<compile_context>
chip_gen: v5e
topology: v5e:2x2
jax: 0.10.0
libtpu: 0.0.40
codegen_flags: <defaults>
</compile_context>

<pallas_src>
import collections

import numpy as np

import jax
import jax.numpy as jnp
from jax.experimental import pallas as pl
from jax.experimental.pallas import tpu as pltpu


_LANES = 128

LayerMeta = collections.namedtuple(
    "LayerMeta",
    ["rh_off", "rh_rows", "rh_cols",
     "t_off", "t_rows", "t_cols",
     "b_off", "b_rows", "b_cols",
     "taps", "mo"])


# ---------------------------------------------------------------------------
# Host-side packing helpers (run once at init, outside the kernel)
# ---------------------------------------------------------------------------
def _sel_tensor(in_size, out_size, ksize, stride, pad, transposed):
    """S[k, i, o] = 1 iff input index i feeds output index o through tap k."""
    S = np.zeros((ksize, in_size, out_size), np.float32)
    for k in range(ksize):
        for o in range(out_size):
            if transposed:
                num = o + pad - k
                if num % stride != 0:
                    continue
                i = num // stride
            else:
                i = stride * o + k - pad
            if 0 <= i < in_size:
                S[k, i, o] = 1.0
    return S


def _bilinear_matrix(in_size, out_size):
    # PyTorch F.interpolate(mode="bilinear", align_corners=False); rows sum to 1.
    dst = np.arange(out_size, dtype=np.float64)
    scale = in_size / out_size
    src = np.maximum((dst + 0.5) * scale - 0.5, 0.0)
    x0f = np.floor(src)
    lam = (src - x0f).astype(np.float32)
    x0 = np.minimum(x0f.astype(np.int64), in_size - 1)
    x1 = np.minimum(x0 + 1, in_size - 1)
    M = np.zeros((out_size, in_size), np.float32)
    M[np.arange(out_size), x0] += 1.0 - lam
    M[np.arange(out_size), x1] += lam
    return M


def _adaptive_pool_matrix(in_size, out_size):
    M = np.zeros((out_size, in_size), np.float32)
    for o in range(out_size):
        s = (o * in_size) // out_size
        e = -(-((o + 1) * in_size) // out_size)  # ceil
        M[o, s:e] = 1.0 / (e - s)
    return M


def _pad_axis(a, axis, size):
    a = np.asarray(a, np.float32)
    if a.shape[axis] == size:
        return a
    pad = [(0, 0)] * a.ndim
    pad[axis] = (0, size - a.shape[axis])
    return np.pad(a, pad)


class _BufBuilder:
    """Stacks 128-column-padded matrices into one flat slab; records offsets."""

    def __init__(self, row_align):
        self.row_align = row_align
        self.chunks = []
        self.rows = 0

    def add(self, mat):
        mat = np.asarray(mat, np.float32)
        r, c = mat.shape
        assert c <= _LANES, (r, c)
        pr = -(-r // self.row_align) * self.row_align
        buf = np.zeros((pr, _LANES), np.float32)
        buf[:r, :c] = mat
        off = self.rows
        self.chunks.append(buf)
        self.rows += pr
        return off, r, c

    def finalize(self, dtype):
        if self.chunks:
            full = np.concatenate(self.chunks, axis=0)
        else:
            full = np.zeros((self.row_align, _LANES), np.float32)
        return jnp.asarray(full, dtype)


# ---------------------------------------------------------------------------
# Parameters (deterministic synthetic init, same shapes as the PyTorch module)
# ---------------------------------------------------------------------------
def init_params(key, image_channels=3, latent_dim=16, base=8):
    params = {}
    state = [key]

    def nk():
        state[0], sub = jax.random.split(state[0])
        return sub

    def conv(name, cout, cin, kh, kw):
        params[name + ".w"] = 0.05 * jax.random.normal(nk(), (cout, cin, kh, kw), jnp.float32)
        params[name + ".b"] = 0.01 * jax.random.normal(nk(), (cout,), jnp.float32)

    def convt(name, cin, cout, kh, kw):
        params[name + ".w"] = 0.05 * jax.random.normal(nk(), (cin, cout, kh, kw), jnp.float32)
        params[name + ".b"] = 0.01 * jax.random.normal(nk(), (cout,), jnp.float32)

    def lin(name, out_f, in_f):
        params[name + ".w"] = 0.05 * jax.random.normal(nk(), (out_f, in_f), jnp.float32)
        params[name + ".b"] = 0.01 * jax.random.normal(nk(), (out_f,), jnp.float32)

    chans = [image_channels, base, base * 2, base * 4]
    for i in range(3):
        conv(f"enc{i}.conv", chans[i + 1], chans[i], 4, 4)
        conv(f"enc{i}.res.conv1", chans[i + 1], chans[i + 1], 3, 3)
        conv(f"enc{i}.res.conv2", chans[i + 1], chans[i + 1], 3, 3)

    feat = base * 4 * 4 * 4
    lin("fc_mu", latent_dim, feat)
    lin("fc_logvar", latent_dim, feat)
    lin("fc_decode", feat, latent_dim)
    conv("h4x4_to_img", image_channels, base * 4, 1, 1)

    convt("dec.up0", base * 4, base * 2, 4, 4)
    conv("dec.res0.conv1", base * 2, base * 2, 3, 3)
    conv("dec.res0.conv2", base * 2, base * 2, 3, 3)
    convt("dec.up1", base * 2, base, 4, 4)
    conv("dec.res1.conv1", base, base, 3, 3)
    conv("dec.res1.conv2", base, base, 3, 3)
    convt("dec.up2", base, image_channels, 4, 4)
    return params


# ---------------------------------------------------------------------------
# Pack all weights (once) into two flat slabs + static layer metadata
# ---------------------------------------------------------------------------
def pack_all(params, image_channels, latent_dim, base, H, W, fold):
    Cp = 4                       # image channels zero-padded 3 -> 4 (lane-dense IO)
    C4 = base * 4
    L = latent_dim
    wb = _BufBuilder(16)         # bf16 matrices: align rows to the (16,128) bf16 tile
    bb = _BufBuilder(8)          # f32 biases:    align rows to the (8,128)  f32 tile
    meta = {}
    p = {k: np.asarray(v, np.float32) for k, v in params.items()}

    def register(name, rh, t, bias, taps, mo):
        assert bias.shape[1] == t.shape[1]
        ro = wb.add(rh)
        to = wb.add(t)
        bo = bb.add(bias)
        meta[name] = LayerMeta(*ro, *to, *bo, taps, mo)

    def block_diag_rows(mat):
        """Block-diagonal replication of `mat` over the folded batch."""
        r, c = mat.shape
        out = np.zeros((fold * r, fold * c), np.float32)
        for n in range(fold):
            out[n * r:(n + 1) * r, n * c:(n + 1) * c] = mat
        return out

    def add_conv(name, w, b, Hin, Win, stride, pad, transposed):
        if transposed:
            Cin, Cout, KH, KW = w.shape
            Ho = (Hin - 1) * stride - 2 * pad + KH
            Wo = (Win - 1) * stride - 2 * pad + KW
            wk = np.transpose(w, (2, 3, 0, 1))            # (KH, KW, Cin, Cout)
        else:
            Cout, Cin, KH, KW = w.shape
            Ho = (Hin + 2 * pad - KH) // stride + 1
            Wo = (Win + 2 * pad - KW) // stride + 1
            wk = np.transpose(w, (2, 3, 1, 0))            # (KH, KW, Cin, Cout)
        Sh = _sel_tensor(Hin, Ho, KH, stride, pad, transposed)    # (KH, Hin, Ho)
        Sw = _sel_tensor(Win, Wo, KW, stride, pad, transposed)    # (KW, Win, Wo)
        t = np.einsum("kwo,hkcd->hwcod", Sw, wk).reshape(KH, Win * Cin, Wo * Cout)
        t_cat = t.reshape(KH * Win * Cin, Wo * Cout)
        rh = np.concatenate([block_diag_rows(Sh[k].T) for k in range(KH)], axis=0)
        bias = np.tile(b, Wo)[None, :]
        register(name, rh, t_cat, bias, taps=KH, mo=fold * Ho)
        return Ho, Wo, Cout

    # ----- encoder: 3x (Conv 4x4 s2 p1 + ReLU + ResBlock) -----
    hh, ww = H, W
    for i in range(3):
        wconv = p[f"enc{i}.conv.w"]
        if i == 0:
            wconv = _pad_axis(wconv, 1, Cp)               # pad input channels (zero taps)
        hh, ww, _ = add_conv(f"enc{i}_conv", wconv, p[f"enc{i}.conv.b"], hh, ww, 2, 1, False)
        add_conv(f"enc{i}_res1", p[f"enc{i}.res.conv1.w"], p[f"enc{i}.res.conv1.b"],
                 hh, ww, 1, 1, False)
        add_conv(f"enc{i}_res2", p[f"enc{i}.res.conv2.w"], p[f"enc{i}.res.conv2.b"],
                 hh, ww, 1, 1, False)

    # ----- pool (folded) + [fc_mu | fc_logvar] in one tap layer -----
    He, We = hh, ww
    Mh_p = _adaptive_pool_matrix(He, 4)                   # (4, He)
    Mw_p = _adaptive_pool_matrix(We, 4)                   # (4, We)
    Tp = np.einsum("pw,cd->wcpd", Mw_p, np.eye(C4, dtype=np.float32)).reshape(We * C4, 4 * C4)

    def fc_row_taps(wfc):                                 # torch flatten(1) order (c, hp, wp)
        out = wfc.shape[0]
        w4 = wfc.reshape(out, C4, 4, 4)
        return np.transpose(w4, (2, 3, 1, 0)).reshape(4, 4 * C4, out)   # [hp, wp*C4+c, out]

    t_full = np.concatenate([fc_row_taps(p["fc_mu.w"]), fc_row_taps(p["fc_logvar.w"])], axis=-1)
    t_comp = np.einsum("wj,hjl->hwl", Tp, t_full).reshape(4 * We * C4, 2 * L)
    rh_fc = np.concatenate([block_diag_rows(Mh_p[hp][None, :]) for hp in range(4)], axis=0)
    bias_fc = np.concatenate([p["fc_mu.b"], p["fc_logvar.b"]])[None, :]
    register("fc_mulv", rh_fc, t_comp, bias_fc, taps=4, mo=fold)

    # ----- fc_decode: z (fold, L) -> h4 (fold*4, 4*C4) -----
    Wd = p["fc_decode.w"]                                 # (C4*16, L)
    bd = p["fc_decode.b"]
    tdec = np.transpose(Wd.reshape(C4, 4, 4, L), (1, 3, 2, 0)).reshape(4, L, 4 * C4)
    t_dec_cat = tdec.reshape(4 * L, 4 * C4)
    rh_dec = np.zeros((4 * 4 * fold, fold), np.float32)
    for r in range(4):
        for n in range(fold):
            rh_dec[r * 4 * fold + n * 4 + r, n] = 1.0
    bias_rows = np.transpose(bd.reshape(C4, 4, 4), (1, 2, 0)).reshape(4, 4 * C4)
    register("fc_decode", rh_dec, t_dec_cat, np.tile(bias_rows, (fold, 1)), taps=4, mo=4 * fold)

    # ----- decoder: 3x (ConvT 4x4 s2 p1 [+ ReLU + ResBlock]) -----
    dh, dw = 4, 4
    for i in range(3):
        wup = p[f"dec.up{i}.w"]
        bup = p[f"dec.up{i}.b"]
        if i == 2:
            wup = _pad_axis(wup, 1, Cp)                   # pad output channels -> lane dense
            bup = _pad_axis(bup, 0, Cp)
        dh, dw, _ = add_conv(f"dec_up{i}", wup, bup, dh, dw, 2, 1, True)
        if i < 2:
            add_conv(f"dec_res{i}_1", p[f"dec.res{i}.conv1.w"], p[f"dec.res{i}.conv1.b"],
                     dh, dw, 1, 1, False)
            add_conv(f"dec_res{i}_2", p[f"dec.res{i}.conv2.w"], p[f"dec.res{i}.conv2.b"],
                     dh, dw, 1, 1, False)

    # ----- final bilinear resize: identity at (H, W) == decoder output -> skip -----
    if (dh, dw) != (H, W):
        Mh = _bilinear_matrix(dh, H)
        Mw = _bilinear_matrix(dw, W)
        t_rs = np.einsum("wp,cd->pcwd", Mw, np.eye(Cp, dtype=np.float32)).reshape(dw * Cp, W * Cp)
        register("resize_out", block_diag_rows(Mh), t_rs,
                 np.zeros((1, W * Cp), np.float32), taps=1, mo=fold * H)

    # ----- h4x4_to_img (1x1 conv) folded into its bilinear resize -----
    w_img = _pad_axis(p["h4x4_to_img.w"], 0, Cp)[:, :, 0, 0]        # (Cp, C4)
    b_img = _pad_axis(p["h4x4_to_img.b"], 0, Cp)                    # (Cp,)
    Mh_r = _bilinear_matrix(4, H)                                   # (H, 4)
    Mw_r = _bilinear_matrix(4, W)                                   # (W, 4)
    T_img = np.einsum("pq,dc->pdqc", np.eye(4, dtype=np.float32), w_img.T).reshape(4 * C4, 4 * Cp)
    T_rw = np.einsum("wp,cd->pcwd", Mw_r, np.eye(Cp, dtype=np.float32)).reshape(4 * Cp, W * Cp)
    bias_himg = np.tile(b_img, 4)[None, :] @ T_rw                   # rows of Mh_r sum to 1
    register("himg", block_diag_rows(Mh_r), T_img @ T_rw, bias_himg, taps=1, mo=fold * H)

    return {
        "wb": wb.finalize(jnp.bfloat16),     # one flat bf16 weight slab
        "bb": bb.finalize(jnp.float32),      # one flat f32 bias slab
        "meta": meta,                        # static python offsets per layer
        "cp": Cp,
        "fold": fold,
    }


# ---------------------------------------------------------------------------
# Fused forward pass: one pallas_call over grid=(batch // fold,)
# ---------------------------------------------------------------------------
def build_forward(packed, N, H, W, image_channels, latent):
    meta = packed["meta"]
    Cp = packed["cp"]
    fold = packed["fold"]
    grid_n = N // fold
    FH = fold * H
    WCp = W * Cp
    wb_shape = tuple(packed["wb"].shape)
    bb_shape = tuple(packed["bb"].shape)

    wb_bytes = int(np.prod(wb_shape)) * 2
    bb_bytes = int(np.prod(bb_shape)) * 4
    vmem_limit = int(min(64 << 20, max(16 << 20, 4 * (wb_bytes + bb_bytes))))

    def kernel(x_ref, eps_ref, wb_ref, bb_ref, img_ref, mulv_ref):
        def layer(name, x, act=None, residual=None):
            m = meta[name]
            rh = wb_ref[m.rh_off:m.rh_off + m.rh_rows, :m.rh_cols]         # bf16 selectors
            g = jnp.dot(rh, x.astype(jnp.bfloat16),
                        preferred_element_type=jnp.float32)
            if m.taps > 1:
                # regroup tap row-blocks into the contraction (lane) dim
                g = jnp.concatenate(
                    [g[k * m.mo:(k + 1) * m.mo, :] for k in range(m.taps)], axis=1)
            t = wb_ref[m.t_off:m.t_off + m.t_rows, :m.t_cols]
            out = jnp.dot(g.astype(jnp.bfloat16), t,
                          preferred_element_type=jnp.float32)
            out = out + bb_ref[m.b_off:m.b_off + m.b_rows, :m.b_cols]
            if residual is not None:
                out = out + residual
            if act == "relu":
                out = jnp.maximum(out, 0.0)
            elif act == "sigmoid":
                out = jax.nn.sigmoid(out)                                   # EUP exp + recip
            return out

        # ---- encoder ----
        h = x_ref[...]
        for i in range(3):
            h = layer(f"enc{i}_conv", h, act="relu")
            r = layer(f"enc{i}_res1", h, act="relu")
            h = layer(f"enc{i}_res2", r, act="relu", residual=h)

        # ---- pool + [mu | logvar] in one matmul pair ----
        mulv = layer("fc_mulv", h)                       # (fold, 2*latent)
        for n in range(fold):
            mulv_ref[n, :, :] = mulv[n:n + 1, :]

        # ---- reparameterize ----
        eps = jnp.concatenate([eps_ref[n] for n in range(fold)], axis=0)    # (fold, latent)
        mu = mulv[:, :latent]
        logvar = mulv[:, latent:2 * latent]
        z = mu + eps * jnp.exp(0.5 * logvar)

        # ---- fc_decode (no VMEM scratch round-trip) ----
        h4 = layer("fc_decode", z)                       # (fold*4, 4*C4)

        # ---- decoder ----
        d = h4
        for i in range(3):
            a = "sigmoid" if i == 2 else "relu"
            d = layer(f"dec_up{i}", d, act=a)
            if i < 2:
                r = layer(f"dec_res{i}_1", d, act="relu")
                d = layer(f"dec_res{i}_2", r, act="relu", residual=d)
        if "resize_out" in meta:                         # identity at 32x32 -> skipped
            d = layer("resize_out", d)
        img_ref[0, :, :] = d                             # recon (lane-dense)

        # ---- h4x4_to_img fused with its bilinear resize ----
        img_ref[1, :, :] = layer("himg", h4)

    def forward(wb, bb, x_nchw, eps):
        x_nhwc = jnp.transpose(x_nchw, (0, 2, 3, 1))
        x_nhwc = jnp.pad(x_nhwc, ((0, 0), (0, 0), (0, 0), (0, Cp - image_channels)))
        x2d = x_nhwc.reshape(N * H, WCp).astype(jnp.float32)

        img, mulv = pl.pallas_call(
            kernel,
            grid=(grid_n,),
            in_specs=[
                pl.BlockSpec((FH, WCp), lambda n: (n, 0)),
                pl.BlockSpec((fold, 1, latent), lambda n: (n, 0, 0)),
                pl.BlockSpec(wb_shape, lambda n: (0, 0)),      # one flat weight slab
                pl.BlockSpec(bb_shape, lambda n: (0, 0)),      # one flat bias slab
            ],
            out_specs=(
                pl.BlockSpec((2, FH, WCp), lambda n: (0, n, 0)),
                pl.BlockSpec((fold, 1, 2 * latent), lambda n: (n, 0, 0)),
            ),
            out_shape=(
                jax.ShapeDtypeStruct((2, N * H, WCp), jnp.float32),   # [recon, h_4x4_img]
                jax.ShapeDtypeStruct((N, 1, 2 * latent), jnp.float32),
            ),
            compiler_params=pltpu.CompilerParams(
                dimension_semantics=("parallel",),
                vmem_limit_bytes=vmem_limit,
            ),
        )(x2d, eps, wb, bb)

        recon = jnp.transpose(
            img[0].reshape(N, H, W, Cp)[..., :image_channels], (0, 3, 1, 2))
        h_img = jnp.transpose(
            img[1].reshape(N, H, W, Cp)[..., :image_channels], (0, 3, 1, 2))
        mu = mulv[:, 0, :latent]
        logvar = mulv[:, 0, latent:]
        return recon, mu, logvar, h_img

    return jax.jit(forward)


def _pick_fold(batch):
    """Fold the batch into matmul M on single-TC chips; keep the grid on multi-TC."""
    try:
        kind = jax.devices()[0].device_kind.lower()
    except Exception:
        kind = ""
    multi_tc = any(t in kind for t in ("v4", "v5p", "7"))
    if multi_tc and batch % 2 == 0:
        return batch // 2
    return batch


if __name__ == "__main__":
    key = jax.random.PRNGKey(0)
    pkey, xkey, ekey = jax.random.split(key, 3)

    image_channels, latent_dim, base = 3, 16, 8
    N, H, W = 2, 32, 32

    params = init_params(pkey, image_channels, latent_dim, base)
    fold = _pick_fold(N)
    packed = pack_all(params, image_channels, latent_dim, base, H, W, fold)
    fwd = build_forward(packed, N, H, W, image_channels, latent_dim)

    x = jax.random.normal(xkey, (N, image_channels, H, W), jnp.float32)
    # eps drawn with JAX RNG outside the kernel (won't bit-match torch.randn_like)
    eps = jax.random.normal(ekey, (N, 1, latent_dim), jnp.float32)

    recon_x, mu, logvar, h_4x4_img = fwd(packed["wb"], packed["bb"], x, eps)
    jax.block_until_ready((recon_x, mu, logvar, h_4x4_img))

    assert recon_x.shape == (N, image_channels, H, W)
    assert mu.shape == (N, latent_dim)
    assert logvar.shape == (N, latent_dim)
    assert h_4x4_img.shape == (N, image_channels, H, W)
    assert bool(jnp.all(jnp.isfinite(recon_x)))
    assert bool(jnp.all(jnp.isfinite(mu)))
    assert bool(jnp.all(jnp.isfinite(logvar)))
    assert bool(jnp.all(jnp.isfinite(h_4x4_img)))
    assert bool(jnp.all(recon_x >= 0.0)) and bool(jnp.all(recon_x <= 1.0))  # sigmoid output
    print("KERNEL_OK")
</pallas_src>

<mosaic_0001>
module attributes {stable_mosaic.version = 11 : i64} {
  func.func @kernel(%arg0: i32, %arg1: memref<64x128xf32, #tpu.memory_space<vmem>>, %arg2: memref<2x1x16xf32, #tpu.memory_space<vmem>>, %arg3: memref<9040x128xbf16, #tpu.memory_space<vmem>>, %arg4: memref<152x128xf32, #tpu.memory_space<vmem>>, %arg5: memref<2x64x128xf32, #tpu.memory_space<vmem>>, %arg6: memref<2x1x32xf32, #tpu.memory_space<vmem>>) attributes {dimension_semantics = [#tpu.dimension_semantics<parallel>], iteration_bounds = array<i64: 1>, scalar_prefetch = 0 : i64, scratch_operands = 0 : i64, tpu.core_type = #tpu.core_type<tc>, window_params = [{transform_indices = @transform_0, window_bounds = array<i64: 64, 128>}, {transform_indices = @transform_1, window_bounds = array<i64: 2, 1, 16>}, {pipeline_mode = #tpu.pipeline_mode<synchronous>, transform_indices = @transform_2, window_bounds = array<i64: 9040, 128>}, {pipeline_mode = #tpu.pipeline_mode<synchronous>, transform_indices = @transform_3, window_bounds = array<i64: 152, 128>}, {transform_indices = @transform_4, window_bounds = array<i64: 2, 64, 128>}, {transform_indices = @transform_5, window_bounds = array<i64: 2, 1, 32>}]} {
    %c0 = arith.constant 0 : index
    %c0_0 = arith.constant 0 : index
    %0 = vector.load %arg1[%c0, %c0_0] : memref<64x128xf32, #tpu.memory_space<vmem>>, vector<64x128xf32>
    %c0_1 = arith.constant 0 : index
    %c0_2 = arith.constant 0 : index
    %1 = vector.load %arg3[%c0_1, %c0_2] : memref<9040x128xbf16, #tpu.memory_space<vmem>>, vector<128x64xbf16>
    %2 = arith.truncf %0 : vector<64x128xf32> to vector<64x128xbf16>
    %cst = arith.constant dense<0.000000e+00> : vector<128x128xf32>
    %3 = tpu.matmul %1, %2, %cst {dimension_numbers = #tpu.dot_dimension_numbers<[1], [0], [0], [1], [0, 0, 1, 1], [], []>} : vector<128x64xbf16>, vector<64x128xbf16>, vector<128x128xf32> -> vector<128x128xf32>
    %4 = vector.extract_strided_slice %3 {offsets = [0, 0], sizes = [32, 128], strides = [1, 1]} : vector<128x128xf32> to vector<32x128xf32>
    %5 = vector.extract_strided_slice %3 {offsets = [32, 0], sizes = [32, 128], strides = [1, 1]} : vector<128x128xf32> to vector<32x128xf32>
    %6 = vector.extract_strided_slice %3 {offsets = [64, 0], sizes = [32, 128], strides = [1, 1]} : vector<128x128xf32> to vector<32x128xf32>
    %7 = vector.extract_strided_slice %3 {offsets = [96, 0], sizes = [32, 128], strides = [1, 1]} : vector<128x128xf32> to vector<32x128xf32>
    %8 = tpu.concatenate %4, %5, %6, %7 in 1 : vector<32x128xf32>, vector<32x128xf32>, vector<32x128xf32>, vector<32x128xf32> -> vector<32x512xf32>
    %c128 = arith.constant 128 : index
    %c0_3 = arith.constant 0 : index
    %9 = vector.load %arg3[%c128, %c0_3] : memref<9040x128xbf16, #tpu.memory_space<vmem>>, vector<512x128xbf16>
    %10 = arith.truncf %8 : vector<32x512xf32> to vector<32x512xbf16>
    %cst_4 = arith.constant dense<0.000000e+00> : vector<32x128xf32>
    %11 = tpu.matmul %10, %9, %cst_4 {dimension_numbers = #tpu.dot_dimension_numbers<[1], [0], [0], [1], [0, 0, 1, 1], [], []>} : vector<32x512xbf16>, vector<512x128xbf16>, vector<32x128xf32> -> vector<32x128xf32>
    %c0_5 = arith.constant 0 : index
    %c0_6 = arith.constant 0 : index
    %12 = vector.load %arg4[%c0_5, %c0_6] : memref<152x128xf32, #tpu.memory_space<vmem>>, vector<1x128xf32>
    %13 = vector.broadcast %12 : vector<1x128xf32> to vector<32x128xf32>
    %14 = arith.addf %11, %13 : vector<32x128xf32>
    %cst_7 = arith.constant 0.000000e+00 : f32
    %15 = vector.broadcast %cst_7 : f32 to vector<32x128xf32>
    %16 = arith.maximumf %14, %15 : vector<32x128xf32>
    %c640 = arith.constant 640 : index
    %c0_8 = arith.constant 0 : index
    %17 = vector.load %arg3[%c640, %c0_8] : memref<9040x128xbf16, #tpu.memory_space<vmem>>, vector<96x32xbf16>
    %18 = arith.truncf %16 : vector<32x128xf32> to vector<32x128xbf16>
    %cst_9 = arith.constant dense<0.000000e+00> : vector<96x128xf32>
    %19 = tpu.matmul %17, %18, %cst_9 {dimension_numbers = #tpu.dot_dimension_numbers<[1], [0], [0], [1], [0, 0, 1, 1], [], []>} : vector<96x32xbf16>, vector<32x128xbf16>, vector<96x128xf32> -> vector<96x128xf32>
    %20 = vector.extract_strided_slice %19 {offsets = [0, 0], sizes = [32, 128], strides = [1, 1]} : vector<96x128xf32> to vector<32x128xf32>
    %21 = vector.extract_strided_slice %19 {offsets = [32, 0], sizes = [32, 128], strides = [1, 1]} : vector<96x128xf32> to vector<32x128xf32>
    %22 = vector.extract_strided_slice %19 {offsets = [64, 0], sizes = [32, 128], strides = [1, 1]} : vector<96x128xf32> to vector<32x128xf32>
    %23 = tpu.concatenate %20, %21, %22 in 1 : vector<32x128xf32>, vector<32x128xf32>, vector<32x128xf32> -> vector<32x384xf32>
    %c736 = arith.constant 736 : index
    %c0_10 = arith.constant 0 : index
    %24 = vector.load %arg3[%c736, %c0_10] : memref<9040x128xbf16, #tpu.memory_space<vmem>>, vector<384x128xbf16>
    %25 = arith.truncf %23 : vector<32x384xf32> to vector<32x384xbf16>
    %cst_11 = arith.constant dense<0.000000e+00> : vector<32x128xf32>
    %26 = tpu.matmul %25, %24, %cst_11 {dimension_numbers = #tpu.dot_dimension_numbers<[1], [0], [0], [1], [0, 0, 1, 1], [], []>} : vector<32x384xbf16>, vector<384x128xbf16>, vector<32x128xf32> -> vector<32x128xf32>
    %c8 = arith.constant 8 : index
    %c0_12 = arith.constant 0 : index
    %27 = vector.load %arg4[%c8, %c0_12] : memref<152x128xf32, #tpu.memory_space<vmem>>, vector<1x128xf32>
    %28 = vector.broadcast %27 : vector<1x128xf32> to vector<32x128xf32>
    %29 = arith.addf %26, %28 : vector<32x128xf32>
    %cst_13 = arith.constant 0.000000e+00 : f32
    %30 = vector.broadcast %cst_13 : f32 to vector<32x128xf32>
    %31 = arith.maximumf %29, %30 : vector<32x128xf32>
    %c1120 = arith.constant 1120 : index
    %c0_14 = arith.constant 0 : index
    %32 = vector.load %arg3[%c1120, %c0_14] : memref<9040x128xbf16, #tpu.memory_space<vmem>>, vector<96x32xbf16>
    %33 = arith.truncf %31 : vector<32x128xf32> to vector<32x128xbf16>
    %cst_15 = arith.constant dense<0.000000e+00> : vector<96x128xf32>
    %34 = tpu.matmul %32, %33, %cst_15 {dimension_numbers = #tpu.dot_dimension_numbers<[1], [0], [0], [1], [0, 0, 1, 1], [], []>} : vector<96x32xbf16>, vector<32x128xbf16>, vector<96x128xf32> -> vector<96x128xf32>
    %35 = vector.extract_strided_slice %34 {offsets = [0, 0], sizes = [32, 128], strides = [1, 1]} : vector<96x128xf32> to vector<32x128xf32>
    %36 = vector.extract_strided_slice %34 {offsets = [32, 0], sizes = [32, 128], strides = [1, 1]} : vector<96x128xf32> to vector<32x128xf32>
    %37 = vector.extract_strided_slice %34 {offsets = [64, 0], sizes = [32, 128], strides = [1, 1]} : vector<96x128xf32> to vector<32x128xf32>
    %38 = tpu.concatenate %35, %36, %37 in 1 : vector<32x128xf32>, vector<32x128xf32>, vector<32x128xf32> -> vector<32x384xf32>
    %c1216 = arith.constant 1216 : index
    %c0_16 = arith.constant 0 : index
    %39 = vector.load %arg3[%c1216, %c0_16] : memref<9040x128xbf16, #tpu.memory_space<vmem>>, vector<384x128xbf16>
    %40 = arith.truncf %38 : vector<32x384xf32> to vector<32x384xbf16>
    %cst_17 = arith.constant dense<0.000000e+00> : vector<32x128xf32>
    %41 = tpu.matmul %40, %39, %cst_17 {dimension_numbers = #tpu.dot_dimension_numbers<[1], [0], [0], [1], [0, 0, 1, 1], [], []>} : vector<32x384xbf16>, vector<384x128xbf16>, vector<32x128xf32> -> vector<32x128xf32>
    %c16 = arith.constant 16 : index
    %c0_18 = arith.constant 0 : index
    %42 = vector.load %arg4[%c16, %c0_18] : memref<152x128xf32, #tpu.memory_space<vmem>>, vector<1x128xf32>
    %43 = vector.broadcast %42 : vector<1x128xf32> to vector<32x128xf32>
    %44 = arith.addf %41, %43 : vector<32x128xf32>
    %45 = arith.addf %44, %16 : vector<32x128xf32>
    %cst_19 = arith.constant 0.000000e+00 : f32
    %46 = vector.broadcast %cst_19 : f32 to vector<32x128xf32>
    %47 = arith.maximumf %45, %46 : vector<32x128xf32>
    %c1600 = arith.constant 1600 : index
    %c0_20 = arith.constant 0 : index
    %48 = vector.load %arg3[%c1600, %c0_20] : memref<9040x128xbf16, #tpu.memory_space<vmem>>, vector<64x32xbf16>
    %49 = arith.truncf %47 : vector<32x128xf32> to vector<32x128xbf16>
    %cst_21 = arith.constant dense<0.000000e+00> : vector<64x128xf32>
    %50 = tpu.matmul %48, %49, %cst_21 {dimension_numbers = #tpu.dot_dimension_numbers<[1], [0], [0], [1], [0, 0, 1, 1], [], []>} : vector<64x32xbf16>, vector<32x128xbf16>, vector<64x128xf32> -> vector<64x128xf32>
    %51 = vector.extract_strided_slice %50 {offsets = [0, 0], sizes = [16, 128], strides = [1, 1]} : vector<64x128xf32> to vector<16x128xf32>
    %52 = vector.extract_strided_slice %50 {offsets = [16, 0], sizes = [16, 128], strides = [1, 1]} : vector<64x128xf32> to vector<16x128xf32>
    %53 = vector.extract_strided_slice %50 {offsets = [32, 0], sizes = [16, 128], strides = [1, 1]} : vector<64x128xf32> to vector<16x128xf32>
    %54 = vector.extract_strided_slice %50 {offsets = [48, 0], sizes = [16, 128], strides = [1, 1]} : vector<64x128xf32> to vector<16x128xf32>
    %55 = tpu.concatenate %51, %52, %53, %54 in 1 : vector<16x128xf32>, vector<16x128xf32>, vector<16x128xf32>, vector<16x128xf32> -> vector<16x512xf32>
    %c1664 = arith.constant 1664 : index
    %c0_22 = arith.constant 0 : index
    %56 = vector.load %arg3[%c1664, %c0_22] : memref<9040x128xbf16, #tpu.memory_space<vmem>>, vector<512x128xbf16>
    %57 = arith.truncf %55 : vector<16x512xf32> to vector<16x512xbf16>
    %cst_23 = arith.constant dense<0.000000e+00> : vector<16x128xf32>
    %58 = tpu.matmul %57, %56, %cst_23 {dimension_numbers = #tpu.dot_dimension_numbers<[1], [0], [0], [1], [0, 0, 1, 1], [], []>} : vector<16x512xbf16>, vector<512x128xbf16>, vector<16x128xf32> -> vector<16x128xf32>
    %c24 = arith.constant 24 : index
    %c0_24 = arith.constant 0 : index
    %59 = vector.load %arg4[%c24, %c0_24] : memref<152x128xf32, #tpu.memory_space<vmem>>, vector<1x128xf32>
    %60 = vector.broadcast %59 : vector<1x128xf32> to vector<16x128xf32>
    %61 = arith.addf %58, %60 : vector<16x128xf32>
    %cst_25 = arith.constant 0.000000e+00 : f32
    %62 = vector.broadcast %cst_25 : f32 to vector<16x128xf32>
    %63 = arith.maximumf %61, %62 : vector<16x128xf32>
    %c2176 = arith.constant 2176 : index
    %c0_26 = arith.constant 0 : index
    %64 = vector.load %arg3[%c2176, %c0_26] : memref<9040x128xbf16, #tpu.memory_space<vmem>>, vector<48x16xbf16>
    %65 = arith.truncf %63 : vector<16x128xf32> to vector<16x128xbf16>
    %cst_27 = arith.constant dense<0.000000e+00> : vector<48x128xf32>
    %66 = tpu.matmul %64, %65, %cst_27 {dimension_numbers = #tpu.dot_dimension_numbers<[1], [0], [0], [1], [0, 0, 1, 1], [], []>} : vector<48x16xbf16>, vector<16x128xbf16>, vector<48x128xf32> -> vector<48x128xf32>
    %67 = vector.extract_strided_slice %66 {offsets = [0, 0], sizes = [16, 128], strides = [1, 1]} : vector<48x128xf32> to vector<16x128xf32>
    %68 = vector.extract_strided_slice %66 {offsets = [16, 0], sizes = [16, 128], strides = [1, 1]} : vector<48x128xf32> to vector<16x128xf32>
    %69 = vector.extract_strided_slice %66 {offsets = [32, 0], sizes = [16, 128], strides = [1, 1]} : vector<48x128xf32> to vector<16x128xf32>
    %70 = tpu.concatenate %67, %68, %69 in 1 : vector<16x128xf32>, vector<16x128xf32>, vector<16x128xf32> -> vector<16x384xf32>
    %c2224 = arith.constant 2224 : index
    %c0_28 = arith.constant 0 : index
    %71 = vector.load %arg3[%c2224, %c0_28] : memref<9040x128xbf16, #tpu.memory_space<vmem>>, vector<384x128xbf16>
    %72 = arith.truncf %70 : vector<16x384xf32> to vector<16x384xbf16>
    %cst_29 = arith.constant dense<0.000000e+00> : vector<16x128xf32>
    %73 = tpu.matmul %72, %71, %cst_29 {dimension_numbers = #tpu.dot_dimension_numbers<[1], [0], [0], [1], [0, 0, 1, 1], [], []>} : vector<16x384xbf16>, vector<384x128xbf16>, vector<16x128xf32> -> vector<16x128xf32>
    %c32 = arith.constant 32 : index
    %c0_30 = arith.constant 0 : index
    %74 = vector.load %arg4[%c32, %c0_30] : memref<152x128xf32, #tpu.memory_space<vmem>>, vector<1x128xf32>
    %75 = vector.broadcast %74 : vector<1x128xf32> to vector<16x128xf32>
    %76 = arith.addf %73, %75 : vector<16x128xf32>
    %cst_31 = arith.constant 0.000000e+00 : f32
    %77 = vector.broadcast %cst_31 : f32 to vector<16x128xf32>
    %78 = arith.maximumf %76, %77 : vector<16x128xf32>
    %c2608 = arith.constant 2608 : index
    %c0_32 = arith.constant 0 : index
    %79 = vector.load %arg3[%c2608, %c0_32] : memref<9040x128xbf16, #tpu.memory_space<vmem>>, vector<48x16xbf16>
    %80 = arith.truncf %78 : vector<16x128xf32> to vector<16x128xbf16>
    %cst_33 = arith.constant dense<0.000000e+00> : vector<48x128xf32>
    %81 = tpu.matmul %79, %80, %cst_33 {dimension_numbers = #tpu.dot_dimension_numbers<[1], [0], [0], [1], [0, 0, 1, 1], [], []>} : vector<48x16xbf16>, vector<16x128xbf16>, vector<48x128xf32> -> vector<48x128xf32>
    %82 = vector.extract_strided_slice %81 {offsets = [0, 0], sizes = [16, 128], strides = [1, 1]} : vector<48x128xf32> to vector<16x128xf32>
    %83 = vector.extract_strided_slice %81 {offsets = [16, 0], sizes = [16, 128], strides = [1, 1]} : vector<48x128xf32> to vector<16x128xf32>
    %84 = vector.extract_strided_slice %81 {offsets = [32, 0], sizes = [16, 128], strides = [1, 1]} : vector<48x128xf32> to vector<16x128xf32>
    %85 = tpu.concatenate %82, %83, %84 in 1 : vector<16x128xf32>, vector<16x128xf32>, vector<16x128xf32> -> vector<16x384xf32>
    %c2656 = arith.constant 2656 : index
    %c0_34 = arith.constant 0 : index
    %86 = vector.load %arg3[%c2656, %c0_34] : memref<9040x128xbf16, #tpu.memory_space<vmem>>, vector<384x128xbf16>
    %87 = arith.truncf %85 : vector<16x384xf32> to vector<16x384xbf16>
    %cst_35 = arith.constant dense<0.000000e+00> : vector<16x128xf32>
    %88 = tpu.matmul %87, %86, %cst_35 {dimension_numbers = #tpu.dot_dimension_numbers<[1], [0], [0], [1], [0, 0, 1, 1], [], []>} : vector<16x384xbf16>, vector<384x128xbf16>, vector<16x128xf32> -> vector<16x128xf32>
    %c40 = arith.constant 40 : index
    %c0_36 = arith.constant 0 : index
    %89 = vector.load %arg4[%c40, %c0_36] : memref<152x128xf32, #tpu.memory_space<vmem>>, vector<1x128xf32>
    %90 = vector.broadcast %89 : vector<1x128xf32> to vector<16x128xf32>
    %91 = arith.addf %88, %90 : vector<16x128xf32>
    %92 = arith.addf %91, %63 : vector<16x128xf32>
    %cst_37 = arith.constant 0.000000e+00 : f32
    %93 = vector.broadcast %cst_37 : f32 to vector<16x128xf32>
    %94 = arith.maximumf %92, %93 : vector<16x128xf32>
    %c3040 = arith.constant 3040 : index
    %c0_38 = arith.constant 0 : index
    %95 = vector.load %arg3[%c3040, %c0_38] : memref<9040x128xbf16, #tpu.memory_space<vmem>>, vector<32x16xbf16>
    %96 = arith.truncf %94 : vector<16x128xf32> to vector<16x128xbf16>
    %cst_39 = arith.constant dense<0.000000e+00> : vector<32x128xf32>
    %97 = tpu.matmul %95, %96, %cst_39 {dimension_numbers = #tpu.dot_dimension_numbers<[1], [0], [0], [1], [0, 0, 1, 1], [], []>} : vector<32x16xbf16>, vector<16x128xbf16>, vector<32x128xf32> -> vector<32x128xf32>
    %98 = vector.extract_strided_slice %97 {offsets = [0, 0], sizes = [8, 128], strides = [1, 1]} : vector<32x128xf32> to vector<8x128xf32>
    %99 = vector.extract_strided_slice %97 {offsets = [8, 0], sizes = [8, 128], strides = [1, 1]} : vector<32x128xf32> to vector<8x128xf32>
    %100 = vector.extract_strided_slice %97 {offsets = [16, 0], sizes = [8, 128], strides = [1, 1]} : vector<32x128xf32> to vector<8x128xf32>
    %101 = vector.extract_strided_slice %97 {offsets = [24, 0], sizes = [8, 128], strides = [1, 1]} : vector<32x128xf32> to vector<8x128xf32>
    %102 = tpu.concatenate %98, %99, %100, %101 in 1 : vector<8x128xf32>, vector<8x128xf32>, vector<8x128xf32>, vector<8x128xf32> -> vector<8x512xf32>
    %c3072 = arith.constant 3072 : index
    %c0_40 = arith.constant 0 : index
    %103 = vector.load %arg3[%c3072, %c0_40] : memref<9040x128xbf16, #tpu.memory_space<vmem>>, vector<512x128xbf16>
    %104 = arith.truncf %102 : vector<8x512xf32> to vector<8x512xbf16>
    %cst_41 = arith.constant dense<0.000000e+00> : vector<8x128xf32>
    %105 = tpu.matmul %104, %103, %cst_41 {dimension_numbers = #tpu.dot_dimension_numbers<[1], [0], [0], [1], [0, 0, 1, 1], [], []>} : vector<8x512xbf16>, vector<512x128xbf16>, vector<8x128xf32> -> vector<8x128xf32>
    %c48 = arith.constant 48 : index
    %c0_42 = arith.constant 0 : index
    %106 = vector.load %arg4[%c48, %c0_42] : memref<152x128xf32, #tpu.memory_space<vmem>>, vector<1x128xf32>
    %107 = vector.broadcast %106 : vector<1x128xf32> to vector<8x128xf32>
    %108 = arith.addf %105, %107 : vector<8x128xf32>
    %cst_43 = arith.constant 0.000000e+00 : f32
    %109 = vector.broadcast %cst_43 : f32 to vector<8x128xf32>
    %110 = arith.maximumf %108, %109 : vector<8x128xf32>
    %c3584 = arith.constant 3584 : index
    %c0_44 = arith.constant 0 : index
    %111 = vector.load %arg3[%c3584, %c0_44] : memref<9040x128xbf16, #tpu.memory_space<vmem>>, vector<24x8xbf16>
    %112 = arith.truncf %110 : vector<8x128xf32> to vector<8x128xbf16>
    %cst_45 = arith.constant dense<0.000000e+00> : vector<24x128xf32>
    %113 = tpu.matmul %111, %112, %cst_45 {dimension_numbers = #tpu.dot_dimension_numbers<[1], [0], [0], [1], [0, 0, 1, 1], [], []>} : vector<24x8xbf16>, vector<8x128xbf16>, vector<24x128xf32> -> vector<24x128xf32>
    %114 = vector.extract_strided_slice %113 {offsets = [0, 0], sizes = [8, 128], strides = [1, 1]} : vector<24x128xf32> to vector<8x128xf32>
    %115 = vector.extract_strided_slice %113 {offsets = [8, 0], sizes = [8, 128], strides = [1, 1]} : vector<24x128xf32> to vector<8x128xf32>
    %116 = vector.extract_strided_slice %113 {offsets = [16, 0], sizes = [8, 128], strides = [1, 1]} : vector<24x128xf32> to vector<8x128xf32>
    %117 = tpu.concatenate %114, %115, %116 in 1 : vector<8x128xf32>, vector<8x128xf32>, vector<8x128xf32> -> vector<8x384xf32>
    %c3616 = arith.constant 3616 : index
    %c0_46 = arith.constant 0 : index
    %118 = vector.load %arg3[%c3616, %c0_46] : memref<9040x128xbf16, #tpu.memory_space<vmem>>, vector<384x128xbf16>
    %119 = arith.truncf %117 : vector<8x384xf32> to vector<8x384xbf16>
    %cst_47 = arith.constant dense<0.000000e+00> : vector<8x128xf32>
    %120 = tpu.matmul %119, %118, %cst_47 {dimension_numbers = #tpu.dot_dimension_numbers<[1], [0], [0], [1], [0, 0, 1, 1], [], []>} : vector<8x384xbf16>, vector<384x128xbf16>, vector<8x128xf32> -> vector<8x128xf32>
    %c56 = arith.constant 56 : index
    %c0_48 = arith.constant 0 : index
    %121 = vector.load %arg4[%c56, %c0_48] : memref<152x128xf32, #tpu.memory_space<vmem>>, vector<1x128xf32>
    %122 = vector.broadcast %121 : vector<1x128xf32> to vector<8x128xf32>
    %123 = arith.addf %120, %122 : vector<8x128xf32>
    %cst_49 = arith.constant 0.000000e+00 : f32
    %124 = vector.broadcast %cst_49 : f32 to vector<8x128xf32>
    %125 = arith.maximumf %123, %124 : vector<8x128xf32>
    %c4000 = arith.constant 4000 : index
    %c0_50 = arith.constant 0 : index
    %126 = vector.load %arg3[%c4000, %c0_50] : memref<9040x128xbf16, #tpu.memory_space<vmem>>, vector<24x8xbf16>
    %127 = arith.truncf %125 : vector<8x128xf32> to vector<8x128xbf16>
    %cst_51 = arith.constant dense<0.000000e+00> : vector<24x128xf32>
    %128 = tpu.matmul %126, %127, %cst_51 {dimension_numbers = #tpu.dot_dimension_numbers<[1], [0], [0], [1], [0, 0, 1, 1], [], []>} : vector<24x8xbf16>, vector<8x128xbf16>, vector<24x128xf32> -> vector<24x128xf32>
    %129 = vector.extract_strided_slice %128 {offsets = [0, 0], sizes = [8, 128], strides = [1, 1]} : vector<24x128xf32> to vector<8x128xf32>
    %130 = vector.extract_strided_slice %128 {offsets = [8, 0], sizes = [8, 128], strides = [1, 1]} : vector<24x128xf32> to vector<8x128xf32>
    %131 = vector.extract_strided_slice %128 {offsets = [16, 0], sizes = [8, 128], strides = [1, 1]} : vector<24x128xf32> to vector<8x128xf32>
    %132 = tpu.concatenate %129, %130, %131 in 1 : vector<8x128xf32>, vector<8x128xf32>, vector<8x128xf32> -> vector<8x384xf32>
    %c4032 = arith.constant 4032 : index
    %c0_52 = arith.constant 0 : index
    %133 = vector.load %arg3[%c4032, %c0_52] : memref<9040x128xbf16, #tpu.memory_space<vmem>>, vector<384x128xbf16>
    %134 = arith.truncf %132 : vector<8x384xf32> to vector<8x384xbf16>
    %cst_53 = arith.constant dense<0.000000e+00> : vector<8x128xf32>
    %135 = tpu.matmul %134, %133, %cst_53 {dimension_numbers = #tpu.dot_dimension_numbers<[1], [0], [0], [1], [0, 0, 1, 1], [], []>} : vector<8x384xbf16>, vector<384x128xbf16>, vector<8x128xf32> -> vector<8x128xf32>
    %c64 = arith.constant 64 : index
    %c0_54 = arith.constant 0 : index
    %136 = vector.load %arg4[%c64, %c0_54] : memref<152x128xf32, #tpu.memory_space<vmem>>, vector<1x128xf32>
    %137 = vector.broadcast %136 : vector<1x128xf32> to vector<8x128xf32>
    %138 = arith.addf %135, %137 : vector<8x128xf32>
    %139 = arith.addf %138, %110 : vector<8x128xf32>
    %cst_55 = arith.constant 0.000000e+00 : f32
    %140 = vector.broadcast %cst_55 : f32 to vector<8x128xf32>
    %141 = arith.maximumf %139, %140 : vector<8x128xf32>
    %c4416 = arith.constant 4416 : index
    %c0_56 = arith.constant 0 : index
    %142 = vector.load %arg3[%c4416, %c0_56] : memref<9040x128xbf16, #tpu.memory_space<vmem>>, vector<8x8xbf16>
    %143 = arith.truncf %141 : vector<8x128xf32> to vector<8x128xbf16>
    %cst_57 = arith.constant dense<0.000000e+00> : vector<8x128xf32>
    %144 = tpu.matmul %142, %143, %cst_57 {dimension_numbers = #tpu.dot_dimension_numbers<[1], [0], [0], [1], [0, 0, 1, 1], [], []>} : vector<8x8xbf16>, vector<8x128xbf16>, vector<8x128xf32> -> vector<8x128xf32>
    %145 = vector.extract_strided_slice %144 {offsets = [0, 0], sizes = [2, 128], strides = [1, 1]} : vector<8x128xf32> to vector<2x128xf32>
    %146 = vector.extract_strided_slice %144 {offsets = [2, 0], sizes = [2, 128], strides = [1, 1]} : vector<8x128xf32> to vector<2x128xf32>
    %147 = vector.extract_strided_slice %144 {offsets = [4, 0], sizes = [2, 128], strides = [1, 1]} : vector<8x128xf32> to vector<2x128xf32>
    %148 = vector.extract_strided_slice %144 {offsets = [6, 0], sizes = [2, 128], strides = [1, 1]} : vector<8x128xf32> to vector<2x128xf32>
    %149 = tpu.concatenate %145, %146, %147, %148 in 1 : vector<2x128xf32>, vector<2x128xf32>, vector<2x128xf32>, vector<2x128xf32> -> vector<2x512xf32>
    %c4432 = arith.constant 4432 : index
    %c0_58 = arith.constant 0 : index
    %150 = vector.load %arg3[%c4432, %c0_58] : memref<9040x128xbf16, #tpu.memory_space<vmem>>, vector<512x32xbf16>
    %151 = arith.truncf %149 : vector<2x512xf32> to vector<2x512xbf16>
    %cst_59 = arith.constant dense<0.000000e+00> : vector<2x32xf32>
    %152 = tpu.matmul %151, %150, %cst_59 {dimension_numbers = #tpu.dot_dimension_numbers<[1], [0], [0], [1], [0, 0, 1, 1], [], []>} : vector<2x512xbf16>, vector<512x32xbf16>, vector<2x32xf32> -> vector<2x32xf32>
    %c72 = arith.constant 72 : index
    %c0_60 = arith.constant 0 : index
    %153 = vector.load %arg4[%c72, %c0_60] : memref<152x128xf32, #tpu.memory_space<vmem>>, vector<1x32xf32>
    %154 = vector.broadcast %153 : vector<1x32xf32> to vector<2x32xf32>
    %155 = arith.addf %152, %154 : vector<2x32xf32>
    %156 = vector.extract_strided_slice %155 {offsets = [0, 0], sizes = [1, 32], strides = [1, 1]} : vector<2x32xf32> to vector<1x32xf32>
    %c0_61 = arith.constant 0 : index
    %c0_62 = arith.constant 0 : index
    %c0_63 = arith.constant 0 : index
    %157 = vector.load %arg6[%c0_61, %c0_62, %c0_63] : memref<2x1x32xf32, #tpu.memory_space<vmem>>, vector<1x1x32xf32>
    %158 = vector.shape_cast %157 : vector<1x1x32xf32> to vector<1x32xf32>
    %159 = vector.shape_cast %156 : vector<1x32xf32> to vector<1x1x32xf32>
    tpu.vector_store %arg6[%c0_61, %c0_62, %c0_63], %159 {strides = array<i32>} : memref<2x1x32xf32, #tpu.memory_space<vmem>>, vector<1x1x32xf32>,
    %160 = vector.extract_strided_slice %155 {offsets = [1, 0], sizes = [1, 32], strides = [1, 1]} : vector<2x32xf32> to vector<1x32xf32>
    %c1 = arith.constant 1 : index
    %c0_64 = arith.constant 0 : index
    %c0_65 = arith.constant 0 : index
    %161 = vector.load %arg6[%c1, %c0_64, %c0_65] : memref<2x1x32xf32, #tpu.memory_space<vmem>>, vector<1x1x32xf32>
    %162 = vector.shape_cast %161 : vector<1x1x32xf32> to vector<1x32xf32>
    %163 = vector.shape_cast %160 : vector<1x32xf32> to vector<1x1x32xf32>
    tpu.vector_store %arg6[%c1, %c0_64, %c0_65], %163 {strides = array<i32>} : memref<2x1x32xf32, #tpu.memory_space<vmem>>, vector<1x1x32xf32>,
    %c0_66 = arith.constant 0 : index
    %c0_67 = arith.constant 0 : index
    %c0_68 = arith.constant 0 : index
    %164 = vector.load %arg2[%c0_66, %c0_67, %c0_68] : memref<2x1x16xf32, #tpu.memory_space<vmem>>, vector<1x1x16xf32>
    %165 = vector.shape_cast %164 : vector<1x1x16xf32> to vector<1x16xf32>
    %c1_69 = arith.constant 1 : index
    %c0_70 = arith.constant 0 : index
    %c0_71 = arith.constant 0 : index
    %166 = vector.load %arg2[%c1_69, %c0_70, %c0_71] : memref<2x1x16xf32, #tpu.memory_space<vmem>>, vector<1x1x16xf32>
    %167 = vector.shape_cast %166 : vector<1x1x16xf32> to vector<1x16xf32>
    %168 = tpu.concatenate %165, %167 in 0 : vector<1x16xf32>, vector<1x16xf32> -> vector<2x16xf32>
    %169 = vector.extract_strided_slice %155 {offsets = [0, 0], sizes = [2, 16], strides = [1, 1]} : vector<2x32xf32> to vector<2x16xf32>
    %170 = vector.extract_strided_slice %155 {offsets = [0, 16], sizes = [2, 16], strides = [1, 1]} : vector<2x32xf32> to vector<2x16xf32>
    %cst_72 = arith.constant 5.000000e-01 : f32
    %171 = vector.broadcast %cst_72 : f32 to vector<2x16xf32>
    %172 = arith.mulf %171, %170 : vector<2x16xf32>
    %173 = math.exp %172 : vector<2x16xf32>
    %174 = arith.mulf %168, %173 : vector<2x16xf32>
    %175 = arith.addf %169, %174 : vector<2x16xf32>
    %c4944 = arith.constant 4944 : index
    %c0_73 = arith.constant 0 : index
    %176 = vector.load %arg3[%c4944, %c0_73] : memref<9040x128xbf16, #tpu.memory_space<vmem>>, vector<32x2xbf16>
    %177 = arith.truncf %175 : vector<2x16xf32> to vector<2x16xbf16>
    %cst_74 = arith.constant dense<0.000000e+00> : vector<32x16xf32>
    %178 = tpu.matmul %176, %177, %cst_74 {dimension_numbers = #tpu.dot_dimension_numbers<[1], [0], [0], [1], [0, 0, 1, 1], [], []>} : vector<32x2xbf16>, vector<2x16xbf16>, vector<32x16xf32> -> vector<32x16xf32>
    %179 = vector.extract_strided_slice %178 {offsets = [0, 0], sizes = [8, 16], strides = [1, 1]} : vector<32x16xf32> to vector<8x16xf32>
    %180 = vector.extract_strided_slice %178 {offsets = [8, 0], sizes = [8, 16], strides = [1, 1]} : vector<32x16xf32> to vector<8x16xf32>
    %181 = vector.extract_strided_slice %178 {offsets = [16, 0], sizes = [8, 16], strides = [1, 1]} : vector<32x16xf32> to vector<8x16xf32>
    %182 = vector.extract_strided_slice %178 {offsets = [24, 0], sizes = [8, 16], strides = [1, 1]} : vector<32x16xf32> to vector<8x16xf32>
    %183 = tpu.concatenate %179, %180, %181, %182 in 1 : vector<8x16xf32>, vector<8x16xf32>, vector<8x16xf32>, vector<8x16xf32> -> vector<8x64xf32>
    %c4976 = arith.constant 4976 : index
    %c0_75 = arith.constant 0 : index
    %184 = vector.load %arg3[%c4976, %c0_75] : memref<9040x128xbf16, #tpu.memory_space<vmem>>, vector<64x128xbf16>
    %185 = arith.truncf %183 : vector<8x64xf32> to vector<8x64xbf16>
    %cst_76 = arith.constant dense<0.000000e+00> : vector<8x128xf32>
    %186 = tpu.matmul %185, %184, %cst_76 {dimension_numbers = #tpu.dot_dimension_numbers<[1], [0], [0], [1], [0, 0, 1, 1], [], []>} : vector<8x64xbf16>, vector<64x128xbf16>, vector<8x128xf32> -> vector<8x128xf32>
    %c80 = arith.constant 80 : index
    %c0_77 = arith.constant 0 : index
    %187 = vector.load %arg4[%c80, %c0_77] : memref<152x128xf32, #tpu.memory_space<vmem>>, vector<8x128xf32>
    %188 = arith.addf %186, %187 : vector<8x128xf32>
    %c5040 = arith.constant 5040 : index
    %c0_78 = arith.constant 0 : index
    %189 = vector.load %arg3[%c5040, %c0_78] : memref<9040x128xbf16, #tpu.memory_space<vmem>>, vector<64x8xbf16>
    %190 = arith.truncf %188 : vector<8x128xf32> to vector<8x128xbf16>
    %cst_79 = arith.constant dense<0.000000e+00> : vector<64x128xf32>
    %191 = tpu.matmul %189, %190, %cst_79 {dimension_numbers = #tpu.dot_dimension_numbers<[1], [0], [0], [1], [0, 0, 1, 1], [], []>} : vector<64x8xbf16>, vector<8x128xbf16>, vector<64x128xf32> -> vector<64x128xf32>
    %192 = vector.extract_strided_slice %191 {offsets = [0, 0], sizes = [16, 128], strides = [1, 1]} : vector<64x128xf32> to vector<16x128xf32>
    %193 = vector.extract_strided_slice %191 {offsets = [16, 0], sizes = [16, 128], strides = [1, 1]} : vector<64x128xf32> to vector<16x128xf32>
    %194 = vector.extract_strided_slice %191 {offsets = [32, 0], sizes = [16, 128], strides = [1, 1]} : vector<64x128xf32> to vector<16x128xf32>
    %195 = vector.extract_strided_slice %191 {offsets = [48, 0], sizes = [16, 128], strides = [1, 1]} : vector<64x128xf32> to vector<16x128xf32>
    %196 = tpu.concatenate %192, %193, %194, %195 in 1 : vector<16x128xf32>, vector<16x128xf32>, vector<16x128xf32>, vector<16x128xf32> -> vector<16x512xf32>
    %c5104 = arith.constant 5104 : index
    %c0_80 = arith.constant 0 : index
    %197 = vector.load %arg3[%c5104, %c0_80] : memref<9040x128xbf16, #tpu.memory_space<vmem>>, vector<512x128xbf16>
    %198 = arith.truncf %196 : vector<16x512xf32> to vector<16x512xbf16>
    %cst_81 = arith.constant dense<0.000000e+00> : vector<16x128xf32>
    %199 = tpu.matmul %198, %197, %cst_81 {dimension_numbers = #tpu.dot_dimension_numbers<[1], [0], [0], [1], [0, 0, 1, 1], [], []>} : vector<16x512xbf16>, vector<512x128xbf16>, vector<16x128xf32> -> vector<16x128xf32>
    %c88 = arith.constant 88 : index
    %c0_82 = arith.constant 0 : index
    %200 = vector.load %arg4[%c88, %c0_82] : memref<152x128xf32, #tpu.memory_space<vmem>>, vector<1x128xf32>
    %201 = vector.broadcast %200 : vector<1x128xf32> to vector<16x128xf32>
    %202 = arith.addf %199, %201 : vector<16x128xf32>
    %cst_83 = arith.constant 0.000000e+00 : f32
    %203 = vector.broadcast %cst_83 : f32 to vector<16x128xf32>
    %204 = arith.maximumf %202, %203 : vector<16x128xf32>
    %c5616 = arith.constant 5616 : index
    %c0_84 = arith.constant 0 : index
    %205 = vector.load %arg3[%c5616, %c0_84] : memref<9040x128xbf16, #tpu.memory_space<vmem>>, vector<48x16xbf16>
    %206 = arith.truncf %204 : vector<16x128xf32> to vector<16x128xbf16>
    %cst_85 = arith.constant dense<0.000000e+00> : vector<48x128xf32>
    %207 = tpu.matmul %205, %206, %cst_85 {dimension_numbers = #tpu.dot_dimension_numbers<[1], [0], [0], [1], [0, 0, 1, 1], [], []>} : vector<48x16xbf16>, vector<16x128xbf16>, vector<48x128xf32> -> vector<48x128xf32>
    %208 = vector.extract_strided_slice %207 {offsets = [0, 0], sizes = [16, 128], strides = [1, 1]} : vector<48x128xf32> to vector<16x128xf32>
    %209 = vector.extract_strided_slice %207 {offsets = [16, 0], sizes = [16, 128], strides = [1, 1]} : vector<48x128xf32> to vector<16x128xf32>
    %210 = vector.extract_strided_slice %207 {offsets = [32, 0], sizes = [16, 128], strides = [1, 1]} : vector<48x128xf32> to vector<16x128xf32>
    %211 = tpu.concatenate %208, %209, %210 in 1 : vector<16x128xf32>, vector<16x128xf32>, vector<16x128xf32> -> vector<16x384xf32>
    %c5664 = arith.constant 5664 : index
    %c0_86 = arith.constant 0 : index
    %212 = vector.load %arg3[%c5664, %c0_86] : memref<9040x128xbf16, #tpu.memory_space<vmem>>, vector<384x128xbf16>
    %213 = arith.truncf %211 : vector<16x384xf32> to vector<16x384xbf16>
    %cst_87 = arith.constant dense<0.000000e+00> : vector<16x128xf32>
    %214 = tpu.matmul %213, %212, %cst_87 {dimension_numbers = #tpu.dot_dimension_numbers<[1], [0], [0], [1], [0, 0, 1, 1], [], []>} : vector<16x384xbf16>, vector<384x128xbf16>, vector<16x128xf32> -> vector<16x128xf32>
    %c96 = arith.constant 96 : index
    %c0_88 = arith.constant 0 : index
    %215 = vector.load %arg4[%c96, %c0_88] : memref<152x128xf32, #tpu.memory_space<vmem>>, vector<1x128xf32>
    %216 = vector.broadcast %215 : vector<1x128xf32> to vector<16x128xf32>
    %217 = arith.addf %214, %216 : vector<16x128xf32>
    %cst_89 = arith.constant 0.000000e+00 : f32
    %218 = vector.broadcast %cst_89 : f32 to vector<16x128xf32>
    %219 = arith.maximumf %217, %218 : vector<16x128xf32>
    %c6048 = arith.constant 6048 : index
    %c0_90 = arith.constant 0 : index
    %220 = vector.load %arg3[%c6048, %c0_90] : memref<9040x128xbf16, #tpu.memory_space<vmem>>, vector<48x16xbf16>
    %221 = arith.truncf %219 : vector<16x128xf32> to vector<16x128xbf16>
    %cst_91 = arith.constant dense<0.000000e+00> : vector<48x128xf32>
    %222 = tpu.matmul %220, %221, %cst_91 {dimension_numbers = #tpu.dot_dimension_numbers<[1], [0], [0], [1], [0, 0, 1, 1], [], []>} : vector<48x16xbf16>, vector<16x128xbf16>, vector<48x128xf32> -> vector<48x128xf32>
    %223 = vector.extract_strided_slice %222 {offsets = [0, 0], sizes = [16, 128], strides = [1, 1]} : vector<48x128xf32> to vector<16x128xf32>
    %224 = vector.extract_strided_slice %222 {offsets = [16, 0], sizes = [16, 128], strides = [1, 1]} : vector<48x128xf32> to vector<16x128xf32>
    %225 = vector.extract_strided_slice %222 {offsets = [32, 0], sizes = [16, 128], strides = [1, 1]} : vector<48x128xf32> to vector<16x128xf32>
    %226 = tpu.concatenate %223, %224, %225 in 1 : vector<16x128xf32>, vector<16x128xf32>, vector<16x128xf32> -> vector<16x384xf32>
    %c6096 = arith.constant 6096 : index
    %c0_92 = arith.constant 0 : index
    %227 = vector.load %arg3[%c6096, %c0_92] : memref<9040x128xbf16, #tpu.memory_space<vmem>>, vector<384x128xbf16>
    %228 = arith.truncf %226 : vector<16x384xf32> to vector<16x384xbf16>
    %cst_93 = arith.constant dense<0.000000e+00> : vector<16x128xf32>
    %229 = tpu.matmul %228, %227, %cst_93 {dimension_numbers = #tpu.dot_dimension_numbers<[1], [0], [0], [1], [0, 0, 1, 1], [], []>} : vector<16x384xbf16>, vector<384x128xbf16>, vector<16x128xf32> -> vector<16x128xf32>
    %c104 = arith.constant 104 : index
    %c0_94 = arith.constant 0 : index
    %230 = vector.load %arg4[%c104, %c0_94] : memref<152x128xf32, #tpu.memory_space<vmem>>, vector<1x128xf32>
    %231 = vector.broadcast %230 : vector<1x128xf32> to vector<16x128xf32>
    %232 = arith.addf %229, %231 : vector<16x128xf32>
    %233 = arith.addf %232, %204 : vector<16x128xf32>
    %cst_95 = arith.constant 0.000000e+00 : f32
    %234 = vector.broadcast %cst_95 : f32 to vector<16x128xf32>
    %235 = arith.maximumf %233, %234 : vector<16x128xf32>
    %c6480 = arith.constant 6480 : index
    %c0_96 = arith.constant 0 : index
    %236 = vector.load %arg3[%c6480, %c0_96] : memref<9040x128xbf16, #tpu.memory_space<vmem>>, vector<128x16xbf16>
    %237 = arith.truncf %235 : vector<16x128xf32> to vector<16x128xbf16>
    %cst_97 = arith.constant dense<0.000000e+00> : vector<128x128xf32>
    %238 = tpu.matmul %236, %237, %cst_97 {dimension_numbers = #tpu.dot_dimension_numbers<[1], [0], [0], [1], [0, 0, 1, 1], [], []>} : vector<128x16xbf16>, vector<16x128xbf16>, vector<128x128xf32> -> vector<128x128xf32>
    %239 = vector.extract_strided_slice %238 {offsets = [0, 0], sizes = [32, 128], strides = [1, 1]} : vector<128x128xf32> to vector<32x128xf32>
    %240 = vector.extract_strided_slice %238 {offsets = [32, 0], sizes = [32, 128], strides = [1, 1]} : vector<128x128xf32> to vector<32x128xf32>
    %241 = vector.extract_strided_slice %238 {offsets = [64, 0], sizes = [32, 128], strides = [1, 1]} : vector<128x128xf32> to vector<32x128xf32>
    %242 = vector.extract_strided_slice %238 {offsets = [96, 0], sizes = [32, 128], strides = [1, 1]} : vector<128x128xf32> to vector<32x128xf32>
    %243 = tpu.concatenate %239, %240, %241, %242 in 1 : vector<32x128xf32>, vector<32x128xf32>, vector<32x128xf32>, vector<32x128xf32> -> vector<32x512xf32>
    %c6608 = arith.constant 6608 : index
    %c0_98 = arith.constant 0 : index
    %244 = vector.load %arg3[%c6608, %c0_98] : memref<9040x128xbf16, #tpu.memory_space<vmem>>, vector<512x128xbf16>
    %245 = arith.truncf %243 : vector<32x512xf32> to vector<32x512xbf16>
    %cst_99 = arith.constant dense<0.000000e+00> : vector<32x128xf32>
    %246 = tpu.matmul %245, %244, %cst_99 {dimension_numbers = #tpu.dot_dimension_numbers<[1], [0], [0], [1], [0, 0, 1, 1], [], []>} : vector<32x512xbf16>, vector<512x128xbf16>, vector<32x128xf32> -> vector<32x128xf32>
    %c112 = arith.constant 112 : index
    %c0_100 = arith.constant 0 : index
    %247 = vector.load %arg4[%c112, %c0_100] : memref<152x128xf32, #tpu.memory_space<vmem>>, vector<1x128xf32>
    %248 = vector.broadcast %247 : vector<1x128xf32> to vector<32x128xf32>
    %249 = arith.addf %246, %248 : vector<32x128xf32>
    %cst_101 = arith.constant 0.000000e+00 : f32
    %250 = vector.broadcast %cst_101 : f32 to vector<32x128xf32>
    %251 = arith.maximumf %249, %250 : vector<32x128xf32>
    %c7120 = arith.constant 7120 : index
    %c0_102 = arith.constant 0 : index
    %252 = vector.load %arg3[%c7120, %c0_102] : memref<9040x128xbf16, #tpu.memory_space<vmem>>, vector<96x32xbf16>
    %253 = arith.truncf %251 : vector<32x128xf32> to vector<32x128xbf16>
    %cst_103 = arith.constant dense<0.000000e+00> : vector<96x128xf32>
    %254 = tpu.matmul %252, %253, %cst_103 {dimension_numbers = #tpu.dot_dimension_numbers<[1], [0], [0], [1], [0, 0, 1, 1], [], []>} : vector<96x32xbf16>, vector<32x128xbf16>, vector<96x128xf32> -> vector<96x128xf32>
    %255 = vector.extract_strided_slice %254 {offsets = [0, 0], sizes = [32, 128], strides = [1, 1]} : vector<96x128xf32> to vector<32x128xf32>
    %256 = vector.extract_strided_slice %254 {offsets = [32, 0], sizes = [32, 128], strides = [1, 1]} : vector<96x128xf32> to vector<32x128xf32>
    %257 = vector.extract_strided_slice %254 {offsets = [64, 0], sizes = [32, 128], strides = [1, 1]} : vector<96x128xf32> to vector<32x128xf32>
    %258 = tpu.concatenate %255, %256, %257 in 1 : vector<32x128xf32>, vector<32x128xf32>, vector<32x128xf32> -> vector<32x384xf32>
    %c7216 = arith.constant 7216 : index
    %c0_104 = arith.constant 0 : index
    %259 = vector.load %arg3[%c7216, %c0_104] : memref<9040x128xbf16, #tpu.memory_space<vmem>>, vector<384x128xbf16>
    %260 = arith.truncf %258 : vector<32x384xf32> to vector<32x384xbf16>
    %cst_105 = arith.constant dense<0.000000e+00> : vector<32x128xf32>
    %261 = tpu.matmul %260, %259, %cst_105 {dimension_numbers = #tpu.dot_dimension_numbers<[1], [0], [0], [1], [0, 0, 1, 1], [], []>} : vector<32x384xbf16>, vector<384x128xbf16>, vector<32x128xf32> -> vector<32x128xf32>
    %c120 = arith.constant 120 : index
    %c0_106 = arith.constant 0 : index
    %262 = vector.load %arg4[%c120, %c0_106] : memref<152x128xf32, #tpu.memory_space<vmem>>, vector<1x128xf32>
    %263 = vector.broadcast %262 : vector<1x128xf32> to vector<32x128xf32>
    %264 = arith.addf %261, %263 : vector<32x128xf32>
    %cst_107 = arith.constant 0.000000e+00 : f32
    %265 = vector.broadcast %cst_107 : f32 to vector<32x128xf32>
    %266 = arith.maximumf %264, %265 : vector<32x128xf32>
    %c7600 = arith.constant 7600 : index
    %c0_108 = arith.constant 0 : index
    %267 = vector.load %arg3[%c7600, %c0_108] : memref<9040x128xbf16, #tpu.memory_space<vmem>>, vector<96x32xbf16>
    %268 = arith.truncf %266 : vector<32x128xf32> to vector<32x128xbf16>
    %cst_109 = arith.constant dense<0.000000e+00> : vector<96x128xf32>
    %269 = tpu.matmul %267, %268, %cst_109 {dimension_numbers = #tpu.dot_dimension_numbers<[1], [0], [0], [1], [0, 0, 1, 1], [], []>} : vector<96x32xbf16>, vector<32x128xbf16>, vector<96x128xf32> -> vector<96x128xf32>
    %270 = vector.extract_strided_slice %269 {offsets = [0, 0], sizes = [32, 128], strides = [1, 1]} : vector<96x128xf32> to vector<32x128xf32>
    %271 = vector.extract_strided_slice %269 {offsets = [32, 0], sizes = [32, 128], strides = [1, 1]} : vector<96x128xf32> to vector<32x128xf32>
    %272 = vector.extract_strided_slice %269 {offsets = [64, 0], sizes = [32, 128], strides = [1, 1]} : vector<96x128xf32> to vector<32x128xf32>
    %273 = tpu.concatenate %270, %271, %272 in 1 : vector<32x128xf32>, vector<32x128xf32>, vector<32x128xf32> -> vector<32x384xf32>
    %c7696 = arith.constant 7696 : index
    %c0_110 = arith.constant 0 : index
    %274 = vector.load %arg3[%c7696, %c0_110] : memref<9040x128xbf16, #tpu.memory_space<vmem>>, vector<384x128xbf16>
    %275 = arith.truncf %273 : vector<32x384xf32> to vector<32x384xbf16>
    %cst_111 = arith.constant dense<0.000000e+00> : vector<32x128xf32>
    %276 = tpu.matmul %275, %274, %cst_111 {dimension_numbers = #tpu.dot_dimension_numbers<[1], [0], [0], [1], [0, 0, 1, 1], [], []>} : vector<32x384xbf16>, vector<384x128xbf16>, vector<32x128xf32> -> vector<32x128xf32>
    %c128_112 = arith.constant 128 : index
    %c0_113 = arith.constant 0 : index
    %277 = vector.load %arg4[%c128_112, %c0_113] : memref<152x128xf32, #tpu.memory_space<vmem>>, vector<1x128xf32>
    %278 = vector.broadcast %277 : vector<1x128xf32> to vector<32x128xf32>
    %279 = arith.addf %276, %278 : vector<32x128xf32>
    %280 = arith.addf %279, %251 : vector<32x128xf32>
    %cst_114 = arith.constant 0.000000e+00 : f32
    %281 = vector.broadcast %cst_114 : f32 to vector<32x128xf32>
    %282 = arith.maximumf %280, %281 : vector<32x128xf32>
    %c8080 = arith.constant 8080 : index
    %c0_115 = arith.constant 0 : index
    %283 = vector.load %arg3[%c8080, %c0_115] : memref<9040x128xbf16, #tpu.memory_space<vmem>>, vector<256x32xbf16>
    %284 = arith.truncf %282 : vector<32x128xf32> to vector<32x128xbf16>
    %cst_116 = arith.constant dense<0.000000e+00> : vector<256x128xf32>
    %285 = tpu.matmul %283, %284, %cst_116 {dimension_numbers = #tpu.dot_dimension_numbers<[1], [0], [0], [1], [0, 0, 1, 1], [], []>} : vector<256x32xbf16>, vector<32x128xbf16>, vector<256x128xf32> -> vector<256x128xf32>
    %286 = vector.extract_strided_slice %285 {offsets = [0, 0], sizes = [64, 128], strides = [1, 1]} : vector<256x128xf32> to vector<64x128xf32>
    %287 = vector.extract_strided_slice %285 {offsets = [64, 0], sizes = [64, 128], strides = [1, 1]} : vector<256x128xf32> to vector<64x128xf32>
    %288 = vector.extract_strided_slice %285 {offsets = [128, 0], sizes = [64, 128], strides = [1, 1]} : vector<256x128xf32> to vector<64x128xf32>
    %289 = vector.extract_strided_slice %285 {offsets = [192, 0], sizes = [64, 128], strides = [1, 1]} : vector<256x128xf32> to vector<64x128xf32>
    %290 = tpu.concatenate %286, %287, %288, %289 in 1 : vector<64x128xf32>, vector<64x128xf32>, vector<64x128xf32>, vector<64x128xf32> -> vector<64x512xf32>
    %c8336 = arith.constant 8336 : index
    %c0_117 = arith.constant 0 : index
    %291 = vector.load %arg3[%c8336, %c0_117] : memref<9040x128xbf16, #tpu.memory_space<vmem>>, vector<512x128xbf16>
    %292 = arith.truncf %290 : vector<64x512xf32> to vector<64x512xbf16>
    %cst_118 = arith.constant dense<0.000000e+00> : vector<64x128xf32>
    %293 = tpu.matmul %292, %291, %cst_118 {dimension_numbers = #tpu.dot_dimension_numbers<[1], [0], [0], [1], [0, 0, 1, 1], [], []>} : vector<64x512xbf16>, vector<512x128xbf16>, vector<64x128xf32> -> vector<64x128xf32>
    %c136 = arith.constant 136 : index
    %c0_119 = arith.constant 0 : index
    %294 = vector.load %arg4[%c136, %c0_119] : memref<152x128xf32, #tpu.memory_space<vmem>>, vector<1x128xf32>
    %295 = vector.broadcast %294 : vector<1x128xf32> to vector<64x128xf32>
    %296 = arith.addf %293, %295 : vector<64x128xf32>
    %297 = arith.negf %296 : vector<64x128xf32>
    %298 = math.exp %297 : vector<64x128xf32>
    %cst_120 = arith.constant 1.000000e+00 : f32
    %299 = vector.broadcast %cst_120 : f32 to vector<64x128xf32>
    %300 = arith.addf %299, %298 : vector<64x128xf32>
    %301 = arith.divf %299, %300 : vector<64x128xf32>
    %c0_121 = arith.constant 0 : index
    %c0_122 = arith.constant 0 : index
    %c0_123 = arith.constant 0 : index
    %302 = vector.load %arg5[%c0_121, %c0_122, %c0_123] : memref<2x64x128xf32, #tpu.memory_space<vmem>>, vector<1x64x128xf32>
    %303 = vector.shape_cast %302 : vector<1x64x128xf32> to vector<64x128xf32>
    %304 = vector.shape_cast %301 : vector<64x128xf32> to vector<1x64x128xf32>
    tpu.vector_store %arg5[%c0_121, %c0_122, %c0_123], %304 {strides = array<i32>} : memref<2x64x128xf32, #tpu.memory_space<vmem>>, vector<1x64x128xf32>,
    %c8848 = arith.constant 8848 : index
    %c0_124 = arith.constant 0 : index
    %305 = vector.load %arg3[%c8848, %c0_124] : memref<9040x128xbf16, #tpu.memory_space<vmem>>, vector<64x8xbf16>
    %306 = arith.truncf %188 : vector<8x128xf32> to vector<8x128xbf16>
    %cst_125 = arith.constant dense<0.000000e+00> : vector<64x128xf32>
    %307 = tpu.matmul %305, %306, %cst_125 {dimension_numbers = #tpu.dot_dimension_numbers<[1], [0], [0], [1], [0, 0, 1, 1], [], []>} : vector<64x8xbf16>, vector<8x128xbf16>, vector<64x128xf32> -> vector<64x128xf32>
    %c8912 = arith.constant 8912 : index
    %c0_126 = arith.constant 0 : index
    %308 = vector.load %arg3[%c8912, %c0_126] : memref<9040x128xbf16, #tpu.memory_space<vmem>>, vector<128x128xbf16>
    %309 = arith.truncf %307 : vector<64x128xf32> to vector<64x128xbf16>
    %cst_127 = arith.constant dense<0.000000e+00> : vector<64x128xf32>
    %310 = tpu.matmul %309, %308, %cst_127 {dimension_numbers = #tpu.dot_dimension_numbers<[1], [0], [0], [1], [0, 0, 1, 1], [], []>} : vector<64x128xbf16>, vector<128x128xbf16>, vector<64x128xf32> -> vector<64x128xf32>
    %c144 = arith.constant 144 : index
    %c0_128 = arith.constant 0 : index
    %311 = vector.load %arg4[%c144, %c0_128] : memref<152x128xf32, #tpu.memory_space<vmem>>, vector<1x128xf32>
    %312 = vector.broadcast %311 : vector<1x128xf32> to vector<64x128xf32>
    %313 = arith.addf %310, %312 : vector<64x128xf32>
    %c1_129 = arith.constant 1 : index
    %c0_130 = arith.constant 0 : index
    %c0_131 = arith.constant 0 : index
    %314 = vector.load %arg5[%c1_129, %c0_130, %c0_131] : memref<2x64x128xf32, #tpu.memory_space<vmem>>, vector<1x64x128xf32>
    %315 = vector.shape_cast %314 : vector<1x64x128xf32> to vector<64x128xf32>
    %316 = vector.shape_cast %313 : vector<64x128xf32> to vector<1x64x128xf32>
    tpu.vector_store %arg5[%c1_129, %c0_130, %c0_131], %316 {strides = array<i32>} : memref<2x64x128xf32, #tpu.memory_space<vmem>>, vector<1x64x128xf32>,
    return
  }
  func.func @transform_0(%arg0: i32) -> (i32, i32) {
    %c0_i32 = arith.constant 0 : i32
    %c0_i32_0 = arith.constant 0 : i32
    return %arg0, %c0_i32 : i32, i32
  }
  func.func @transform_1(%arg0: i32) -> (i32, i32, i32) {
    %c0_i32 = arith.constant 0 : i32
    %c0_i32_0 = arith.constant 0 : i32
    %c0_i32_1 = arith.constant 0 : i32
    return %arg0, %c0_i32, %c0_i32_0 : i32, i32, i32
  }
  func.func @transform_2(%arg0: i32) -> (i32, i32) {
    %c0_i32 = arith.constant 0 : i32
    %c0_i32_0 = arith.constant 0 : i32
    %c0_i32_1 = arith.constant 0 : i32
    return %c0_i32, %c0_i32_0 : i32, i32
  }
  func.func @transform_3(%arg0: i32) -> (i32, i32) {
    %c0_i32 = arith.constant 0 : i32
    %c0_i32_0 = arith.constant 0 : i32
    %c0_i32_1 = arith.constant 0 : i32
    return %c0_i32, %c0_i32_0 : i32, i32
  }
  func.func @transform_4(%arg0: i32) -> (i32, i32, i32) {
    %c0_i32 = arith.constant 0 : i32
    %c0_i32_0 = arith.constant 0 : i32
    %c0_i32_1 = arith.constant 0 : i32
    return %c0_i32, %arg0, %c0_i32_0 : i32, i32, i32
  }
  func.func @transform_5(%arg0: i32) -> (i32, i32, i32) {
    %c0_i32 = arith.constant 0 : i32
    %c0_i32_0 = arith.constant 0 : i32
    %c0_i32_1 = arith.constant 0 : i32
    return %arg0, %c0_i32, %c0_i32_0 : i32, i32, i32
  }
}

</mosaic_0001>

<bundles_post_ra>
// kernel: squeeze.4
= control target key start
LH: loop header
LB: loop body
LE: loop exit
PB: predicated region body
PF: predicated region fallthrough
CT: control target
= control target key end

     0   :  { %s1180_s10 = smov 96   ;;  %vm3_vm0 = vcmask 261120   ;;  %s1748_s0 = inlined_call_operand.vmem [shape: f32[1,64,128], index: 0, kind: input, shape index: {}]   ;;  %s1749_s1 = inlined_call_operand.vmem [shape: f32[2,32,32,4], index: 1, kind: output, shape index: {}]  }
   0x1   :  { %v111_v0 = vld [vmem:[%s1748_s0] sm:$0xff]   ;;  %v1038_v1 = vld [vmem:[%s1748_s0 + $0x10] sm:$0xff]   ;;  %v1037_v3 = vld [vmem:[%s1748_s0 + $0x8] sm:$0xff]  }
   0x2   :  { %112 = vrot.lane.b32.xlu0 %v111_v0, %s1180_s10  ;;  %130 = vrot.lane.b32.xlu1 %v1038_v1, %s1180_s10  ;;  %v1040_v2 = vld [vmem:[%s1748_s0 + $0x20] sm:$0xff]   ;;  %v1039_v4 = vld [vmem:[%s1748_s0 + $0x18] sm:$0xff]   ;;  %4 = vst.msk [vmem:[#allocation0] ss:$8 sm:$0xf] %vm3_vm0, %v111_v0  }
   0x3   :  { %148 = vrot.lane.b32.xlu2 %v1040_v2, %s1180_s10  ;;  %v1041_v5 = vld [vmem:[%s1748_s0 + $0x28] sm:$0xff]   ;;  %v1042_v6 = vld [vmem:[%s1748_s0 + $0x30] sm:$0xff]   ;;  %v1043_v7 = vld [vmem:[%s1748_s0 + $0x38] sm:$0xff]   ;;  %5 = vst.msk [vmem:[#allocation0] ss:$8 sm:$0xf0] %vm3_vm0, %v111_v0  }
   0x4   :  { %v1044_v8 = vld [vmem:[%s1748_s0 + $0x40] sm:$0xff]   ;;  %v1045_v9 = vld [vmem:[%s1748_s0 + $0x48] sm:$0xff]   ;;  %v1233_v10 = vld [vmem:[%s1748_s0 + $0x50] sm:$0xff]   ;;  %31 = vst.msk [vmem:[#allocation0 + $0x100] ss:$8 sm:$0xf] %vm3_vm0, %v1040_v2  }
   0x5   :  { %v1047_v11 = vld [vmem:[%s1748_s0 + $0x58] sm:$0xff]   ;;  %v1245_v12 = vld [vmem:[%s1748_s0 + $0x60] sm:$0xff]   ;;  %v1250_v13 = vld [vmem:[%s1748_s0 + $0x68] sm:$0xff]   ;;  %33 = vst.msk [vmem:[#allocation0 + $0x100] ss:$8 sm:$0xf0] %vm3_vm0, %v1040_v2  }
   0x6   :  { %v1255_v14 = vld [vmem:[%s1748_s0 + $0x70] sm:$0xff]   ;;  %v1266_v15 = vld [vmem:[%s1748_s0 + $0x78] sm:$0xff]   ;;  %17 = vst.msk [vmem:[#allocation0 + $0x80] ss:$8 sm:$0xf] %vm3_vm0, %v1038_v1  }
   0x7   :  { %19 = vst.msk [vmem:[#allocation0 + $0x80] ss:$8 sm:$0xf0] %vm3_vm0, %v1038_v1  }
   0x8   :  { %10 = vst.msk [vmem:[#allocation0 + $0x40] ss:$8 sm:$0xf] %vm3_vm0, %v1037_v3  }
   0x9   :  { %12 = vst.msk [vmem:[#allocation0 + $0x40] ss:$8 sm:$0xf0] %vm3_vm0, %v1037_v3  }
   0xa   :  { %121 = vrot.lane.b32.xlu0 %v1037_v3, %s1180_s10  ;;  %139 = vrot.lane.b32.xlu1 %v1039_v4, %s1180_s10  ;;  %38 = vst.msk [vmem:[#allocation0 + $0x140] ss:$8 sm:$0xf] %vm3_vm0, %v1041_v5  }
   0xb   :  { %157 = vrot.lane.b32.xlu2 %v1041_v5, %s1180_s10  ;;  %40 = vst.msk [vmem:[#allocation0 + $0x140] ss:$8 sm:$0xf0] %vm3_vm0, %v1041_v5  }
   0xc   :  { %24 = vst.msk [vmem:[#allocation0 + $0xc0] ss:$8 sm:$0xf] %vm3_vm0, %v1039_v4  }
   0xd   :  { %26 = vst.msk [vmem:[#allocation0 + $0xc0] ss:$8 sm:$0xf0] %vm3_vm0, %v1039_v4  }
   0xe   :  { %45 = vst.msk [vmem:[#allocation0 + $0x180] ss:$8 sm:$0xf] %vm3_vm0, %v1042_v6  }
   0xf   :  { %47 = vst.msk [vmem:[#allocation0 + $0x180] ss:$8 sm:$0xf0] %vm3_vm0, %v1042_v6  }
  0x10   :  { %59 = vst.msk [vmem:[#allocation0 + $0x200] ss:$8 sm:$0xf] %vm3_vm0, %v1044_v8  }
  0x11   :  { %61 = vst.msk [vmem:[#allocation0 + $0x200] ss:$8 sm:$0xf0] %vm3_vm0, %v1044_v8  }
  0x12   :  { %166 = vrot.lane.b32.xlu0 %v1042_v6, %s1180_s10  ;;  %175 = vrot.lane.b32.xlu1 %v1043_v7, %s1180_s10  ;;  %52 = vst.msk [vmem:[#allocation0 + $0x1c0] ss:$8 sm:$0xf] %vm3_vm0, %v1043_v7  }
  0x13   :  { %184 = vrot.lane.b32.xlu2 %v1044_v8, %s1180_s10  ;;  %54 = vst.msk [vmem:[#allocation0 + $0x1c0] ss:$8 sm:$0xf0] %vm3_vm0, %v1043_v7  }
  0x14   :  { %66 = vst.msk [vmem:[#allocation0 + $0x240] ss:$8 sm:$0xf] %vm3_vm0, %v1045_v9  }
  0x15   :  { %68 = vst.msk [vmem:[#allocation0 + $0x240] ss:$8 sm:$0xf0] %vm3_vm0, %v1045_v9  }
  0x16   :  { %80 = vst.msk [vmem:[#allocation0 + $0x2c0] ss:$8 sm:$0xf] %vm3_vm0, %v1047_v11  }
  0x17   :  { %82 = vst.msk [vmem:[#allocation0 + $0x2c0] ss:$8 sm:$0xf0] %vm3_vm0, %v1047_v11  }
  0x18   :  { %73 = vst.msk [vmem:[#allocation0 + $0x280] ss:$8 sm:$0xf] %vm3_vm0, %v1233_v10  }
  0x19   :  { %75 = vst.msk [vmem:[#allocation0 + $0x280] ss:$8 sm:$0xf0] %vm3_vm0, %v1233_v10  }
  0x1a   :  { %193 = vrot.lane.b32.xlu0 %v1045_v9, %s1180_s10  ;;  %202 = vrot.lane.b32.xlu1 %v1233_v10, %s1180_s10  ;;  %87 = vst.msk [vmem:[#allocation0 + $0x300] ss:$8 sm:$0xf] %vm3_vm0, %v1245_v12  }
  0x1b   :  { %211 = vrot.lane.b32.xlu2 %v1047_v11, %s1180_s10  ;;  %89 = vst.msk [vmem:[#allocation0 + $0x300] ss:$8 sm:$0xf0] %vm3_vm0, %v1245_v12  }
  0x1c   :  { %101 = vst.msk [vmem:[#allocation0 + $0x380] ss:$8 sm:$0xf] %vm3_vm0, %v1255_v14  }
  0x1d   :  { %103 = vst.msk [vmem:[#allocation0 + $0x380] ss:$8 sm:$0xf0] %vm3_vm0, %v1255_v14  }
  0x1e   :  { %94 = vst.msk [vmem:[#allocation0 + $0x340] ss:$8 sm:$0xf] %vm3_vm0, %v1250_v13  }
  0x1f   :  { %96 = vst.msk [vmem:[#allocation0 + $0x340] ss:$8 sm:$0xf0] %vm3_vm0, %v1250_v13  }
  0x20   :  { %108 = vst.msk [vmem:[#allocation0 + $0x3c0] ss:$8 sm:$0xf] %vm3_vm0, %v1266_v15  }
  0x21   :  { %110 = vst.msk [vmem:[#allocation0 + $0x3c0] ss:$8 sm:$0xf0] %vm3_vm0, %v1266_v15  }
  0x22   :  { %220 = vrot.lane.b32.xlu0 %v1245_v12, %s1180_s10  ;;  %229 = vrot.lane.b32.xlu1 %v1250_v13, %s1180_s10 }
  0x23   :  { %238 = vrot.lane.b32.xlu2 %v1255_v14, %s1180_s10 }
  0x2a   :  { %247 = vrot.lane.b32.xlu0 %v1266_v15, %s1180_s10 }
  0x5d   :  { %v149_v16 = vpop.permute.xlu2 %148  }
  0x5e   :  { %152 = vst.msk [vmem:[#allocation0 + $0x101] ss:$8 sm:$0xf] %vm3_vm0, %v149_v16  }
  0x5f   :  { %154 = vst.msk [vmem:[#allocation0 + $0x101] ss:$8 sm:$0xf0] %vm3_vm0, %v149_v16  }
  0x65   :  { %v447_v17 = vld [vmem:[#allocation0 + $0x100] sm:$0x3]  ;;  %v453_v18 = vld [vmem:[#allocation0 + $0x108] sm:$0x3]  ;;  %v459_v19 = vld [vmem:[#allocation0 + $0x110] sm:$0x3]  ;;  %v158_v27 = vpop.permute.xlu2 %157  }
  0x66   :  { %1083 = vst [vmem:[%s1749_s1 + $0x40] sm:$0x3] %v447_v17  ;;  %v465_v20 = vld [vmem:[#allocation0 + $0x118] sm:$0x3]  ;;  %v471_v21 = vld [vmem:[#allocation0 + $0x120] sm:$0x3] }
  0x67   :  { %1084 = vst [vmem:[%s1749_s1 + $0x42] sm:$0x3] %v453_v18  ;;  %v477_v22 = vld [vmem:[#allocation0 + $0x128] sm:$0x3]  ;;  %v483_v23 = vld [vmem:[#allocation0 + $0x130] sm:$0x3] }
  0x68   :  { %1085 = vst [vmem:[%s1749_s1 + $0x44] sm:$0x3] %v459_v19  ;;  %v489_v24 = vld [vmem:[#allocation0 + $0x138] sm:$0x3] }
  0x69   :  { %1086 = vst [vmem:[%s1749_s1 + $0x46] sm:$0x3] %v465_v20 }
  0x6a   :  { %1087 = vst [vmem:[%s1749_s1 + $0x48] sm:$0x3] %v471_v21 }
  0x6b   :  { %1088 = vst [vmem:[%s1749_s1 + $0x4a] sm:$0x3] %v477_v22 }
  0x6c   :  { %1089 = vst [vmem:[%s1749_s1 + $0x4c] sm:$0x3] %v483_v23 }
  0x6d   :  { %1090 = vst [vmem:[%s1749_s1 + $0x4e] sm:$0x3] %v489_v24  ;;  %v185_v53 = vpop.permute.xlu2 %184  }
  0x6e   :  { %161 = vst.msk [vmem:[#allocation0 + $0x141] ss:$8 sm:$0xf] %vm3_vm0, %v158_v27  }
  0x6f   :  { %163 = vst.msk [vmem:[#allocation0 + $0x141] ss:$8 sm:$0xf0] %vm3_vm0, %v158_v27  }
  0x70   :  { %188 = vst.msk [vmem:[#allocation0 + $0x201] ss:$8 sm:$0xf] %vm3_vm0, %v185_v53  }
  0x71   :  { %190 = vst.msk [vmem:[#allocation0 + $0x201] ss:$8 sm:$0xf0] %vm3_vm0, %v185_v53  }
  0x74   :  { %v113_v25 = vpop.permute.xlu0 %112   ;;  %v131_v26 = vpop.permute.xlu1 %130  }
  0x75   :  { %116 = vst.msk [vmem:[#allocation0 + $0x1] ss:$8 sm:$0xf] %vm3_vm0, %v113_v25   ;;  %v495_v57 = vld [vmem:[#allocation0 + $0x140] sm:$0x3]  ;;  %v212_v22 = vpop.permute.xlu2 %211  }
  0x76   :  { %118 = vst.msk [vmem:[#allocation0 + $0x1] ss:$8 sm:$0xf0] %vm3_vm0, %v113_v25   ;;  %v501_v58 = vld [vmem:[#allocation0 + $0x148] sm:$0x3] }
  0x77   :  { %134 = vst.msk [vmem:[#allocation0 + $0x81] ss:$8 sm:$0xf] %vm3_vm0, %v131_v26   ;;  %v507_v59 = vld [vmem:[#allocation0 + $0x150] sm:$0x3] }
  0x78   :  { %136 = vst.msk [vmem:[#allocation0 + $0x81] ss:$8 sm:$0xf0] %vm3_vm0, %v131_v26   ;;  %v513_v60 = vld [vmem:[#allocation0 + $0x158] sm:$0x3] }
  0x79   :  { %1091 = vst [vmem:[%s1749_s1 + $0x50] sm:$0x3] %v495_v57  ;;  %v519_v61 = vld [vmem:[#allocation0 + $0x160] sm:$0x3]  ;;  %v525_v62 = vld [vmem:[#allocation0 + $0x168] sm:$0x3] }
  0x7a   :  { %1092 = vst [vmem:[%s1749_s1 + $0x52] sm:$0x3] %v501_v58  ;;  %v531_v63 = vld [vmem:[#allocation0 + $0x170] sm:$0x3]  ;;  %v537_v0 = vld [vmem:[#allocation0 + $0x178] sm:$0x3] }
  0x7b   :  { %1093 = vst [vmem:[%s1749_s1 + $0x54] sm:$0x3] %v507_v59  ;;  %v639_v24 = vld [vmem:[#allocation0 + $0x200] sm:$0x3]  ;;  %v645_v25 = vld [vmem:[#allocation0 + $0x208] sm:$0x3] }
  0x7c   :  { %v256_v28 = vld [vmem:[#allocation0] sm:$0x3]  ;;  %v261_v29 = vld [vmem:[#allocation0 + $0x8] sm:$0x3]  ;;  %v267_v30 = vld [vmem:[#allocation0 + $0x10] sm:$0x3]  ;;  %v122_v31 = vpop.permute.xlu0 %121   ;;  %v140_v32 = vpop.permute.xlu1 %139  }
  0x7d   :  { %259 = vst [vmem:[%s1749_s1] sm:$0x3] %v256_v28  ;;  %v273_v33 = vld [vmem:[#allocation0 + $0x18] sm:$0x3]  ;;  %v279_v34 = vld [vmem:[#allocation0 + $0x20] sm:$0x3] }
  0x7e   :  { %1052 = vst [vmem:[%s1749_s1 + $0x2] sm:$0x3] %v261_v29  ;;  %v285_v35 = vld [vmem:[#allocation0 + $0x28] sm:$0x3]  ;;  %v291_v36 = vld [vmem:[#allocation0 + $0x30] sm:$0x3] }
  0x7f   :  { %1053 = vst [vmem:[%s1749_s1 + $0x4] sm:$0x3] %v267_v30  ;;  %v297_v37 = vld [vmem:[#allocation0 + $0x38] sm:$0x3]  ;;  %v351_v38 = vld [vmem:[#allocation0 + $0x80] sm:$0x3] }
  0x80   :  { %1054 = vst [vmem:[%s1749_s1 + $0x6] sm:$0x3] %v273_v33  ;;  %v357_v39 = vld [vmem:[#allocation0 + $0x88] sm:$0x3]  ;;  %v363_v40 = vld [vmem:[#allocation0 + $0x90] sm:$0x3] }
  0x81   :  { %1055 = vst [vmem:[%s1749_s1 + $0x8] sm:$0x3] %v279_v34  ;;  %v369_v42 = vld [vmem:[#allocation0 + $0x98] sm:$0x3]  ;;  %v375_v43 = vld [vmem:[#allocation0 + $0xa0] sm:$0x3] }
  0x82   :  { %1056 = vst [vmem:[%s1749_s1 + $0xa] sm:$0x3] %v285_v35  ;;  %v381_v44 = vld [vmem:[#allocation0 + $0xa8] sm:$0x3]  ;;  %v387_v45 = vld [vmem:[#allocation0 + $0xb0] sm:$0x3] }
  0x83   :  { %1057 = vst [vmem:[%s1749_s1 + $0xc] sm:$0x3] %v291_v36  ;;  %v393_v46 = vld [vmem:[#allocation0 + $0xb8] sm:$0x3]  ;;  %v651_v26 = vld [vmem:[#allocation0 + $0x210] sm:$0x3] }
  0x84   :  { %1058 = vst [vmem:[%s1749_s1 + $0xe] sm:$0x3] %v297_v37  ;;  %v1350_v41 = vpop.permute.xlu0 %166   ;;  %v1396_v55 = vpop.permute.xlu1 %175   ;;  %v657_v27 = vld [vmem:[#allocation0 + $0x218] sm:$0x3]  ;;  %v663_v28 = vld [vmem:[#allocation0 + $0x220] sm:$0x3] }
  0x85   :  { %1067 = vst [vmem:[%s1749_s1 + $0x20] sm:$0x3] %v351_v38  ;;  %v669_v29 = vld [vmem:[#allocation0 + $0x228] sm:$0x3]  ;;  %v675_v30 = vld [vmem:[#allocation0 + $0x230] sm:$0x3] }
  0x86   :  { %1068 = vst [vmem:[%s1749_s1 + $0x22] sm:$0x3] %v357_v39 }
  0x87   :  { %1069 = vst [vmem:[%s1749_s1 + $0x24] sm:$0x3] %v363_v40 }
  0x88   :  { %1070 = vst [vmem:[%s1749_s1 + $0x26] sm:$0x3] %v369_v42 }
  0x89   :  { %1071 = vst [vmem:[%s1749_s1 + $0x28] sm:$0x3] %v375_v43 }
  0x8a   :  { %1072 = vst [vmem:[%s1749_s1 + $0x2a] sm:$0x3] %v381_v44 }
  0x8b   :  { %1073 = vst [vmem:[%s1749_s1 + $0x2c] sm:$0x3] %v387_v45 }
  0x8c   :  { %1074 = vst [vmem:[%s1749_s1 + $0x2e] sm:$0x3] %v393_v46  ;;  %v194_v8 = vpop.permute.xlu0 %193   ;;  %v1486_v23 = vpop.permute.xlu1 %202  }
  0x8d   :  { %125 = vst.msk [vmem:[#allocation0 + $0x41] ss:$8 sm:$0xf] %vm3_vm0, %v122_v31  }
  0x8e   :  { %127 = vst.msk [vmem:[#allocation0 + $0x41] ss:$8 sm:$0xf0] %vm3_vm0, %v122_v31   ;;  %v681_v31 = vld [vmem:[#allocation0 + $0x238] sm:$0x3] }
  0x8f   :  { %143 = vst.msk [vmem:[#allocation0 + $0xc1] ss:$8 sm:$0xf] %vm3_vm0, %v140_v32  }
  0x90   :  { %145 = vst.msk [vmem:[#allocation0 + $0xc1] ss:$8 sm:$0xf0] %vm3_vm0, %v140_v32  }
  0x91   :  { %170 = vst.msk [vmem:[#allocation0 + $0x181] ss:$8 sm:$0xf] %vm3_vm0, %v1350_v41  }
  0x92   :  { %1094 = vst [vmem:[%s1749_s1 + $0x56] sm:$0x3] %v513_v60 }
  0x93   :  { %1095 = vst [vmem:[%s1749_s1 + $0x58] sm:$0x3] %v519_v61 }
  0x94   :  { %v303_v47 = vld [vmem:[#allocation0 + $0x40] sm:$0x3]  ;;  %v309_v48 = vld [vmem:[#allocation0 + $0x48] sm:$0x3]  ;;  %v315_v49 = vld [vmem:[#allocation0 + $0x50] sm:$0x3]  ;;  %v1517_v32 = vpop.permute.xlu0 %220  }
  0x95   :  { %1059 = vst [vmem:[%s1749_s1 + $0x10] sm:$0x3] %v303_v47  ;;  %v321_v50 = vld [vmem:[#allocation0 + $0x58] sm:$0x3]  ;;  %v327_v51 = vld [vmem:[#allocation0 + $0x60] sm:$0x3] }
  0x96   :  { %1060 = vst [vmem:[%s1749_s1 + $0x12] sm:$0x3] %v309_v48  ;;  %v333_v52 = vld [vmem:[#allocation0 + $0x68] sm:$0x3]  ;;  %v339_v54 = vld [vmem:[#allocation0 + $0x70] sm:$0x3] }
  0x97   :  { %1061 = vst [vmem:[%s1749_s1 + $0x14] sm:$0x3] %v315_v49  ;;  %v345_v56 = vld [vmem:[#allocation0 + $0x78] sm:$0x3]  ;;  %v399_v1 = vld [vmem:[#allocation0 + $0xc0] sm:$0x3] }
  0x98   :  { %1062 = vst [vmem:[%s1749_s1 + $0x16] sm:$0x3] %v321_v50  ;;  %v405_v2 = vld [vmem:[#allocation0 + $0xc8] sm:$0x3]  ;;  %v411_v3 = vld [vmem:[#allocation0 + $0xd0] sm:$0x3] }
  0x99   :  { %1063 = vst [vmem:[%s1749_s1 + $0x18] sm:$0x3] %v327_v51  ;;  %v417_v4 = vld [vmem:[#allocation0 + $0xd8] sm:$0x3]  ;;  %v423_v5 = vld [vmem:[#allocation0 + $0xe0] sm:$0x3] }
  0x9a   :  { %1064 = vst [vmem:[%s1749_s1 + $0x1a] sm:$0x3] %v333_v52  ;;  %v429_v6 = vld [vmem:[#allocation0 + $0xe8] sm:$0x3]  ;;  %v435_v7 = vld [vmem:[#allocation0 + $0xf0] sm:$0x3] }
  0x9b   :  { %1065 = vst [vmem:[%s1749_s1 + $0x1c] sm:$0x3] %v339_v54  ;;  %v441_v9 = vld [vmem:[#allocation0 + $0xf8] sm:$0x3]  ;;  %v543_v10 = vld [vmem:[#allocation0 + $0x180] sm:$0x3] }
  0x9c   :  { %1066 = vst [vmem:[%s1749_s1 + $0x1e] sm:$0x3] %v345_v56  ;;  %v549_v11 = vld [vmem:[#allocation0 + $0x188] sm:$0x3]  ;;  %v555_v16 = vld [vmem:[#allocation0 + $0x190] sm:$0x3]  ;;  %v1581_v56 = vpop.permute.xlu1 %229  }
  0x9d   :  { %1096 = vst [vmem:[%s1749_s1 + $0x5a] sm:$0x3] %v525_v62  ;;  %v561_v17 = vld [vmem:[#allocation0 + $0x198] sm:$0x3] }
  0x9e   :  { %1097 = vst [vmem:[%s1749_s1 + $0x5c] sm:$0x3] %v531_v63 }
  0x9f   :  { %1098 = vst [vmem:[%s1749_s1 + $0x5e] sm:$0x3] %v537_v0 }
  0xa0   :  { %1075 = vst [vmem:[%s1749_s1 + $0x30] sm:$0x3] %v399_v1 }
  0xa1   :  { %1076 = vst [vmem:[%s1749_s1 + $0x32] sm:$0x3] %v405_v2  ;;  %v248_v2 = vpop.permute.xlu0 %247  }
  0xa2   :  { %1077 = vst [vmem:[%s1749_s1 + $0x34] sm:$0x3] %v411_v3 }
  0xa3   :  { %1078 = vst [vmem:[%s1749_s1 + $0x36] sm:$0x3] %v417_v4 }
  0xa4   :  { %1079 = vst [vmem:[%s1749_s1 + $0x38] sm:$0x3] %v423_v5 }
  0xa5   :  { %1080 = vst [vmem:[%s1749_s1 + $0x3a] sm:$0x3] %v429_v6 }
  0xa6   :  { %1081 = vst [vmem:[%s1749_s1 + $0x3c] sm:$0x3] %v435_v7 }
  0xa7   :  { %1082 = vst [vmem:[%s1749_s1 + $0x3e] sm:$0x3] %v441_v9 }
  0xa8   :  { %172 = vst.msk [vmem:[#allocation0 + $0x181] ss:$8 sm:$0xf0] %vm3_vm0, %v1350_v41  }
  0xa9   :  { %1099 = vst [vmem:[%s1749_s1 + $0x60] sm:$0x3] %v543_v10 }
  0xaa   :  { %1100 = vst [vmem:[%s1749_s1 + $0x62] sm:$0x3] %v549_v11 }
  0xab   :  { %1101 = vst [vmem:[%s1749_s1 + $0x64] sm:$0x3] %v555_v16 }
  0xac   :  { %1102 = vst [vmem:[%s1749_s1 + $0x66] sm:$0x3] %v561_v17 }
  0xad   :  { %1115 = vst [vmem:[%s1749_s1 + $0x80] sm:$0x3] %v639_v24 }
  0xae   :  { %1116 = vst [vmem:[%s1749_s1 + $0x82] sm:$0x3] %v645_v25 }
  0xaf   :  { %v567_v18 = vld [vmem:[#allocation0 + $0x1a0] sm:$0x3]  ;;  %v573_v19 = vld [vmem:[#allocation0 + $0x1a8] sm:$0x3]  ;;  %v579_v20 = vld [vmem:[#allocation0 + $0x1b0] sm:$0x3] }
  0xb0   :  { %1103 = vst [vmem:[%s1749_s1 + $0x68] sm:$0x3] %v567_v18  ;;  %v585_v21 = vld [vmem:[#allocation0 + $0x1b8] sm:$0x3] }
  0xb1   :  { %1104 = vst [vmem:[%s1749_s1 + $0x6a] sm:$0x3] %v573_v19 }
  0xb2   :  { %1105 = vst [vmem:[%s1749_s1 + $0x6c] sm:$0x3] %v579_v20 }
  0xb3   :  { %1106 = vst [vmem:[%s1749_s1 + $0x6e] sm:$0x3] %v585_v21 }
  0xb4   :  { %1117 = vst [vmem:[%s1749_s1 + $0x84] sm:$0x3] %v651_v26 }
  0xb5   :  { %1118 = vst [vmem:[%s1749_s1 + $0x86] sm:$0x3] %v657_v27 }
  0xb6   :  { %1119 = vst [vmem:[%s1749_s1 + $0x88] sm:$0x3] %v663_v28 }
  0xb7   :  { %1120 = vst [vmem:[%s1749_s1 + $0x8a] sm:$0x3] %v669_v29 }
  0xb8   :  { %1121 = vst [vmem:[%s1749_s1 + $0x8c] sm:$0x3] %v675_v30 }
  0xb9   :  { %1122 = vst [vmem:[%s1749_s1 + $0x8e] sm:$0x3] %v681_v31 }
  0xba   :  { %179 = vst.msk [vmem:[#allocation0 + $0x1c1] ss:$8 sm:$0xf] %vm3_vm0, %v1396_v55  }
  0xbb   :  { %181 = vst.msk [vmem:[#allocation0 + $0x1c1] ss:$8 sm:$0xf0] %vm3_vm0, %v1396_v55   ;;  %v239_v55 = vpop.permute.xlu2 %238  }
  0xbc   :  { %197 = vst.msk [vmem:[#allocation0 + $0x241] ss:$8 sm:$0xf] %vm3_vm0, %v194_v8  }
  0xbd   :  { %199 = vst.msk [vmem:[#allocation0 + $0x241] ss:$8 sm:$0xf0] %vm3_vm0, %v194_v8  }
  0xbe   :  { %215 = vst.msk [vmem:[#allocation0 + $0x2c1] ss:$8 sm:$0xf] %vm3_vm0, %v212_v22  }
  0xbf   :  { %217 = vst.msk [vmem:[#allocation0 + $0x2c1] ss:$8 sm:$0xf0] %vm3_vm0, %v212_v22  }
  0xc0   :  { %206 = vst.msk [vmem:[#allocation0 + $0x281] ss:$8 sm:$0xf] %vm3_vm0, %v1486_v23  }
  0xc1   :  { %v591_v33 = vld [vmem:[#allocation0 + $0x1c0] sm:$0x3]  ;;  %v597_v34 = vld [vmem:[#allocation0 + $0x1c8] sm:$0x3]  ;;  %v603_v35 = vld [vmem:[#allocation0 + $0x1d0] sm:$0x3] }
  0xc2   :  { %1107 = vst [vmem:[%s1749_s1 + $0x70] sm:$0x3] %v591_v33  ;;  %v609_v36 = vld [vmem:[#allocation0 + $0x1d8] sm:$0x3]  ;;  %v615_v37 = vld [vmem:[#allocation0 + $0x1e0] sm:$0x3] }
  0xc3   :  { %1108 = vst [vmem:[%s1749_s1 + $0x72] sm:$0x3] %v597_v34  ;;  %v621_v38 = vld [vmem:[#allocation0 + $0x1e8] sm:$0x3]  ;;  %v627_v39 = vld [vmem:[#allocation0 + $0x1f0] sm:$0x3] }
  0xc4   :  { %1109 = vst [vmem:[%s1749_s1 + $0x74] sm:$0x3] %v603_v35  ;;  %v633_v40 = vld [vmem:[#allocation0 + $0x1f8] sm:$0x3]  ;;  %v687_v41 = vld [vmem:[#allocation0 + $0x240] sm:$0x3] }
  0xc5   :  { %1110 = vst [vmem:[%s1749_s1 + $0x76] sm:$0x3] %v609_v36  ;;  %v693_v42 = vld [vmem:[#allocation0 + $0x248] sm:$0x3]  ;;  %v699_v43 = vld [vmem:[#allocation0 + $0x250] sm:$0x3] }
  0xc6   :  { %1111 = vst [vmem:[%s1749_s1 + $0x78] sm:$0x3] %v615_v37  ;;  %v705_v44 = vld [vmem:[#allocation0 + $0x258] sm:$0x3]  ;;  %v711_v45 = vld [vmem:[#allocation0 + $0x260] sm:$0x3] }
  0xc7   :  { %1112 = vst [vmem:[%s1749_s1 + $0x7a] sm:$0x3] %v621_v38  ;;  %v717_v46 = vld [vmem:[#allocation0 + $0x268] sm:$0x3]  ;;  %v723_v47 = vld [vmem:[#allocation0 + $0x270] sm:$0x3] }
  0xc8   :  { %1113 = vst [vmem:[%s1749_s1 + $0x7c] sm:$0x3] %v627_v39  ;;  %v729_v48 = vld [vmem:[#allocation0 + $0x278] sm:$0x3]  ;;  %v783_v49 = vld [vmem:[#allocation0 + $0x2c0] sm:$0x3] }
  0xc9   :  { %1114 = vst [vmem:[%s1749_s1 + $0x7e] sm:$0x3] %v633_v40  ;;  %v789_v50 = vld [vmem:[#allocation0 + $0x2c8] sm:$0x3]  ;;  %v795_v51 = vld [vmem:[#allocation0 + $0x2d0] sm:$0x3] }
  0xca   :  { %1123 = vst [vmem:[%s1749_s1 + $0x90] sm:$0x3] %v687_v41  ;;  %v801_v52 = vld [vmem:[#allocation0 + $0x2d8] sm:$0x3]  ;;  %v807_v53 = vld [vmem:[#allocation0 + $0x2e0] sm:$0x3] }
  0xcb   :  { %1124 = vst [vmem:[%s1749_s1 + $0x92] sm:$0x3] %v693_v42  ;;  %v813_v54 = vld [vmem:[#allocation0 + $0x2e8] sm:$0x3]  ;;  %v819_v57 = vld [vmem:[#allocation0 + $0x2f0] sm:$0x3] }
  0xcc   :  { %1125 = vst [vmem:[%s1749_s1 + $0x94] sm:$0x3] %v699_v43  ;;  %v825_v58 = vld [vmem:[#allocation0 + $0x2f8] sm:$0x3]  ;;  %v735_v59 = vld [vmem:[#allocation0 + $0x280] sm:$0x3] }
  0xcd   :  { %1126 = vst [vmem:[%s1749_s1 + $0x96] sm:$0x3] %v705_v44  ;;  %v741_v60 = vld [vmem:[#allocation0 + $0x288] sm:$0x3]  ;;  %v747_v61 = vld [vmem:[#allocation0 + $0x290] sm:$0x3] }
  0xce   :  { %1127 = vst [vmem:[%s1749_s1 + $0x98] sm:$0x3] %v711_v45  ;;  %v753_v62 = vld [vmem:[#allocation0 + $0x298] sm:$0x3] }
  0xcf   :  { %1128 = vst [vmem:[%s1749_s1 + $0x9a] sm:$0x3] %v717_v46 }
  0xd0   :  { %1129 = vst [vmem:[%s1749_s1 + $0x9c] sm:$0x3] %v723_v47 }
  0xd1   :  { %1130 = vst [vmem:[%s1749_s1 + $0x9e] sm:$0x3] %v729_v48 }
  0xd2   :  { %1139 = vst [vmem:[%s1749_s1 + $0xb0] sm:$0x3] %v783_v49 }
  0xd3   :  { %1140 = vst [vmem:[%s1749_s1 + $0xb2] sm:$0x3] %v789_v50 }
  0xd4   :  { %1141 = vst [vmem:[%s1749_s1 + $0xb4] sm:$0x3] %v795_v51 }
  0xd5   :  { %1142 = vst [vmem:[%s1749_s1 + $0xb6] sm:$0x3] %v801_v52 }
  0xd6   :  { %1143 = vst [vmem:[%s1749_s1 + $0xb8] sm:$0x3] %v807_v53 }
  0xd7   :  { %1144 = vst [vmem:[%s1749_s1 + $0xba] sm:$0x3] %v813_v54 }
  0xd8   :  { %1145 = vst [vmem:[%s1749_s1 + $0xbc] sm:$0x3] %v819_v57 }
  0xd9   :  { %1146 = vst [vmem:[%s1749_s1 + $0xbe] sm:$0x3] %v825_v58 }
  0xda   :  { %208 = vst.msk [vmem:[#allocation0 + $0x281] ss:$8 sm:$0xf0] %vm3_vm0, %v1486_v23  }
  0xdb   :  { %1131 = vst [vmem:[%s1749_s1 + $0xa0] sm:$0x3] %v735_v59 }
  0xdc   :  { %1132 = vst [vmem:[%s1749_s1 + $0xa2] sm:$0x3] %v741_v60 }
  0xdd   :  { %1133 = vst [vmem:[%s1749_s1 + $0xa4] sm:$0x3] %v747_v61 }
  0xde   :  { %1134 = vst [vmem:[%s1749_s1 + $0xa6] sm:$0x3] %v753_v62 }
  0xdf   :  { %224 = vst.msk [vmem:[#allocation0 + $0x301] ss:$8 sm:$0xf] %vm3_vm0, %v1517_v32  }
  0xe0   :  { %226 = vst.msk [vmem:[#allocation0 + $0x301] ss:$8 sm:$0xf0] %vm3_vm0, %v1517_v32  }
  0xe1   :  { %v759_v12 = vld [vmem:[#allocation0 + $0x2a0] sm:$0x3]  ;;  %v765_v63 = vld [vmem:[#allocation0 + $0x2a8] sm:$0x3]  ;;  %v771_v0 = vld [vmem:[#allocation0 + $0x2b0] sm:$0x3] }
  0xe2   :  { %1135 = vst [vmem:[%s1749_s1 + $0xa8] sm:$0x3] %v759_v12  ;;  %v777_v1 = vld [vmem:[#allocation0 + $0x2b8] sm:$0x3] }
  0xe3   :  { %1136 = vst [vmem:[%s1749_s1 + $0xaa] sm:$0x3] %v765_v63 }
  0xe4   :  { %1137 = vst [vmem:[%s1749_s1 + $0xac] sm:$0x3] %v771_v0 }
  0xe5   :  { %1138 = vst [vmem:[%s1749_s1 + $0xae] sm:$0x3] %v777_v1 }
  0xe6   :  { %242 = vst.msk [vmem:[#allocation0 + $0x381] ss:$8 sm:$0xf] %vm3_vm0, %v239_v55   ;;  %v831_v14 = vld [vmem:[#allocation0 + $0x300] sm:$0x3] }
  0xe7   :  { %244 = vst.msk [vmem:[#allocation0 + $0x381] ss:$8 sm:$0xf0] %vm3_vm0, %v239_v55   ;;  %v837_v3 = vld [vmem:[#allocation0 + $0x308] sm:$0x3] }
  0xe8   :  { %v843_v4 = vld [vmem:[#allocation0 + $0x310] sm:$0x3]  ;;  %1147 = vst [vmem:[%s1749_s1 + $0xc0] sm:$0x3] %v831_v14  ;;  %v849_v5 = vld [vmem:[#allocation0 + $0x318] sm:$0x3] }
  0xe9   :  { %1148 = vst [vmem:[%s1749_s1 + $0xc2] sm:$0x3] %v837_v3  ;;  %v855_v6 = vld [vmem:[#allocation0 + $0x320] sm:$0x3]  ;;  %v861_v7 = vld [vmem:[#allocation0 + $0x328] sm:$0x3] }
  0xea   :  { %1149 = vst [vmem:[%s1749_s1 + $0xc4] sm:$0x3] %v843_v4  ;;  %v867_v8 = vld [vmem:[#allocation0 + $0x330] sm:$0x3]  ;;  %v873_v9 = vld [vmem:[#allocation0 + $0x338] sm:$0x3] }
  0xeb   :  { %1150 = vst [vmem:[%s1749_s1 + $0xc6] sm:$0x3] %v849_v5 }
  0xec   :  { %1151 = vst [vmem:[%s1749_s1 + $0xc8] sm:$0x3] %v855_v6 }
  0xed   :  { %1152 = vst [vmem:[%s1749_s1 + $0xca] sm:$0x3] %v861_v7  ;;  %v927_v10 = vld [vmem:[#allocation0 + $0x380] sm:$0x3]  ;;  %v933_v11 = vld [vmem:[#allocation0 + $0x388] sm:$0x3] }
  0xee   :  { %1153 = vst [vmem:[%s1749_s1 + $0xcc] sm:$0x3] %v867_v8  ;;  %v939_v16 = vld [vmem:[#allocation0 + $0x390] sm:$0x3]  ;;  %v945_v17 = vld [vmem:[#allocation0 + $0x398] sm:$0x3] }
  0xef   :  { %1154 = vst [vmem:[%s1749_s1 + $0xce] sm:$0x3] %v873_v9  ;;  %v951_v18 = vld [vmem:[#allocation0 + $0x3a0] sm:$0x3]  ;;  %v957_v19 = vld [vmem:[#allocation0 + $0x3a8] sm:$0x3] }
  0xf0   :  { %1163 = vst [vmem:[%s1749_s1 + $0xe0] sm:$0x3] %v927_v10  ;;  %v963_v20 = vld [vmem:[#allocation0 + $0x3b0] sm:$0x3]  ;;  %v969_v21 = vld [vmem:[#allocation0 + $0x3b8] sm:$0x3] }
  0xf1   :  { %1164 = vst [vmem:[%s1749_s1 + $0xe2] sm:$0x3] %v933_v11 }
  0xf2   :  { %1165 = vst [vmem:[%s1749_s1 + $0xe4] sm:$0x3] %v939_v16 }
  0xf3   :  { %1166 = vst [vmem:[%s1749_s1 + $0xe6] sm:$0x3] %v945_v17 }
  0xf4   :  { %1167 = vst [vmem:[%s1749_s1 + $0xe8] sm:$0x3] %v951_v18 }
  0xf5   :  { %1168 = vst [vmem:[%s1749_s1 + $0xea] sm:$0x3] %v957_v19 }
  0xf6   :  { %1169 = vst [vmem:[%s1749_s1 + $0xec] sm:$0x3] %v963_v20 }
  0xf7   :  { %1170 = vst [vmem:[%s1749_s1 + $0xee] sm:$0x3] %v969_v21 }
  0xf8   :  { %233 = vst.msk [vmem:[#allocation0 + $0x341] ss:$8 sm:$0xf] %vm3_vm0, %v1581_v56  }
  0xf9   :  { %235 = vst.msk [vmem:[#allocation0 + $0x341] ss:$8 sm:$0xf0] %vm3_vm0, %v1581_v56  }
  0xfa   :  { %251 = vst.msk [vmem:[#allocation0 + $0x3c1] ss:$8 sm:$0xf] %vm3_vm0, %v248_v2  }
  0xfb   :  { %253 = vst.msk [vmem:[#allocation0 + $0x3c1] ss:$8 sm:$0xf0] %vm3_vm0, %v248_v2  }
  0xff   :  { %v879_v13 = vld [vmem:[#allocation0 + $0x340] sm:$0x3]  ;;  %v885_v15 = vld [vmem:[#allocation0 + $0x348] sm:$0x3]  ;;  %v891_v22 = vld [vmem:[#allocation0 + $0x350] sm:$0x3] }
 0x100   :  { %1155 = vst [vmem:[%s1749_s1 + $0xd0] sm:$0x3] %v879_v13  ;;  %v897_v23 = vld [vmem:[#allocation0 + $0x358] sm:$0x3]  ;;  %v903_v24 = vld [vmem:[#allocation0 + $0x360] sm:$0x3] }
 0x101   :  { %1156 = vst [vmem:[%s1749_s1 + $0xd2] sm:$0x3] %v885_v15  ;;  %v909_v25 = vld [vmem:[#allocation0 + $0x368] sm:$0x3]  ;;  %v915_v26 = vld [vmem:[#allocation0 + $0x370] sm:$0x3] }
 0x102   :  { %1157 = vst [vmem:[%s1749_s1 + $0xd4] sm:$0x3] %v891_v22  ;;  %v921_v27 = vld [vmem:[#allocation0 + $0x378] sm:$0x3]  ;;  %v975_v28 = vld [vmem:[#allocation0 + $0x3c0] sm:$0x3] }
 0x103   :  { %1158 = vst [vmem:[%s1749_s1 + $0xd6] sm:$0x3] %v897_v23  ;;  %v981_v29 = vld [vmem:[#allocation0 + $0x3c8] sm:$0x3]  ;;  %v987_v30 = vld [vmem:[#allocation0 + $0x3d0] sm:$0x3] }
 0x104   :  { %1159 = vst [vmem:[%s1749_s1 + $0xd8] sm:$0x3] %v903_v24  ;;  %v993_v31 = vld [vmem:[#allocation0 + $0x3d8] sm:$0x3]  ;;  %v999_v32 = vld [vmem:[#allocation0 + $0x3e0] sm:$0x3] }
 0x105   :  { %1160 = vst [vmem:[%s1749_s1 + $0xda] sm:$0x3] %v909_v25  ;;  %v1005_v33 = vld [vmem:[#allocation0 + $0x3e8] sm:$0x3]  ;;  %v1011_v34 = vld [vmem:[#allocation0 + $0x3f0] sm:$0x3] }
 0x106   :  { %1161 = vst [vmem:[%s1749_s1 + $0xdc] sm:$0x3] %v915_v26  ;;  %v1017_v35 = vld [vmem:[#allocation0 + $0x3f8] sm:$0x3] }
 0x107   :  { %1162 = vst [vmem:[%s1749_s1 + $0xde] sm:$0x3] %v921_v27 }
 0x108   :  { %1171 = vst [vmem:[%s1749_s1 + $0xf0] sm:$0x3] %v975_v28 }
 0x109   :  { %1172 = vst [vmem:[%s1749_s1 + $0xf2] sm:$0x3] %v981_v29 }
 0x10a   :  { %1173 = vst [vmem:[%s1749_s1 + $0xf4] sm:$0x3] %v987_v30 }
 0x10b   :  { %1174 = vst [vmem:[%s1749_s1 + $0xf6] sm:$0x3] %v993_v31 }
 0x10c   :  { %1175 = vst [vmem:[%s1749_s1 + $0xf8] sm:$0x3] %v999_v32 }
 0x10d   :  { %1176 = vst [vmem:[%s1749_s1 + $0xfa] sm:$0x3] %v1005_v33 }
 0x10e   :  { %1177 = vst [vmem:[%s1749_s1 + $0xfc] sm:$0x3] %v1011_v34 }
 0x10f   :  { %1178 = vst [vmem:[%s1749_s1 + $0xfe] sm:$0x3] %v1017_v35 }

// kernel: forward.1
= control target key start
LH: loop header
LB: loop body
LE: loop exit
PB: predicated region body
PF: predicated region fallthrough
CT: control target
= control target key end

     0   :  { %11 = vsyncpa [#allocation3], 0  ;;  %s10264_s0 = inlined_call_operand.vmem [shape: f32[64,128], index: 0, kind: input, shape index: {}]   ;;  %s10265_s1 = inlined_call_operand.hbm [shape: f32[2,1,16], index: 1, kind: input, shape index: {}]   ;;  %s10266_s2 = inlined_call_operand.hbm [shape: bf16[9040,128], index: 2, kind: input, shape index: {}]   ;;  %s10267_s3 = inlined_call_operand.hbm [shape: f32[152,128], index: 3, kind: input, shape index: {}]   ;;  %s10268_s4 = inlined_call_operand.vmem [shape: f32[2,64,128], index: 4, kind: output, shape index: {0}]   ;;  %s10269_s5 = inlined_call_operand.vmem [shape: f32[2,1,32], index: 5, kind: output, shape index: {1}]  }
   0x1   :  { %12 = vsyncpa [#allocation5], 0  ;;  %s32_s20 = sshll.u32 %s10266_s2, 4  ;;  %s9892_s21 = smov [#allocation4]   ;;  %s33_s20 = int_to_ptr.hbm [resolvable:$true] %s32_s20 }
   0x2   :  { %s34_s22 = sshll.u32 %s9892_s21, 4  ;;  %s19_s25 = sshll.u32 %s10265_s1, 4  ;;  %s35_s22 = int_to_ptr.vmem [resolvable:$true] %s34_s22  ;;  %s20_s25 = int_to_ptr.hbm [resolvable:$true] %s19_s25 }
   0x3   :  { %s9893_s26 = smov 64   ;;  %s9894_s27 = smov 4  }
   0x4   :  { %40 = dma.hbm_to_vmem [thread:$0]  %s33_s20, 72320, %s35_s22, [#allocation5], %s9893_s26, %s9893_s26, %s9894_s27  }
   0x5   :  { %s9895_s28 = smov [#allocation2]   ;;  %s9896_s30 = smov 16  }
   0x6   :  { %s21_s29 = sshll.u32 %s9895_s28, 4  ;;  %s9897_s6 = smov 1   ;;  %s22_s29 = int_to_ptr.vmem [resolvable:$true] %s21_s29 }
   0x7   :  { %27 = dma.hbm_to_vmem [thread:$0]  %s20_s25, 32, %s22_s29, [#allocation3], %s9896_s30, %s9896_s30, %s9897_s6  }
   0x8   :  { %s45_s8 = sshll.u32 %s10267_s3, 4  ;;  %s9898_s9 = smov [#allocation6]   ;;  %s46_s8 = int_to_ptr.hbm [resolvable:$true] %s45_s8 }
   0x9   :  { %s47_s10 = sshll.u32 %s9898_s9, 4  ;;  %s9899_s1 = smov 128   ;;  %s48_s10 = int_to_ptr.vmem [resolvable:$true] %s47_s10 }
   0xa   :  { %s9900_s11 = smov 8  }
   0xb   :  { %53 = dma.hbm_to_vmem [thread:$0]  %s46_s8, 2432, %s48_s10, [#allocation5], %s9899_s1, %s9899_s1, %s9900_s11  }
   0xc   :  { %9888 = dma.done.wait [#allocation3], 32  }
   0xd   :  { %9889 = vsyncadd [#allocation3], 4294967264 }
   0xe   :  { %9890 = dma.done.wait [#allocation5], 74752  }
   0xf   :  { %9891 = vsyncadd [#allocation5], 4294892544  ;;  %v73_v0 = vld [vmem:[%s10264_s0 + $0x30] sm:$0xff]  ;;  %v74_v1 = vld [vmem:[%s10264_s0 + $0x38] sm:$0xff]  ;;  %vm135_vm0 = vcmask 523264   ;;  %vm599_vm1 = vcmask 261120  }
  0x10   :  { %v71_v2 = vld [vmem:[%s10264_s0 + $0x20] sm:$0xff]  ;;  %v94_v3 = vpack.c.bf16 %v74_v1, %v73_v0  ;;  %v72_v4 = vld [vmem:[%s10264_s0 + $0x28] sm:$0xff]  ;;  %v69_v6 = vld [vmem:[%s10264_s0 + $0x10] sm:$0xff]  ;;  %vm1697_vm2 = vcmask 130048   ;;  %vm2644_vm3 = vcmask 1043456   ;;  %vm2637_vm4 = vcmask 64512  }
  0x11   :  { %v93_v5 = vpack.c.bf16 %v72_v4, %v71_v2  ;;  %v70_v7 = vld [vmem:[%s10264_s0 + $0x18] sm:$0xff]  ;;  %v67_v8 = vld [vmem:[%s10264_s0] sm:$0xff]  ;;  %v68_v9 = vld [vmem:[%s10264_s0 + $0x8] sm:$0xff]  ;;  %vm3522_vm5 = vcmask 253952   ;;  %vm3525_vm6 = vcmask 254977   ;;  %s9901_s6 = smov 112  }
  0x12   :  { %164 = vmatpush.bf16.msra.mxu0 %v94_v3  ;;  %v92_v10 = vpack.c.bf16 %v70_v7, %v69_v6  ;;  %v91_v11 = vpack.c.bf16 %v68_v9, %v67_v8  ;;  %v9188_v12 = vld [vmem:[#allocation4] sm:$0xff]  ;;  %v9189_v13 = vld [vmem:[#allocation4 + $0x8] sm:$0xff]  ;;  %v9190_v14 = vld [vmem:[#allocation4 + $0x10] sm:$0xff]  ;;  %vm3533_vm7 = vcmask 1040384   ;;  %vm3559_vm8 = vcmask 15360   ;;  %s9903_s2 = smov 48  }
  0x13   :  { %v9191_v15 = vld [vmem:[#allocation4 + $0x18] sm:$0xff]  ;;  %v9192_v16 = vld [vmem:[#allocation4 + $0x20] sm:$0xff]  ;;  %v9202_v18 = vld [vmem:[#allocation4 + $0x70] sm:$0xff]  ;;  %vm3602_vm9 = vcmask 392192  }
  0x14   :  { %v9203_v17 = vld [vmem:[#allocation4 + $0x78] sm:$0xff]  ;;  %v9193_v19 = vld [vmem:[#allocation4 + $0x28] sm:$0xff]  ;;  %v9200_v21 = vld [vmem:[#allocation4 + $0x60] sm:$0xff] }
  0x15   :  { %475 = vmatpush.bf16.msra.mxu1 %v9203_v17  ;;  %v9201_v20 = vld [vmem:[#allocation4 + $0x68] sm:$0xff]  ;;  %v9199_v22 = vld [vmem:[#allocation4 + $0x58] sm:$0xff]  ;;  %v9198_v23 = vld [vmem:[#allocation4 + $0x50] sm:$0xff] }
  0x16   :  { %165 = vmatpush.bf16.msra.mxu0 %v93_v5  ;;  %v9194_v24 = vld [vmem:[#allocation4 + $0x30] sm:$0xff]  ;;  %v9197_v25 = vld [vmem:[#allocation4 + $0x48] sm:$0xff]  ;;  %v9196_v26 = vld [vmem:[#allocation4 + $0x40] sm:$0xff] }
  0x17   :  { %v9211_v27 = vld [vmem:[#allocation4 + $0xb8] sm:$0xff]  ;;  %v9210_v28 = vld [vmem:[#allocation4 + $0xb0] sm:$0xff]  ;;  %v9209_v30 = vld [vmem:[#allocation4 + $0xa8] sm:$0xff] }
  0x18   :  { %494 = vmatpush.bf16.msra.mxu2 %v9211_v27  ;;  %v9195_v29 = vld [vmem:[#allocation4 + $0x38] sm:$0xff]  ;;  %v9208_v31 = vld [vmem:[#allocation4 + $0xa0] sm:$0xff]  ;;  %v9206_v33 = vld [vmem:[#allocation4 + $0x90] sm:$0xff] }
  0x19   :  { %476 = vmatpush.bf16.msra.mxu1 %v9202_v18  ;;  %v9207_v32 = vld [vmem:[#allocation4 + $0x98] sm:$0xff]  ;;  %v9205_v35 = vld [vmem:[#allocation4 + $0x88] sm:$0xff]  ;;  %v9204_v36 = vld [vmem:[#allocation4 + $0x80] sm:$0xff] }
  0x1a   :  { %166 = vmatpush.bf16.msra.mxu0 %v92_v10  ;;  %v9219_v39 = vld [vmem:[#allocation4 + $0xf8] sm:$0xff]  ;;  %v9218_v40 = vld [vmem:[#allocation4 + $0xf0] sm:$0xff]  ;;  %v9217_v42 = vld [vmem:[#allocation4 + $0xe8] sm:$0xff] }
  0x1b   :  { %513 = vmatpush.bf16.msra.mxu3 %v9219_v39  ;;  %v9216_v43 = vld [vmem:[#allocation4 + $0xe0] sm:$0xff]  ;;  %v9215_v46 = vld [vmem:[#allocation4 + $0xd8] sm:$0xff]  ;;  %v9214_v47 = vld [vmem:[#allocation4 + $0xd0] sm:$0xff] }
  0x1c   :  { %495 = vmatpush.bf16.msra.mxu2 %v9210_v28  ;;  %v9213_v49 = vld [vmem:[#allocation4 + $0xc8] sm:$0xff]  ;;  %v9212_v50 = vld [vmem:[#allocation4 + $0xc0] sm:$0xff]  ;;  %v9227_v53 = vld [vmem:[#allocation4 + $0x138] sm:$0xff] }
  0x1d   :  { %477 = vmatpush.bf16.msra.mxu1 %v9201_v20  ;;  %v9226_v54 = vld [vmem:[#allocation4 + $0x130] sm:$0xff]  ;;  %v9225_v56 = vld [vmem:[#allocation4 + $0x128] sm:$0xff]  ;;  %v9224_v57 = vld [vmem:[#allocation4 + $0x120] sm:$0xff] }
  0x1e   :  { %167 = vmatpush.bf16.msra.mxu0 %v91_v11  ;;  %v9223_v60 = vld [vmem:[#allocation4 + $0x118] sm:$0xff]  ;;  %v9222_v61 = vld [vmem:[#allocation4 + $0x110] sm:$0xff]  ;;  %v9221_v63 = vld [vmem:[#allocation4 + $0x108] sm:$0xff] }
  0x1f   :  { %514 = vmatpush.bf16.msra.mxu3 %v9218_v40  ;;  %v9220_v0 = vld [vmem:[#allocation4 + $0x100] sm:$0xff] }
  0x20   :  { %496 = vmatpush.bf16.msra.mxu2 %v9209_v30 }
  0x21   :  { %6865 = vmatmul.msk.bf16.vlgmr.msra.gmra.mxu0 %vm135_vm0, %v9188_v12  ;;  %478 = vmatpush.bf16.msra.mxu1 %v9200_v21 }
  0x23   :  { %515 = vmatpush.bf16.msra.mxu3 %v9217_v42 }
  0x24   :  { %497 = vmatpush.bf16.msra.mxu2 %v9208_v31 }
  0x25   :  { %479 = vmatpush.bf16.msra.mxu1 %v9199_v22 }
  0x27   :  { %516 = vmatpush.bf16.msra.mxu3 %v9216_v43 }
  0x28   :  { %498 = vmatpush.bf16.msra.mxu2 %v9207_v32 }
  0x29   :  { %480 = vmatpush.bf16.msra.mxu1 %v9198_v23 }
  0x2b   :  { %517 = vmatpush.bf16.msra.mxu3 %v9215_v46 }
  0x2c   :  { %499 = vmatpush.bf16.msra.mxu2 %v9206_v33 }
  0x2d   :  { %481 = vmatpush.bf16.msra.mxu1 %v9197_v25 }
  0x2f   :  { %518 = vmatpush.bf16.msra.mxu3 %v9214_v47 }
  0x30   :  { %500 = vmatpush.bf16.msra.mxu2 %v9205_v35 }
  0x31   :  { %6866 = vmatmul.msk.bf16.gmra.mxu0 %vm135_vm0, %v9189_v13  ;;  %482 = vmatpush.bf16.msra.mxu1 %v9196_v26 }
  0x33   :  { %519 = vmatpush.bf16.msra.mxu3 %v9213_v49 }
  0x34   :  { %501 = vmatpush.bf16.msra.mxu2 %v9204_v36 }
  0x35   :  { %532 = vmatpush.bf16.msrb.mxu1 %v9227_v53  ;;  %v9230_v53 = vld [vmem:[#allocation4 + $0x150] sm:$0xff] }
  0x37   :  { %520 = vmatpush.bf16.msra.mxu3 %v9212_v50 }
  0x39   :  { %533 = vmatpush.bf16.msrb.mxu1 %v9226_v54  ;;  %v9231_v54 = vld [vmem:[#allocation4 + $0x158] sm:$0xff] }
  0x3d   :  { %534 = vmatpush.bf16.msrb.mxu1 %v9225_v56  ;;  %v9240_v56 = vld [vmem:[#allocation4 + $0x1a0] sm:$0xff] }
  0x41   :  { %6867 = vmatmul.msk.bf16.gmra.mxu0 %vm135_vm0, %v9190_v14  ;;  %535 = vmatpush.bf16.msrb.mxu1 %v9224_v57  ;;  %v9239_v57 = vld [vmem:[#allocation4 + $0x198] sm:$0xff] }
  0x45   :  { %536 = vmatpush.bf16.msrb.mxu1 %v9223_v60  ;;  %v9237_v60 = vld [vmem:[#allocation4 + $0x188] sm:$0xff] }
  0x49   :  { %537 = vmatpush.bf16.msrb.mxu1 %v9222_v61  ;;  %v9233_v61 = vld [vmem:[#allocation4 + $0x168] sm:$0xff] }
  0x4d   :  { %538 = vmatpush.bf16.msrb.mxu1 %v9221_v63  ;;  %v9235_v63 = vld [vmem:[#allocation4 + $0x178] sm:$0xff] }
  0x51   :  { %6868 = vmatmul.msk.bf16.gmra.mxu0 %vm135_vm0, %v9191_v15  ;;  %539 = vmatpush.bf16.msrb.mxu1 %v9220_v0  ;;  %v9234_v0 = vld [vmem:[#allocation4 + $0x170] sm:$0xff] }
  0x61   :  { %6869 = vmatmul.msk.bf16.gmra.mxu0 %vm135_vm0, %v9192_v16 }
  0x71   :  { %6870 = vmatmul.msk.bf16.gmra.mxu0 %vm135_vm0, %v9193_v19 }
  0x81   :  { %6871 = vmatmul.msk.bf16.gmra.mxu0 %vm135_vm0, %v9194_v24  ;;  %v9763_v24 = vld [vmem:[#allocation6] ss:$0 sm:$0xff] }
  0x91   :  { %6872 = vmatmul.msk.bf16.gmra.mxu0 %vm135_vm0, %v9195_v29 }
  0x9e   :  { %v169_v34 = vpop.f32.mrf.mxu0 }
  0xa6   :  { %v171_v37 = vpop.f32.mrf.mxu0 }
  0xa7   :  { %v273_v38 = vpack.c.bf16 %v171_v37, %v169_v34 }
  0xa9   :  { %483 = vmatmul.bf16.vlgmr.msra.gmra.mxu1 %v273_v38 }
  0xae   :  { %v174_v41 = vpop.f32.mrf.mxu0 }
  0xb6   :  { %v176_v44 = vpop.f32.mrf.mxu0 }
  0xb7   :  { %v277_v45 = vpack.c.bf16 %v176_v44, %v174_v41 }
  0xb9   :  { %488 = vmatmul.bf16.gmra.mxu1 %v277_v45 }
  0xbe   :  { %v179_v48 = vpop.f32.mrf.mxu0 }
  0xc6   :  { %v181_v51 = vpop.f32.mrf.mxu0 }
  0xc7   :  { %v274_v52 = vpack.c.bf16 %v181_v51, %v179_v48  ;;  %v9228_v51 = vld [vmem:[#allocation4 + $0x140] sm:$0xff] }
  0xc9   :  { %502 = vmatmul.bf16.vlgmr.msra.gmra.mxu2 %v274_v52  ;;  %v9229_v52 = vld [vmem:[#allocation4 + $0x148] sm:$0xff] }
  0xce   :  { %v184_v55 = vpop.f32.mrf.mxu0 }
  0xd6   :  { %v186_v58 = vpop.f32.mrf.mxu0 }
  0xd7   :  { %v278_v59 = vpack.c.bf16 %v186_v58, %v184_v55  ;;  %v9241_v55 = vld [vmem:[#allocation4 + $0x1a8] sm:$0xff]  ;;  %v9238_v58 = vld [vmem:[#allocation4 + $0x190] sm:$0xff] }
  0xd8   :  { %857 = vmatpush.bf16.msrb.mxu3 %v9241_v55 }
  0xd9   :  { %507 = vmatmul.bf16.gmra.mxu2 %v278_v59  ;;  %v9232_v59 = vld [vmem:[#allocation4 + $0x160] sm:$0xff] }
  0xdc   :  { %858 = vmatpush.bf16.msrb.mxu3 %v9240_v56 }
  0xde   :  { %v189_v62 = vpop.f32.mrf.mxu0 }
  0xe0   :  { %859 = vmatpush.bf16.msrb.mxu3 %v9239_v57 }
  0xe4   :  { %860 = vmatpush.bf16.msrb.mxu3 %v9238_v58 }
  0xe6   :  { %v191_v1 = vpop.f32.mrf.mxu0 }
  0xe7   :  { %v275_v2 = vpack.c.bf16 %v191_v1, %v189_v62  ;;  %v9236_v62 = vld [vmem:[#allocation4 + $0x180] sm:$0xff]  ;;  %v9249_v1 = vld [vmem:[#allocation4 + $0x1e8] sm:$0xff] }
  0xe8   :  { %861 = vmatpush.bf16.msrb.mxu3 %v9237_v60  ;;  %876 = vmatpush.bf16.msra.mxu1 %v9249_v1 }
  0xe9   :  { %521 = vmatmul.bf16.vlgmr.msra.gmra.mxu3 %v275_v2  ;;  %v9248_v2 = vld [vmem:[#allocation4 + $0x1e0] sm:$0xff] }
  0xec   :  { %862 = vmatpush.bf16.msrb.mxu3 %v9236_v62  ;;  %877 = vmatpush.bf16.msra.mxu1 %v9248_v2 }
  0xee   :  { %v194_v3 = vpop.f32.mrf.mxu0 }
  0xf0   :  { %863 = vmatpush.bf16.msrb.mxu3 %v9235_v63 }
  0xf4   :  { %864 = vmatpush.bf16.msrb.mxu3 %v9234_v0 }
  0xf6   :  { %v196_v4 = vpop.f32.mrf.mxu0 }
  0xf7   :  { %v279_v5 = vpack.c.bf16 %v196_v4, %v194_v3  ;;  %v9247_v3 = vld [vmem:[#allocation4 + $0x1d8] sm:$0xff]  ;;  %v9246_v4 = vld [vmem:[#allocation4 + $0x1d0] sm:$0xff] }
  0xf8   :  { %878 = vmatpush.bf16.msra.mxu1 %v9247_v3 }
  0xf9   :  { %526 = vmatmul.bf16.gmra.mxu3 %v279_v5  ;;  %v9245_v5 = vld [vmem:[#allocation4 + $0x1c8] sm:$0xff] }
  0xfc   :  { %879 = vmatpush.bf16.msra.mxu1 %v9246_v4 }
  0xfe   :  { %v199_v6 = vpop.f32.mrf.mxu0 }
 0x100   :  { %880 = vmatpush.bf16.msra.mxu1 %v9245_v5 }
 0x106   :  { %v201_v7 = vpop.f32.mrf.mxu0 }
 0x107   :  { %v276_v8 = vpack.c.bf16 %v201_v7, %v199_v6  ;;  %v9244_v6 = vld [vmem:[#allocation4 + $0x1c0] sm:$0xff] }
 0x108   :  { %881 = vmatpush.bf16.msra.mxu1 %v9244_v6 }
 0x109   :  { %540 = vmatmul.bf16.vlgmr.msrb.gmra.mxu1 %v276_v8  ;;  %v9243_v8 = vld [vmem:[#allocation4 + $0x1b8] sm:$0xff] }
 0x10c   :  { %882 = vmatpush.bf16.msra.mxu1 %v9243_v8 }
 0x10e   :  { %v204_v9 = vpop.f32.mrf.mxu0 }
 0x116   :  { %v206_v10 = vpop.f32.mrf.mxu0 }
 0x117   :  { %v280_v11 = vpack.c.bf16 %v206_v10, %v204_v9  ;;  %v9242_v9 = vld [vmem:[#allocation4 + $0x1b0] sm:$0xff] }
 0x118   :  { %883 = vmatpush.bf16.msra.mxu1 %v9242_v9 }
 0x119   :  { %545 = vmatmul.bf16.gmra.mxu1 %v280_v11 }
 0x126   :  { %v484_v12 = vpop.f32.mrf.mxu1 }
 0x127   :  { %v485_v32 = vadd.f32 %v9763_v24, %v484_v12  ;;  %v9257_v12 = vld [vmem:[#allocation4 + $0x228] sm:$0xff] }
 0x128   :  { %895 = vmatpush.bf16.msra.mxu3 %v9257_v12  ;;  %v9260_v12 = vld [vmem:[#allocation4 + $0x240] sm:$0xff] }
 0x12e   :  { %v486_v13 = vpop.f32.mrf.mxu1 }
 0x12f   :  { %v487_v28 = vadd.f32 %v9763_v24, %v486_v13  ;;  %v9256_v13 = vld [vmem:[#allocation4 + $0x220] sm:$0xff] }
 0x130   :  { %896 = vmatpush.bf16.msra.mxu3 %v9256_v13  ;;  %v9261_v13 = vld [vmem:[#allocation4 + $0x248] sm:$0xff] }
 0x136   :  { %v489_v14 = vpop.f32.mrf.mxu1 }
 0x137   :  { %v490_v26 = vadd.f32 %v9763_v24, %v489_v14 }
 0x13e   :  { %v491_v17 = vpop.f32.mrf.mxu1 }
 0x13f   :  { %v492_v29 = vadd.f32 %v9763_v24, %v491_v17 }
 0x14c   :  { %v503_v15 = vpop.f32.mrf.mxu2 }
 0x14d   :  { %v504_v36 = vadd.f32 %v503_v15, %v485_v32  ;;  %v9255_v15 = vld [vmem:[#allocation4 + $0x218] sm:$0xff] }
 0x14e   :  { %897 = vmatpush.bf16.msra.mxu3 %v9255_v15  ;;  %v9271_v15 = vld [vmem:[#allocation4 + $0x298] sm:$0xff] }
 0x154   :  { %v505_v18 = vpop.f32.mrf.mxu2 }
 0x155   :  { %v506_v33 = vadd.f32 %v505_v18, %v487_v28 }
 0x15c   :  { %v508_v21 = vpop.f32.mrf.mxu2 }
 0x15d   :  { %v509_v30 = vadd.f32 %v508_v21, %v490_v26 }
 0x164   :  { %v510_v27 = vpop.f32.mrf.mxu2 }
 0x165   :  { %v511_v34 = vadd.f32 %v510_v27, %v492_v29 }
 0x16c   :  { %v522_v16 = vpop.f32.mrf.mxu3 }
 0x16d   :  { %v523_v41 = vadd.f32 %v522_v16, %v504_v36  ;;  %v9254_v16 = vld [vmem:[#allocation4 + $0x210] sm:$0xff] }
 0x16e   :  { %898 = vmatpush.bf16.msra.mxu3 %v9254_v16  ;;  %v9270_v16 = vld [vmem:[#allocation4 + $0x290] sm:$0xff] }
 0x174   :  { %v524_v19 = vpop.f32.mrf.mxu3 }
 0x175   :  { %v525_v37 = vadd.f32 %v524_v19, %v506_v33  ;;  %v9253_v19 = vld [vmem:[#allocation4 + $0x208] sm:$0xff] }
 0x176   :  { %899 = vmatpush.bf16.msra.mxu3 %v9253_v19  ;;  %v9268_v19 = vld [vmem:[#allocation4 + $0x280] sm:$0xff] }
 0x17c   :  { %v527_v23 = vpop.f32.mrf.mxu3 }
 0x17d   :  { %v528_v35 = vadd.f32 %v527_v23, %v509_v30  ;;  %v9250_v23 = vld [vmem:[#allocation4 + $0x1f0] sm:$0xff] }
 0x184   :  { %v529_v31 = vpop.f32.mrf.mxu3 }
 0x185   :  { %v530_v38 = vadd.f32 %v529_v31, %v511_v34 }
 0x186   :  { %v541_v20 = vpop.f32.mrf.mxu1 }
 0x187   :  { %v9983_v44 = vadd.f32 %v541_v20, %v523_v41  ;;  %v9252_v20 = vld [vmem:[#allocation4 + $0x200] sm:$0xff] }
 0x188   :  { %900 = vmatpush.bf16.msra.mxu3 %v9252_v20  ;;  %v9262_v20 = vld [vmem:[#allocation4 + $0x250] sm:$0xff] }
 0x189   :  { %v551_v49 = vmax.f32 %v9983_v44, 0.0  ;;  %v9307_v44 = vld [vmem:[#allocation4 + $0x3b8] sm:$0xff] }
 0x18e   :  { %v543_v22 = vpop.f32.mrf.mxu1 }
 0x18f   :  { %v9979_v42 = vadd.f32 %v543_v22, %v525_v37  ;;  %v9251_v22 = vld [vmem:[#allocation4 + $0x1f8] sm:$0xff] }
 0x190   :  { %901 = vmatpush.bf16.msra.mxu3 %v9251_v22  ;;  %v9263_v22 = vld [vmem:[#allocation4 + $0x258] sm:$0xff] }
 0x191   :  { %v552_v47 = vmax.f32 %v9979_v42, 0.0  ;;  %v9299_v42 = vld [vmem:[#allocation4 + $0x378] sm:$0xff] }
 0x193   :  { %v567_v50 = vpack.c.bf16 %v552_v47, %v551_v49 }
 0x194   :  { %902 = vmatpush.bf16.msra.mxu3 %v9250_v23  ;;  %v9266_v23 = vld [vmem:[#allocation4 + $0x270] sm:$0xff] }
 0x196   :  { %v546_v25 = vpop.f32.mrf.mxu1 }
 0x197   :  { %v9977_v39 = vadd.f32 %v546_v25, %v528_v35 }
 0x199   :  { %v553_v45 = vmax.f32 %v9977_v39, 0.0  ;;  %v9289_v39 = vld [vmem:[#allocation4 + $0x328] sm:$0xff] }
 0x19e   :  { %v548_v40 = vpop.f32.mrf.mxu1 }
 0x19f   :  { %v9981_v43 = vadd.f32 %v548_v40, %v530_v38 }
 0x1a1   :  { %v554_v46 = vmax.f32 %v9981_v43, 0.0  ;;  %v9323_v43 = vld [vmem:[#allocation4 + $0x438] sm:$0xff] }
 0x1a3   :  { %v568_v48 = vpack.c.bf16 %v554_v46, %v553_v45 }
 0x1a5   :  { %624 = vmatpush.bf16.msrb.mxu2 %v568_v48 }
 0x1a9   :  { %625 = vmatpush.bf16.msrb.mxu2 %v567_v50 }
 0x1ac   :  { %7025 = vmatmul.msk.bf16.vlgmr.msrb.gmra.mxu2 %vm599_vm1, %v9228_v51 }
 0x1bc   :  { %7026 = vmatmul.msk.bf16.gmra.mxu2 %vm599_vm1, %v9229_v52 }
 0x1cc   :  { %7027 = vmatmul.msk.bf16.gmra.mxu2 %vm599_vm1, %v9230_v53  ;;  %v9764_v53 = vld [vmem:[#allocation6 + $0x8] ss:$0 sm:$0xff] }
 0x1dc   :  { %7028 = vmatmul.msk.bf16.gmra.mxu2 %vm599_vm1, %v9231_v54 }
 0x1ec   :  { %7029 = vmatmul.msk.bf16.gmra.mxu2 %vm599_vm1, %v9232_v59 }
 0x1fc   :  { %7030 = vmatmul.msk.bf16.gmra.mxu2 %vm599_vm1, %v9233_v61 }
 0x22f   :  { %v627_v7 = vpop.f32.mrf.mxu2 }
 0x237   :  { %v629_v10 = vpop.f32.mrf.mxu2 }
 0x238   :  { %v705_v11 = vpack.c.bf16 %v629_v10, %v627_v7  ;;  %v9258_v10 = vld [vmem:[#allocation4 + $0x230] sm:$0xff] }
 0x23a   :  { %865 = vmatmul.bf16.vlgmr.msrb.gmra.mxu3 %v705_v11  ;;  %v9259_v11 = vld [vmem:[#allocation4 + $0x238] sm:$0xff] }
 0x23b   :  { %1219 = vmatpush.bf16.msrb.mxu3 %v9271_v15 }
 0x23f   :  { %v632_v14 = vpop.f32.mrf.mxu2  ;;  %1220 = vmatpush.bf16.msrb.mxu3 %v9270_v16 }
 0x247   :  { %v634_v17 = vpop.f32.mrf.mxu2 }
 0x248   :  { %v708_v18 = vpack.c.bf16 %v634_v17, %v632_v14  ;;  %v9279_v14 = vld [vmem:[#allocation4 + $0x2d8] sm:$0xff]  ;;  %v9278_v17 = vld [vmem:[#allocation4 + $0x2d0] sm:$0xff] }
 0x249   :  { %1238 = vmatpush.bf16.msrb.mxu0 %v9279_v14 }
 0x24a   :  { %870 = vmatmul.bf16.gmra.mxu3 %v708_v18  ;;  %v9269_v18 = vld [vmem:[#allocation4 + $0x288] sm:$0xff] }
 0x24b   :  { %1221 = vmatpush.bf16.msrb.mxu3 %v9269_v18 }
 0x24d   :  { %1239 = vmatpush.bf16.msrb.mxu0 %v9278_v17 }
 0x24f   :  { %v637_v21 = vpop.f32.mrf.mxu2  ;;  %1222 = vmatpush.bf16.msrb.mxu3 %v9268_v19 }
 0x257   :  { %v639_v24 = vpop.f32.mrf.mxu2 }
 0x258   :  { %v706_v25 = vpack.c.bf16 %v639_v24, %v637_v21  ;;  %v9267_v21 = vld [vmem:[#allocation4 + $0x278] sm:$0xff]  ;;  %v9265_v24 = vld [vmem:[#allocation4 + $0x268] sm:$0xff] }
 0x259   :  { %1223 = vmatpush.bf16.msrb.mxu3 %v9267_v21 }
 0x25a   :  { %884 = vmatmul.bf16.vlgmr.msra.gmra.mxu1 %v706_v25  ;;  %v9287_v25 = vld [vmem:[#allocation4 + $0x318] sm:$0xff] }
 0x25b   :  { %1257 = vmatpush.bf16.msra.mxu2 %v9287_v25 }
 0x25d   :  { %1224 = vmatpush.bf16.msrb.mxu3 %v9266_v23 }
 0x25f   :  { %v642_v26 = vpop.f32.mrf.mxu2 }
 0x261   :  { %1225 = vmatpush.bf16.msrb.mxu3 %v9265_v24 }
 0x267   :  { %v644_v27 = vpop.f32.mrf.mxu2 }
 0x268   :  { %v709_v28 = vpack.c.bf16 %v644_v27, %v642_v26  ;;  %v9264_v26 = vld [vmem:[#allocation4 + $0x260] sm:$0xff]  ;;  %v9277_v27 = vld [vmem:[#allocation4 + $0x2c8] sm:$0xff] }
 0x269   :  { %1226 = vmatpush.bf16.msrb.mxu3 %v9264_v26  ;;  %1240 = vmatpush.bf16.msrb.mxu0 %v9277_v27 }
 0x26a   :  { %889 = vmatmul.bf16.gmra.mxu1 %v709_v28  ;;  %v9286_v28 = vld [vmem:[#allocation4 + $0x310] sm:$0xff] }
 0x26b   :  { %1258 = vmatpush.bf16.msra.mxu2 %v9286_v28 }
 0x26f   :  { %v647_v29 = vpop.f32.mrf.mxu2 }
 0x277   :  { %v649_v30 = vpop.f32.mrf.mxu2 }
 0x278   :  { %v707_v31 = vpack.c.bf16 %v649_v30, %v647_v29  ;;  %v9276_v29 = vld [vmem:[#allocation4 + $0x2c0] sm:$0xff]  ;;  %v9275_v30 = vld [vmem:[#allocation4 + $0x2b8] sm:$0xff] }
 0x279   :  { %1241 = vmatpush.bf16.msrb.mxu0 %v9276_v29 }
 0x27a   :  { %903 = vmatmul.bf16.vlgmr.msra.gmra.mxu3 %v707_v31  ;;  %v9285_v31 = vld [vmem:[#allocation4 + $0x308] sm:$0xff] }
 0x27b   :  { %1259 = vmatpush.bf16.msra.mxu2 %v9285_v31 }
 0x27d   :  { %1242 = vmatpush.bf16.msrb.mxu0 %v9275_v30 }
 0x27f   :  { %v652_v32 = vpop.f32.mrf.mxu2 }
 0x287   :  { %v654_v33 = vpop.f32.mrf.mxu2 }
 0x288   :  { %v710_v34 = vpack.c.bf16 %v654_v33, %v652_v32  ;;  %v9274_v32 = vld [vmem:[#allocation4 + $0x2b0] sm:$0xff] }
 0x289   :  { %1243 = vmatpush.bf16.msrb.mxu0 %v9274_v32 }
 0x28a   :  { %908 = vmatmul.bf16.gmra.mxu3 %v710_v34  ;;  %v9273_v34 = vld [vmem:[#allocation4 + $0x2a8] sm:$0xff] }
 0x28d   :  { %1244 = vmatpush.bf16.msrb.mxu0 %v9273_v34 }
 0x2bd   :  { %v866_v35 = vpop.f32.mrf.mxu3 }
 0x2be   :  { %v867_v59 = vadd.f32 %v9764_v53, %v866_v35  ;;  %v9272_v35 = vld [vmem:[#allocation4 + $0x2a0] sm:$0xff] }
 0x2bf   :  { %1245 = vmatpush.bf16.msrb.mxu0 %v9272_v35 }
 0x2c3   :  { %1617 = vmatpush.bf16.msra.mxu0 %v9299_v42 }
 0x2c5   :  { %v868_v36 = vpop.f32.mrf.mxu3 }
 0x2c6   :  { %v869_v56 = vadd.f32 %v9764_v53, %v868_v36 }
 0x2cd   :  { %v871_v37 = vpop.f32.mrf.mxu3 }
 0x2ce   :  { %v872_v54 = vadd.f32 %v9764_v53, %v871_v37 }
 0x2d5   :  { %v873_v40 = vpop.f32.mrf.mxu3 }
 0x2d6   :  { %v874_v57 = vadd.f32 %v9764_v53, %v873_v40  ;;  %v9281_v53 = vld [vmem:[#allocation4 + $0x2e8] sm:$0xff] }
 0x2d7   :  { %v885_v38 = vpop.f32.mrf.mxu1 }
 0x2d8   :  { %v886_v0 = vadd.f32 %v885_v38, %v867_v59  ;;  %v9284_v38 = vld [vmem:[#allocation4 + $0x300] sm:$0xff] }
 0x2d9   :  { %1260 = vmatpush.bf16.msra.mxu2 %v9284_v38  ;;  %v9295_v38 = vld [vmem:[#allocation4 + $0x358] sm:$0xff] }
 0x2df   :  { %v887_v41 = vpop.f32.mrf.mxu1 }
 0x2e0   :  { %v888_v60 = vadd.f32 %v887_v41, %v869_v56  ;;  %v9283_v41 = vld [vmem:[#allocation4 + $0x2f8] sm:$0xff] }
 0x2e1   :  { %1261 = vmatpush.bf16.msra.mxu2 %v9283_v41  ;;  %v9294_v41 = vld [vmem:[#allocation4 + $0x350] sm:$0xff] }
 0x2e7   :  { %v890_v51 = vpop.f32.mrf.mxu1 }
 0x2e8   :  { %v891_v58 = vadd.f32 %v890_v51, %v872_v54  ;;  %v9282_v51 = vld [vmem:[#allocation4 + $0x2f0] sm:$0xff]  ;;  %v9280_v54 = vld [vmem:[#allocation4 + $0x2e0] sm:$0xff] }
 0x2e9   :  { %1262 = vmatpush.bf16.msra.mxu2 %v9282_v51  ;;  %v9293_v51 = vld [vmem:[#allocation4 + $0x348] sm:$0xff] }
 0x2ed   :  { %1263 = vmatpush.bf16.msra.mxu2 %v9281_v53  ;;  %v9292_v53 = vld [vmem:[#allocation4 + $0x340] sm:$0xff] }
 0x2ef   :  { %v892_v55 = vpop.f32.mrf.mxu1 }
 0x2f0   :  { %v893_v61 = vadd.f32 %v892_v55, %v874_v57 }
 0x2f1   :  { %1264 = vmatpush.bf16.msra.mxu2 %v9280_v54  ;;  %v9304_v54 = vld [vmem:[#allocation4 + $0x3a0] sm:$0xff] }
 0x2f5   :  { %1631 = vmatpush.bf16.msrb.mxu2 %v9307_v44  ;;  %v9334_v44 = vld [vmem:[#allocation4 + $0x490] sm:$0xff] }
 0x2fd   :  { %v904_v48 = vpop.f32.mrf.mxu3 }
 0x2fe   :  { %v905_v3 = vadd.f32 %v904_v48, %v886_v0 }
 0x300   :  { %v914_v8 = vmax.f32 %v905_v3, 0.0 }
 0x305   :  { %v906_v50 = vpop.f32.mrf.mxu3 }
 0x306   :  { %v907_v1 = vadd.f32 %v906_v50, %v888_v60 }
 0x308   :  { %v915_v6 = vmax.f32 %v907_v1, 0.0 }
 0x30a   :  { %v930_v9 = vpack.c.bf16 %v915_v6, %v914_v8 }
 0x30d   :  { %v909_v52 = vpop.f32.mrf.mxu3 }
 0x30e   :  { %v910_v62 = vadd.f32 %v909_v52, %v891_v58 }
 0x310   :  { %v916_v4 = vmax.f32 %v910_v62, 0.0 }
 0x315   :  { %v911_v63 = vpop.f32.mrf.mxu3 }
 0x316   :  { %v912_v2 = vadd.f32 %v911_v63, %v893_v61 }
 0x318   :  { %v917_v5 = vmax.f32 %v912_v2, 0.0 }
 0x31a   :  { %v931_v7 = vpack.c.bf16 %v917_v5, %v916_v4 }
 0x31c   :  { %986 = vmatpush.bf16.msrb.mxu1 %v931_v7 }
 0x320   :  { %987 = vmatpush.bf16.msrb.mxu1 %v930_v9 }
 0x323   :  { %7151 = vmatmul.msk.bf16.vlgmr.msrb.gmra.mxu1 %vm599_vm1, %v9258_v10  ;;  %v9765_v10 = vld [vmem:[#allocation6 + $0x10] ss:$0 sm:$0xff] }
 0x324   :  { %1659 = vmatpush.bf16.msra.mxu1 %v9323_v43 }
 0x333   :  { %7152 = vmatmul.msk.bf16.gmra.mxu1 %vm599_vm1, %v9259_v11 }
 0x343   :  { %7153 = vmatmul.msk.bf16.gmra.mxu1 %vm599_vm1, %v9260_v12 }
 0x353   :  { %7154 = vmatmul.msk.bf16.gmra.mxu1 %vm599_vm1, %v9261_v13 }
 0x363   :  { %7155 = vmatmul.msk.bf16.gmra.mxu1 %vm599_vm1, %v9262_v20 }
 0x373   :  { %7156 = vmatmul.msk.bf16.gmra.mxu1 %vm599_vm1, %v9263_v22 }
 0x3a0   :  { %v989_v33 = vpop.f32.mrf.mxu1 }
 0x3a8   :  { %v991_v36 = vpop.f32.mrf.mxu1 }
 0x3a9   :  { %v1067_v37 = vpack.c.bf16 %v991_v36, %v989_v33 }
 0x3ab   :  { %1227 = vmatmul.bf16.vlgmr.msrb.gmra.mxu3 %v1067_v37  ;;  %v9288_v37 = vld [vmem:[#allocation4 + $0x320] sm:$0xff] }
 0x3b0   :  { %v994_v40 = vpop.f32.mrf.mxu1 }
 0x3b8   :  { %v996_v48 = vpop.f32.mrf.mxu1 }
 0x3b9   :  { %v1070_v50 = vpack.c.bf16 %v996_v48, %v994_v40  ;;  %v9291_v40 = vld [vmem:[#allocation4 + $0x338] sm:$0xff]  ;;  %v9306_v48 = vld [vmem:[#allocation4 + $0x3b0] sm:$0xff] }
 0x3ba   :  { %1632 = vmatpush.bf16.msrb.mxu2 %v9306_v48  ;;  %v9326_v48 = vld [vmem:[#allocation4 + $0x450] sm:$0xff] }
 0x3bb   :  { %1232 = vmatmul.bf16.gmra.mxu3 %v1070_v50  ;;  %v9322_v50 = vld [vmem:[#allocation4 + $0x430] sm:$0xff] }
 0x3bc   :  { %1660 = vmatpush.bf16.msra.mxu1 %v9322_v50  ;;  %v9329_v50 = vld [vmem:[#allocation4 + $0x468] sm:$0xff] }
 0x3c0   :  { %v999_v52 = vpop.f32.mrf.mxu1 }
 0x3c8   :  { %v1001_v55 = vpop.f32.mrf.mxu1 }
 0x3c9   :  { %v1068_v56 = vpack.c.bf16 %v1001_v55, %v999_v52  ;;  %v9305_v52 = vld [vmem:[#allocation4 + $0x3a8] sm:$0xff]  ;;  %v9303_v55 = vld [vmem:[#allocation4 + $0x398] sm:$0xff] }
 0x3ca   :  { %1633 = vmatpush.bf16.msrb.mxu2 %v9305_v52  ;;  %v9328_v52 = vld [vmem:[#allocation4 + $0x460] sm:$0xff] }
 0x3cb   :  { %1246 = vmatmul.bf16.vlgmr.msrb.gmra.mxu0 %v1068_v56  ;;  %v9315_v56 = vld [vmem:[#allocation4 + $0x3f8] sm:$0xff] }
 0x3ce   :  { %1634 = vmatpush.bf16.msrb.mxu2 %v9304_v54  ;;  %v9327_v54 = vld [vmem:[#allocation4 + $0x458] sm:$0xff] }
 0x3d0   :  { %v1004_v57 = vpop.f32.mrf.mxu1 }
 0x3d2   :  { %1635 = vmatpush.bf16.msrb.mxu2 %v9303_v55  ;;  %v9339_v55 = vld [vmem:[#allocation4 + $0x4b8] sm:$0xff] }
 0x3d8   :  { %v1006_v58 = vpop.f32.mrf.mxu1 }
 0x3d9   :  { %v1071_v59 = vpack.c.bf16 %v1006_v58, %v1004_v57  ;;  %v9321_v57 = vld [vmem:[#allocation4 + $0x428] sm:$0xff]  ;;  %v9302_v58 = vld [vmem:[#allocation4 + $0x390] sm:$0xff] }
 0x3da   :  { %1661 = vmatpush.bf16.msra.mxu1 %v9321_v57  ;;  %1636 = vmatpush.bf16.msrb.mxu2 %v9302_v58  ;;  %v9350_v57 = vld [vmem:[#allocation4 + $0x510] sm:$0xff]  ;;  %v9337_v58 = vld [vmem:[#allocation4 + $0x4a8] sm:$0xff] }
 0x3db   :  { %1251 = vmatmul.bf16.gmra.mxu0 %v1071_v59  ;;  %v9314_v59 = vld [vmem:[#allocation4 + $0x3f0] sm:$0xff] }
 0x3e0   :  { %v1009_v60 = vpop.f32.mrf.mxu1 }
 0x3e8   :  { %v1011_v61 = vpop.f32.mrf.mxu1 }
 0x3e9   :  { %v1069_v62 = vpack.c.bf16 %v1011_v61, %v1009_v60  ;;  %v9301_v60 = vld [vmem:[#allocation4 + $0x388] sm:$0xff] }
 0x3ea   :  { %v9313_v61 = vld [vmem:[#allocation4 + $0x3e8] sm:$0xff]  ;;  %1637 = vmatpush.bf16.msrb.mxu2 %v9301_v60  ;;  %v9336_v60 = vld [vmem:[#allocation4 + $0x4a0] sm:$0xff] }
 0x3eb   :  { %1265 = vmatmul.bf16.vlgmr.msra.gmra.mxu2 %v1069_v62  ;;  %v9300_v62 = vld [vmem:[#allocation4 + $0x380] sm:$0xff] }
 0x3ee   :  { %1638 = vmatpush.bf16.msrb.mxu2 %v9300_v62  ;;  %v9335_v62 = vld [vmem:[#allocation4 + $0x498] sm:$0xff] }
 0x3f0   :  { %v1014_v63 = vpop.f32.mrf.mxu1 }
 0x3f8   :  { %v1016_v0 = vpop.f32.mrf.mxu1 }
 0x3f9   :  { %v1072_v1 = vpack.c.bf16 %v1016_v0, %v1014_v63  ;;  %v9312_v63 = vld [vmem:[#allocation4 + $0x3e0] sm:$0xff] }
 0x3fa   :  { %v9320_v0 = vld [vmem:[#allocation4 + $0x420] sm:$0xff] }
 0x3fb   :  { %1270 = vmatmul.bf16.gmra.mxu2 %v1072_v1  ;;  %v9311_v1 = vld [vmem:[#allocation4 + $0x3d8] sm:$0xff]  ;;  %1662 = vmatpush.bf16.msra.mxu1 %v9320_v0  ;;  %v9346_v0 = vld [vmem:[#allocation4 + $0x4f0] sm:$0xff] }
 0x42e   :  { %v1228_v2 = vpop.f32.mrf.mxu3 }
 0x42f   :  { %v1229_v17 = vadd.f32 %v9765_v10, %v1228_v2  ;;  %v9310_v2 = vld [vmem:[#allocation4 + $0x3d0] sm:$0xff] }
 0x436   :  { %v1230_v4 = vpop.f32.mrf.mxu3 }
 0x437   :  { %v1231_v14 = vadd.f32 %v9765_v10, %v1230_v4  ;;  %v9309_v4 = vld [vmem:[#allocation4 + $0x3c8] sm:$0xff] }
 0x43e   :  { %v1233_v7 = vpop.f32.mrf.mxu3 }
 0x43f   :  { %v1234_v12 = vadd.f32 %v9765_v10, %v1233_v7 }
 0x446   :  { %v1235_v13 = vpop.f32.mrf.mxu3 }
 0x447   :  { %v1236_v18 = vadd.f32 %v9765_v10, %v1235_v13 }
 0x448   :  { %v1247_v3 = vpop.f32.mrf.mxu0 }
 0x449   :  { %v1248_v21 = vadd.f32 %v1247_v3, %v1229_v17 }
 0x450   :  { %v1249_v5 = vpop.f32.mrf.mxu0 }
 0x451   :  { %v1250_v19 = vadd.f32 %v1249_v5, %v1231_v14  ;;  %v9319_v5 = vld [vmem:[#allocation4 + $0x418] sm:$0xff] }
 0x452   :  { %1663 = vmatpush.bf16.msra.mxu1 %v9319_v5 }
 0x458   :  { %v1252_v9 = vpop.f32.mrf.mxu0 }
 0x459   :  { %v1253_v15 = vadd.f32 %v1252_v9, %v1234_v12  ;;  %v9318_v9 = vld [vmem:[#allocation4 + $0x410] sm:$0xff]  ;;  %v9316_v12 = vld [vmem:[#allocation4 + $0x400] sm:$0xff] }
 0x45a   :  { %1664 = vmatpush.bf16.msra.mxu1 %v9318_v9 }
 0x460   :  { %v1254_v16 = vpop.f32.mrf.mxu0 }
 0x461   :  { %v1255_v22 = vadd.f32 %v1254_v16, %v1236_v18 }
 0x46e   :  { %v1266_v6 = vpop.f32.mrf.mxu2 }
 0x46f   :  { %v1267_v25 = vadd.f32 %v1266_v6, %v1248_v21  ;;  %v9308_v6 = vld [vmem:[#allocation4 + $0x3c0] sm:$0xff] }
 0x471   :  { %v1276_v30 = vadd.f32 %v1267_v25, %v551_v49  ;;  %v9290_v49 = vld [vmem:[#allocation4 + $0x330] sm:$0xff]  ;;  %v9766_v25 = vld [vmem:[#allocation6 + $0x18] ss:$0 sm:$0xff] }
 0x473   :  { %v1280_v35 = vmax.f32 %v1276_v30, 0.0 }
 0x476   :  { %v1268_v8 = vpop.f32.mrf.mxu2 }
 0x477   :  { %v1269_v23 = vadd.f32 %v1268_v8, %v1250_v19 }
 0x479   :  { %v1277_v28 = vadd.f32 %v1269_v23, %v552_v47  ;;  %v9296_v47 = vld [vmem:[#allocation4 + $0x360] sm:$0xff] }
 0x47b   :  { %v1281_v33 = vmax.f32 %v1277_v28, 0.0 }
 0x47d   :  { %v1292_v36 = vpack.c.bf16 %v1281_v33, %v1280_v35 }
 0x47e   :  { %v1271_v11 = vpop.f32.mrf.mxu2 }
 0x47f   :  { %v1272_v20 = vadd.f32 %v1271_v11, %v1253_v15  ;;  %v9317_v11 = vld [vmem:[#allocation4 + $0x408] sm:$0xff] }
 0x480   :  { %1665 = vmatpush.bf16.msra.mxu1 %v9317_v11 }
 0x481   :  { %v1278_v26 = vadd.f32 %v1272_v20, %v553_v45  ;;  %v9298_v45 = vld [vmem:[#allocation4 + $0x370] sm:$0xff] }
 0x482   :  { %1618 = vmatpush.bf16.msra.mxu0 %v9298_v45  ;;  %v9324_v45 = vld [vmem:[#allocation4 + $0x440] sm:$0xff] }
 0x483   :  { %v1282_v31 = vmax.f32 %v1278_v26, 0.0 }
 0x484   :  { %1666 = vmatpush.bf16.msra.mxu1 %v9316_v12 }
 0x486   :  { %v1273_v24 = vpop.f32.mrf.mxu2 }
 0x487   :  { %v1274_v27 = vadd.f32 %v1273_v24, %v1255_v22 }
 0x488   :  { %1956 = vmatpush.bf16.msrb.mxu1 %v9350_v57  ;;  %v9372_v57 = vld [vmem:[#allocation4 + $0x5c0] sm:$0xff] }
 0x489   :  { %v1279_v29 = vadd.f32 %v1274_v27, %v554_v46  ;;  %v9297_v46 = vld [vmem:[#allocation4 + $0x368] sm:$0xff] }
 0x48a   :  { %1619 = vmatpush.bf16.msra.mxu0 %v9297_v46  ;;  %v9342_v46 = vld [vmem:[#allocation4 + $0x4d0] sm:$0xff] }
 0x48b   :  { %v1283_v32 = vmax.f32 %v1279_v29, 0.0 }
 0x48d   :  { %v1293_v34 = vpack.c.bf16 %v1283_v32, %v1282_v31 }
 0x48e   :  { %1620 = vmatpush.bf16.msra.mxu0 %v9296_v47  ;;  %v9333_v47 = vld [vmem:[#allocation4 + $0x488] sm:$0xff] }
 0x48f   :  { %1332 = vmatpush.bf16.msra.mxu3 %v1293_v34 }
 0x492   :  { %1621 = vmatpush.bf16.msra.mxu0 %v9295_v38  ;;  %v9331_v38 = vld [vmem:[#allocation4 + $0x478] sm:$0xff] }
 0x493   :  { %1333 = vmatpush.bf16.msra.mxu3 %v1292_v36 }
 0x496   :  { %7269 = vmatmul.msk.bf16.vlgmr.msra.gmra.mxu3 %vm599_vm1, %v9288_v37  ;;  %1622 = vmatpush.bf16.msra.mxu0 %v9294_v41  ;;  %v9330_v41 = vld [vmem:[#allocation4 + $0x470] sm:$0xff] }
 0x497   :  { %1928 = vmatpush.bf16.msrb.mxu3 %v9334_v44  ;;  %v9356_v44 = vld [vmem:[#allocation4 + $0x540] sm:$0xff] }
 0x49a   :  { %1623 = vmatpush.bf16.msra.mxu0 %v9293_v51  ;;  %v9341_v51 = vld [vmem:[#allocation4 + $0x4c8] sm:$0xff] }
 0x49b   :  { %1929 = vmatpush.bf16.msrb.mxu3 %v9333_v47  ;;  %v9355_v47 = vld [vmem:[#allocation4 + $0x538] sm:$0xff] }
 0x49e   :  { %1624 = vmatpush.bf16.msra.mxu0 %v9292_v53  ;;  %v9340_v53 = vld [vmem:[#allocation4 + $0x4c0] sm:$0xff] }
 0x4a2   :  { %1645 = vmatpush.bf16.msrb.mxu0 %v9315_v56  ;;  %v9338_v56 = vld [vmem:[#allocation4 + $0x4b0] sm:$0xff] }
 0x4a6   :  { %7270 = vmatmul.msk.bf16.gmra.mxu3 %vm599_vm1, %v9289_v39  ;;  %1646 = vmatpush.bf16.msrb.mxu0 %v9314_v59  ;;  %v9349_v59 = vld [vmem:[#allocation4 + $0x508] sm:$0xff] }
 0x4a7   :  { %1957 = vmatpush.bf16.msrb.mxu1 %v9349_v59  ;;  %v9371_v59 = vld [vmem:[#allocation4 + $0x5b8] sm:$0xff] }
 0x4aa   :  { %1647 = vmatpush.bf16.msrb.mxu0 %v9313_v61  ;;  %v9348_v61 = vld [vmem:[#allocation4 + $0x500] sm:$0xff] }
 0x4ab   :  { %1958 = vmatpush.bf16.msrb.mxu1 %v9348_v61 }
 0x4ae   :  { %1648 = vmatpush.bf16.msrb.mxu0 %v9312_v63  ;;  %v9347_v63 = vld [vmem:[#allocation4 + $0x4f8] sm:$0xff] }
 0x4af   :  { %1959 = vmatpush.bf16.msrb.mxu1 %v9347_v63 }
 0x4b2   :  { %1649 = vmatpush.bf16.msrb.mxu0 %v9311_v1  ;;  %v9345_v1 = vld [vmem:[#allocation4 + $0x4e8] sm:$0xff] }
 0x4b3   :  { %1960 = vmatpush.bf16.msrb.mxu1 %v9346_v0 }
 0x4b6   :  { %7271 = vmatmul.msk.bf16.gmra.mxu3 %vm599_vm1, %v9290_v49  ;;  %1650 = vmatpush.bf16.msrb.mxu0 %v9310_v2  ;;  %v9332_v49 = vld [vmem:[#allocation4 + $0x480] sm:$0xff] }
 0x4b7   :  { %1930 = vmatpush.bf16.msrb.mxu3 %v9332_v49  ;;  %1961 = vmatpush.bf16.msrb.mxu1 %v9345_v1  ;;  %v9367_v49 = vld [vmem:[#allocation4 + $0x598] sm:$0xff] }
 0x4ba   :  { %1651 = vmatpush.bf16.msrb.mxu0 %v9309_v4  ;;  %v9343_v4 = vld [vmem:[#allocation4 + $0x4d8] sm:$0xff] }
 0x4bb   :  { %1931 = vmatpush.bf16.msrb.mxu3 %v9331_v38  ;;  %v9354_v38 = vld [vmem:[#allocation4 + $0x530] sm:$0xff] }
 0x4be   :  { %1652 = vmatpush.bf16.msrb.mxu0 %v9308_v6 }
 0x4bf   :  { %1932 = vmatpush.bf16.msrb.mxu3 %v9330_v41  ;;  %v9365_v41 = vld [vmem:[#allocation4 + $0x588] sm:$0xff] }
 0x4c3   :  { %1933 = vmatpush.bf16.msrb.mxu3 %v9329_v50  ;;  %v9364_v50 = vld [vmem:[#allocation4 + $0x580] sm:$0xff] }
 0x4c6   :  { %7272 = vmatmul.msk.bf16.gmra.mxu3 %vm599_vm1, %v9291_v40  ;;  %v9325_v40 = vld [vmem:[#allocation4 + $0x448] sm:$0xff] }
 0x4c7   :  { %1934 = vmatpush.bf16.msrb.mxu3 %v9328_v52  ;;  %v9363_v52 = vld [vmem:[#allocation4 + $0x578] sm:$0xff] }
 0x4cb   :  { %1935 = vmatpush.bf16.msrb.mxu3 %v9327_v54  ;;  %v9362_v54 = vld [vmem:[#allocation4 + $0x570] sm:$0xff] }
 0x519   :  { %v1335_v3 = vpop.f32.mrf.mxu3 }
 0x521   :  { %v1337_v7 = vpop.f32.mrf.mxu3 }
 0x522   :  { %v1419_v8 = vpack.c.bf16 %v1337_v7, %v1335_v3  ;;  %v9344_v3 = vld [vmem:[#allocation4 + $0x4e0] sm:$0xff] }
 0x523   :  { %1962 = vmatpush.bf16.msrb.mxu1 %v9344_v3 }
 0x524   :  { %1625 = vmatmul.bf16.vlgmr.msra.gmra.mxu0 %v1419_v8 }
 0x525   :  { %1942 = vmatpush.bf16.msra.mxu0 %v9342_v46  ;;  %v9368_v46 = vld [vmem:[#allocation4 + $0x5a0] sm:$0xff] }
 0x527   :  { %1963 = vmatpush.bf16.msrb.mxu1 %v9343_v4 }
 0x529   :  { %v1340_v10 = vpop.f32.mrf.mxu3  ;;  %1943 = vmatpush.bf16.msra.mxu0 %v9341_v51  ;;  %v9376_v51 = vld [vmem:[#allocation4 + $0x5e0] sm:$0xff] }
 0x52d   :  { %1944 = vmatpush.bf16.msra.mxu0 %v9340_v53  ;;  %v9375_v53 = vld [vmem:[#allocation4 + $0x5d8] sm:$0xff] }
 0x531   :  { %v1342_v13 = vpop.f32.mrf.mxu3  ;;  %1945 = vmatpush.bf16.msra.mxu0 %v9339_v55  ;;  %v9374_v55 = vld [vmem:[#allocation4 + $0x5d0] sm:$0xff] }
 0x532   :  { %v1420_v14 = vpack.c.bf16 %v1342_v13, %v1340_v10 }
 0x534   :  { %1639 = vmatmul.bf16.vlgmr.msrb.gmra.mxu2 %v1420_v14 }
 0x535   :  { %1946 = vmatpush.bf16.msra.mxu0 %v9338_v56  ;;  %v9373_v56 = vld [vmem:[#allocation4 + $0x5c8] sm:$0xff] }
 0x539   :  { %v1345_v15 = vpop.f32.mrf.mxu3  ;;  %1947 = vmatpush.bf16.msra.mxu0 %v9337_v58 }
 0x53d   :  { %1948 = vmatpush.bf16.msra.mxu0 %v9336_v60  ;;  %v9370_v60 = vld [vmem:[#allocation4 + $0x5b0] sm:$0xff] }
 0x541   :  { %v1347_v16 = vpop.f32.mrf.mxu3  ;;  %1949 = vmatpush.bf16.msra.mxu0 %v9335_v62 }
 0x542   :  { %v1421_v17 = vpack.c.bf16 %v1347_v16, %v1345_v15  ;;  %v9767_v15 = vld [vmem:[#allocation6 + $0x20] ss:$0 sm:$0xff] }
 0x544   :  { %1653 = vmatmul.bf16.vlgmr.msrb.gmra.mxu0 %v1421_v17 }
 0x549   :  { %v1350_v18 = vpop.f32.mrf.mxu3 }
 0x551   :  { %v1352_v19 = vpop.f32.mrf.mxu3 }
 0x552   :  { %v1422_v20 = vpack.c.bf16 %v1352_v19, %v1350_v18 }
 0x554   :  { %1667 = vmatmul.bf16.vlgmr.msra.gmra.mxu1 %v1422_v20 }
 0x5a1   :  { %v1626_v21 = vpop.f32.mrf.mxu0 }
 0x5a2   :  { %v1627_v27 = vadd.f32 %v9766_v25, %v1626_v21 }
 0x5a9   :  { %v1628_v22 = vpop.f32.mrf.mxu0 }
 0x5aa   :  { %v1629_v29 = vadd.f32 %v9766_v25, %v1628_v22 }
 0x5b7   :  { %v1640_v23 = vpop.f32.mrf.mxu2 }
 0x5b8   :  { %v1641_v30 = vadd.f32 %v1640_v23, %v1627_v27 }
 0x5bf   :  { %v1642_v28 = vpop.f32.mrf.mxu2 }
 0x5c0   :  { %v1643_v32 = vadd.f32 %v1642_v28, %v1629_v29  ;;  %v9351_v29 = vld [vmem:[#allocation4 + $0x518] sm:$0xff] }
 0x5c1   :  { %v1654_v24 = vpop.f32.mrf.mxu0 }
 0x5c2   :  { %v1655_v33 = vadd.f32 %v1654_v24, %v1641_v30  ;;  %v9361_v30 = vld [vmem:[#allocation4 + $0x568] sm:$0xff] }
 0x5c9   :  { %v1656_v31 = vpop.f32.mrf.mxu0 }
 0x5ca   :  { %v1657_v34 = vadd.f32 %v1656_v31, %v1643_v32  ;;  %v9369_v31 = vld [vmem:[#allocation4 + $0x5a8] sm:$0xff]  ;;  %v9360_v32 = vld [vmem:[#allocation4 + $0x560] sm:$0xff] }
 0x5cb   :  { %2238 = vmatpush.bf16.msrb.mxu0 %v9369_v31 }
 0x5cf   :  { %2239 = vmatpush.bf16.msrb.mxu0 %v9368_v46  ;;  %v9400_v46 = vld [vmem:[#allocation4 + $0x6a0] sm:$0xff] }
 0x5d1   :  { %v1668_v26 = vpop.f32.mrf.mxu1 }
 0x5d2   :  { %v10021_v35 = vadd.f32 %v1668_v26, %v1655_v33  ;;  %v9359_v33 = vld [vmem:[#allocation4 + $0x558] sm:$0xff] }
 0x5d3   :  { %2240 = vmatpush.bf16.msrb.mxu0 %v9367_v49  ;;  %v9389_v49 = vld [vmem:[#allocation4 + $0x648] sm:$0xff] }
 0x5d4   :  { %v1673_v39 = vmax.f32 %v10021_v35, 0.0  ;;  %v9378_v35 = vld [vmem:[#allocation4 + $0x5f0] sm:$0xff] }
 0x5d9   :  { %v1670_v36 = vpop.f32.mrf.mxu1 }
 0x5da   :  { %v10023_v37 = vadd.f32 %v1670_v36, %v1657_v34  ;;  %v9358_v34 = vld [vmem:[#allocation4 + $0x550] sm:$0xff]  ;;  %v9352_v36 = vld [vmem:[#allocation4 + $0x520] sm:$0xff] }
 0x5dc   :  { %v1674_v42 = vmax.f32 %v10023_v37, 0.0  ;;  %v9391_v37 = vld [vmem:[#allocation4 + $0x658] sm:$0xff] }
 0x5de   :  { %v1681_v43 = vpack.c.bf16 %v1674_v42, %v1673_v39 }
 0x5e0   :  { %1714 = vmatpush.bf16.msra.mxu2 %v1681_v43  ;;  %v9357_v43 = vld [vmem:[#allocation4 + $0x548] sm:$0xff] }
 0x5e3   :  { %7413 = vmatmul.msk.bf16.vlgmr.msra.gmra.mxu2 %vm1697_vm2, %v9324_v45  ;;  %v9353_v45 = vld [vmem:[#allocation4 + $0x528] sm:$0xff] }
 0x5e4   :  { %2224 = vmatpush.bf16.msrb.mxu2 %v9361_v30  ;;  %v9403_v30 = vld [vmem:[#allocation4 + $0x6b8] sm:$0xff] }
 0x5e8   :  { %2225 = vmatpush.bf16.msrb.mxu2 %v9360_v32  ;;  %v9392_v32 = vld [vmem:[#allocation4 + $0x660] sm:$0xff] }
 0x5ec   :  { %2226 = vmatpush.bf16.msrb.mxu2 %v9359_v33  ;;  %v9402_v33 = vld [vmem:[#allocation4 + $0x6b0] sm:$0xff] }
 0x5f0   :  { %2227 = vmatpush.bf16.msrb.mxu2 %v9358_v34  ;;  %v9401_v34 = vld [vmem:[#allocation4 + $0x6a8] sm:$0xff] }
 0x5f3   :  { %7414 = vmatmul.msk.bf16.gmra.mxu2 %vm1697_vm2, %v9325_v40  ;;  %v9366_v40 = vld [vmem:[#allocation4 + $0x590] sm:$0xff] }
 0x5f4   :  { %2228 = vmatpush.bf16.msrb.mxu2 %v9357_v43  ;;  %2241 = vmatpush.bf16.msrb.mxu0 %v9366_v40  ;;  %v9379_v43 = vld [vmem:[#allocation4 + $0x5f8] sm:$0xff]  ;;  %v9409_v40 = vld [vmem:[#allocation4 + $0x6e8] sm:$0xff] }
 0x5f8   :  { %2229 = vmatpush.bf16.msrb.mxu2 %v9356_v44  ;;  %2242 = vmatpush.bf16.msrb.mxu0 %v9365_v41  ;;  %v9390_v44 = vld [vmem:[#allocation4 + $0x650] sm:$0xff]  ;;  %v9388_v41 = vld [vmem:[#allocation4 + $0x640] sm:$0xff] }
 0x5fc   :  { %2230 = vmatpush.bf16.msrb.mxu2 %v9355_v47  ;;  %2243 = vmatpush.bf16.msrb.mxu0 %v9364_v50  ;;  %v9410_v47 = vld [vmem:[#allocation4 + $0x6f0] sm:$0xff]  ;;  %v9408_v50 = vld [vmem:[#allocation4 + $0x6e0] sm:$0xff] }
 0x600   :  { %2231 = vmatpush.bf16.msrb.mxu2 %v9354_v38  ;;  %2244 = vmatpush.bf16.msrb.mxu0 %v9363_v52  ;;  %v9399_v38 = vld [vmem:[#allocation4 + $0x698] sm:$0xff] }
 0x601   :  { %v9407_v52 = vld [vmem:[#allocation4 + $0x6d8] sm:$0xff] }
 0x603   :  { %7415 = vmatmul.msk.bf16.gmra.mxu2 %vm1697_vm2, %v9326_v48  ;;  %v9377_v48 = vld [vmem:[#allocation4 + $0x5e8] sm:$0xff] }
 0x604   :  { %2252 = vmatpush.bf16.msra.mxu1 %v9377_v48  ;;  %2245 = vmatpush.bf16.msrb.mxu0 %v9362_v54  ;;  %v9398_v48 = vld [vmem:[#allocation4 + $0x690] sm:$0xff] }
 0x605   :  { %v9406_v54 = vld [vmem:[#allocation4 + $0x6d0] sm:$0xff] }
 0x608   :  { %2253 = vmatpush.bf16.msra.mxu1 %v9376_v51  ;;  %v9397_v51 = vld [vmem:[#allocation4 + $0x688] sm:$0xff] }
 0x60c   :  { %2254 = vmatpush.bf16.msra.mxu1 %v9375_v53  ;;  %v9396_v53 = vld [vmem:[#allocation4 + $0x680] sm:$0xff] }
 0x610   :  { %2255 = vmatpush.bf16.msra.mxu1 %v9374_v55  ;;  %v9405_v55 = vld [vmem:[#allocation4 + $0x6c8] sm:$0xff] }
 0x614   :  { %2256 = vmatpush.bf16.msra.mxu1 %v9373_v56  ;;  %v9404_v56 = vld [vmem:[#allocation4 + $0x6c0] sm:$0xff] }
 0x618   :  { %2257 = vmatpush.bf16.msra.mxu1 %v9372_v57 }
 0x61c   :  { %2258 = vmatpush.bf16.msra.mxu1 %v9371_v59 }
 0x620   :  { %2259 = vmatpush.bf16.msra.mxu1 %v9370_v60 }
 0x666   :  { %v1716_v2 = vpop.f32.mrf.mxu2 }
 0x66e   :  { %v1718_v5 = vpop.f32.mrf.mxu2 }
 0x66f   :  { %v1779_v6 = vpack.c.bf16 %v1718_v5, %v1716_v2 }
 0x671   :  { %1936 = vmatmul.bf16.vlgmr.msrb.gmra.mxu3 %v1779_v6 }
 0x676   :  { %v1721_v7 = vpop.f32.mrf.mxu2 }
 0x67e   :  { %v1723_v8 = vpop.f32.mrf.mxu2 }
 0x67f   :  { %v1780_v9 = vpack.c.bf16 %v1723_v8, %v1721_v7  ;;  %v9768_v7 = vld [vmem:[#allocation6 + $0x28] ss:$0 sm:$0xff] }
 0x681   :  { %1950 = vmatmul.bf16.vlgmr.msra.gmra.mxu0 %v1780_v9 }
 0x686   :  { %v1726_v10 = vpop.f32.mrf.mxu2 }
 0x68e   :  { %v1728_v11 = vpop.f32.mrf.mxu2 }
 0x68f   :  { %v1781_v12 = vpack.c.bf16 %v1728_v11, %v1726_v10 }
 0x691   :  { %1964 = vmatmul.bf16.vlgmr.msrb.gmra.mxu1 %v1781_v12 }
 0x6f4   :  { %v1937_v13 = vpop.f32.mrf.mxu3 }
 0x6f5   :  { %v1938_v18 = vadd.f32 %v9767_v15, %v1937_v13  ;;  %v9387_v13 = vld [vmem:[#allocation4 + $0x638] sm:$0xff] }
 0x6fc   :  { %v1939_v17 = vpop.f32.mrf.mxu3 }
 0x6fd   :  { %v1940_v20 = vadd.f32 %v9767_v15, %v1939_v17  ;;  %v9386_v17 = vld [vmem:[#allocation4 + $0x630] sm:$0xff] }
 0x6fe   :  { %v1951_v14 = vpop.f32.mrf.mxu0 }
 0x6ff   :  { %v1952_v21 = vadd.f32 %v1951_v14, %v1938_v18 }
 0x706   :  { %v1953_v19 = vpop.f32.mrf.mxu0 }
 0x707   :  { %v1954_v22 = vadd.f32 %v1953_v19, %v1940_v20  ;;  %v9394_v19 = vld [vmem:[#allocation4 + $0x670] sm:$0xff] }
 0x70e   :  { %v1965_v16 = vpop.f32.mrf.mxu1 }
 0x70f   :  { %v1966_v23 = vadd.f32 %v1965_v16, %v1952_v21  ;;  %v9395_v16 = vld [vmem:[#allocation4 + $0x678] sm:$0xff] }
 0x710   :  { %2585 = vmatpush.bf16.msra.mxu0 %v9395_v16  ;;  %v9418_v16 = vld [vmem:[#allocation4 + $0x738] sm:$0xff] }
 0x711   :  { %v1970_v26 = vmax.f32 %v1966_v23, 0.0  ;;  %v9411_v23 = vld [vmem:[#allocation4 + $0x6f8] sm:$0xff] }
 0x712   :  { %2611 = vmatpush.bf16.msrb.mxu1 %v9411_v23  ;;  %v9425_v23 = vld [vmem:[#allocation4 + $0x770] sm:$0xff] }
 0x714   :  { %2586 = vmatpush.bf16.msra.mxu0 %v9394_v19 }
 0x716   :  { %v1967_v24 = vpop.f32.mrf.mxu1  ;;  %2612 = vmatpush.bf16.msrb.mxu1 %v9410_v47  ;;  %v9429_v47 = vld [vmem:[#allocation4 + $0x790] sm:$0xff] }
 0x717   :  { %v1968_v25 = vadd.f32 %v1967_v24, %v1954_v22  ;;  %v9385_v24 = vld [vmem:[#allocation4 + $0x628] sm:$0xff] }
 0x719   :  { %v1971_v27 = vmax.f32 %v1968_v25, 0.0 }
 0x71a   :  { %2613 = vmatpush.bf16.msrb.mxu1 %v9409_v40 }
 0x71b   :  { %v1978_v28 = vpack.c.bf16 %v1971_v27, %v1970_v26  ;;  %v9393_v26 = vld [vmem:[#allocation4 + $0x668] sm:$0xff] }
 0x71c   :  { %2587 = vmatpush.bf16.msra.mxu0 %v9393_v26 }
 0x71d   :  { %2010 = vmatpush.bf16.msra.mxu3 %v1978_v28 }
 0x71e   :  { %2614 = vmatpush.bf16.msrb.mxu1 %v9408_v50 }
 0x720   :  { %7524 = vmatmul.msk.bf16.vlgmr.msra.gmra.mxu3 %vm1697_vm2, %v9351_v29  ;;  %v9384_v29 = vld [vmem:[#allocation4 + $0x620] sm:$0xff]  ;;  %2588 = vmatpush.bf16.msra.mxu0 %v9392_v32  ;;  %v2627_v32 = vld [vmem:[#allocation4 + $0x708] sm:$0xf] }
 0x721   :  { %2572 = vmatpush.bf16.msrb.mxu3 %v9387_v13 }
 0x722   :  { %2615 = vmatpush.bf16.msrb.mxu1 %v9407_v52 }
 0x724   :  { %2589 = vmatpush.bf16.msra.mxu0 %v9391_v37  ;;  %v9413_v37 = vld [vmem:[#allocation4 + $0x710] sm:$0xff] }
 0x725   :  { %2573 = vmatpush.bf16.msrb.mxu3 %v9386_v17  ;;  %v9426_v17 = vld [vmem:[#allocation4 + $0x778] sm:$0xff] }
 0x726   :  { %2616 = vmatpush.bf16.msrb.mxu1 %v9406_v54 }
 0x728   :  { %2590 = vmatpush.bf16.msra.mxu0 %v9390_v44  ;;  %v9431_v44 = vld [vmem:[#allocation4 + $0x7a0] sm:$0xff] }
 0x729   :  { %2574 = vmatpush.bf16.msrb.mxu3 %v9385_v24 }
 0x72a   :  { %2617 = vmatpush.bf16.msrb.mxu1 %v9405_v55  ;;  %v9770_v55 = vld [vmem:[#allocation6 + $0x38] ss:$0 sm:$0xff] }
 0x72c   :  { %2591 = vmatpush.bf16.msra.mxu0 %v9389_v49 }
 0x72d   :  { %2575 = vmatpush.bf16.msrb.mxu3 %v9384_v29  ;;  %v9424_v29 = vld [vmem:[#allocation4 + $0x768] sm:$0xff] }
 0x72e   :  { %2618 = vmatpush.bf16.msrb.mxu1 %v9404_v56  ;;  %v9445_v56 = vld [vmem:[#allocation4 + $0x818] sm:$0xff] }
 0x730   :  { %7525 = vmatmul.msk.bf16.gmra.mxu3 %vm1697_vm2, %v9352_v36  ;;  %v9381_v36 = vld [vmem:[#allocation4 + $0x608] sm:$0xff]  ;;  %2592 = vmatpush.bf16.msra.mxu0 %v9388_v41 }
 0x740   :  { %7526 = vmatmul.msk.bf16.gmra.mxu3 %vm1697_vm2, %v9353_v45  ;;  %v9380_v45 = vld [vmem:[#allocation4 + $0x600] sm:$0xff] }
 0x7a3   :  { %v2012_v58 = vpop.f32.mrf.mxu3 }
 0x7ab   :  { %v2014_v61 = vpop.f32.mrf.mxu3 }
 0x7ac   :  { %v2075_v62 = vpack.c.bf16 %v2014_v61, %v2012_v58 }
 0x7ae   :  { %2232 = vmatmul.bf16.vlgmr.msrb.gmra.mxu2 %v2075_v62 }
 0x7b3   :  { %v2017_v63 = vpop.f32.mrf.mxu3 }
 0x7bb   :  { %v2019_v0 = vpop.f32.mrf.mxu3 }
 0x7bc   :  { %v2076_v1 = vpack.c.bf16 %v2019_v0, %v2017_v63 }
 0x7be   :  { %2246 = vmatmul.bf16.vlgmr.msrb.gmra.mxu0 %v2076_v1 }
 0x7c3   :  { %v2022_v2 = vpop.f32.mrf.mxu3 }
 0x7cb   :  { %v2024_v3 = vpop.f32.mrf.mxu3 }
 0x7cc   :  { %v2077_v4 = vpack.c.bf16 %v2024_v3, %v2022_v2  ;;  %v9769_v3 = vld [vmem:[#allocation6 + $0x30] ss:$0 sm:$0xff] }
 0x7ce   :  { %2260 = vmatmul.bf16.vlgmr.msra.gmra.mxu1 %v2077_v4 }
 0x831   :  { %v2233_v5 = vpop.f32.mrf.mxu2 }
 0x832   :  { %v2234_v9 = vadd.f32 %v9768_v7, %v2233_v5 }
 0x839   :  { %v2235_v10 = vpop.f32.mrf.mxu2 }
 0x83a   :  { %v2236_v14 = vadd.f32 %v9768_v7, %v2235_v10  ;;  %v9420_v7 = vld [vmem:[#allocation4 + $0x748] sm:$0xff]  ;;  %v9419_v10 = vld [vmem:[#allocation4 + $0x740] sm:$0xff] }
 0x83b   :  { %v2247_v6 = vpop.f32.mrf.mxu0  ;;  %2863 = vmatpush.bf16.msrb.mxu0 %v9420_v7 }
 0x83c   :  { %v2248_v11 = vadd.f32 %v2247_v6, %v2234_v9 }
 0x83f   :  { %2864 = vmatpush.bf16.msrb.mxu0 %v9419_v10  ;;  %v9452_v10 = vld [vmem:[#allocation4 + $0x850] sm:$0xff] }
 0x843   :  { %v2249_v12 = vpop.f32.mrf.mxu0  ;;  %2865 = vmatpush.bf16.msrb.mxu0 %v9418_v16  ;;  %v9439_v16 = vld [vmem:[#allocation4 + $0x7e8] sm:$0xff] }
 0x844   :  { %v2250_v18 = vadd.f32 %v2249_v12, %v2236_v14  ;;  %v9427_v12 = vld [vmem:[#allocation4 + $0x780] sm:$0xff] }
 0x84b   :  { %v2261_v8 = vpop.f32.mrf.mxu1 }
 0x84c   :  { %v2262_v15 = vadd.f32 %v2261_v8, %v2248_v11  ;;  %v9428_v8 = vld [vmem:[#allocation4 + $0x788] sm:$0xff] }
 0x84e   :  { %v2266_v21 = vadd.f32 %v2262_v15, %v1673_v39  ;;  %v9383_v39 = vld [vmem:[#allocation4 + $0x618] sm:$0xff] }
 0x84f   :  { %2576 = vmatpush.bf16.msrb.mxu3 %v9383_v39  ;;  %v2634_v39 = vunpack.c.l.b16 %v2627_v32 }
 0x850   :  { %v2268_v27 = vmax.f32 %v2266_v21, 0.0  ;;  %v9436_v21 = vld [vmem:[#allocation4 + $0x7c8] sm:$0xff] }
 0x853   :  { %v2263_v20 = vpop.f32.mrf.mxu1 }
 0x854   :  { %v2264_v22 = vadd.f32 %v2263_v20, %v2250_v18  ;;  %v9417_v20 = vld [vmem:[#allocation4 + $0x730] sm:$0xff] }
 0x855   :  { %2866 = vmatpush.bf16.msrb.mxu0 %v9417_v20 }
 0x856   :  { %v2267_v25 = vadd.f32 %v2264_v22, %v1674_v42  ;;  %v9382_v42 = vld [vmem:[#allocation4 + $0x610] sm:$0xff] }
 0x857   :  { %2577 = vmatpush.bf16.msrb.mxu3 %v9382_v42  ;;  %v9423_v42 = vld [vmem:[#allocation4 + $0x760] sm:$0xff] }
 0x858   :  { %v2269_v28 = vmax.f32 %v2267_v25, 0.0  ;;  %v9412_v25 = vld [vmem:[#allocation4 + $0x700] sm:$0xff] }
 0x85a   :  { %v2274_v31 = vpack.c.bf16 %v2269_v28, %v2268_v27  ;;  %v9416_v27 = vld [vmem:[#allocation4 + $0x728] sm:$0xff]  ;;  %v9435_v28 = vld [vmem:[#allocation4 + $0x7c0] sm:$0xff] }
 0x85b   :  { %2578 = vmatpush.bf16.msrb.mxu3 %v9381_v36  ;;  %2867 = vmatpush.bf16.msrb.mxu0 %v9416_v27  ;;  %v9422_v36 = vld [vmem:[#allocation4 + $0x758] sm:$0xff]  ;;  %v9456_v27 = vld [vmem:[#allocation4 + $0x870] sm:$0xff] }
 0x85c   :  { %2298 = vmatpush.bf16.msra.mxu2 %v2274_v31  ;;  %v9434_v31 = vld [vmem:[#allocation4 + $0x7b8] sm:$0xff] }
 0x85f   :  { %7631 = vmatmul.msk.bf16.vlgmr.msra.gmra.mxu2 %vm1697_vm2, %v9378_v35  ;;  %2579 = vmatpush.bf16.msrb.mxu3 %v9380_v45  ;;  %v9414_v35 = vld [vmem:[#allocation4 + $0x718] sm:$0xff]  ;;  %v9421_v45 = vld [vmem:[#allocation4 + $0x750] sm:$0xff] }
 0x860   :  { %2598 = vmatpush.bf16.msrb.mxu2 %v9403_v30  ;;  %v9415_v30 = vld [vmem:[#allocation4 + $0x720] sm:$0xff] }
 0x861   :  { %2868 = vmatpush.bf16.msrb.mxu0 %v9415_v30 }
 0x864   :  { %2599 = vmatpush.bf16.msrb.mxu2 %v9402_v33  ;;  %v2636_v33 = vpack.c.b16 %v2634_v39, %v2634_v39 }
 0x865   :  { %2869 = vmatpush.bf16.msrb.mxu0 %v9414_v35 }
 0x868   :  { %2600 = vmatpush.bf16.msrb.mxu2 %v9401_v34  ;;  %v9433_v34 = vld [vmem:[#allocation4 + $0x7b0] sm:$0xff] }
 0x869   :  { %2870 = vmatpush.bf16.msrb.mxu0 %v9413_v37 }
 0x86c   :  { %2601 = vmatpush.bf16.msrb.mxu2 %v9400_v46  ;;  %v9430_v46 = vld [vmem:[#allocation4 + $0x798] sm:$0xff] }
 0x86f   :  { %7632 = vmatmul.msk.bf16.gmra.mxu2 %vm1697_vm2, %v9379_v43  ;;  %v9432_v43 = vld [vmem:[#allocation4 + $0x7a8] sm:$0xff] }
 0x870   :  { %2602 = vmatpush.bf16.msrb.mxu2 %v9399_v38 }
 0x874   :  { %2603 = vmatpush.bf16.msrb.mxu2 %v9398_v48 }
 0x878   :  { %2604 = vmatpush.bf16.msrb.mxu2 %v9397_v51 }
 0x87c   :  { %2605 = vmatpush.bf16.msrb.mxu2 %v9396_v53 }
 0x880   :  { %2876 = vmatpush.bf16.msra.mxu2 %v9428_v8  ;;  %v9437_v8 = vld [vmem:[#allocation4 + $0x7d0] sm:$0xff] }
 0x884   :  { %2877 = vmatpush.bf16.msra.mxu2 %v9427_v12  ;;  %v9451_v12 = vld [vmem:[#allocation4 + $0x848] sm:$0xff] }
 0x888   :  { %2878 = vmatpush.bf16.msra.mxu2 %v9426_v17 }
 0x88c   :  { %2879 = vmatpush.bf16.msra.mxu2 %v9425_v23  ;;  %v9458_v23 = vld [vmem:[#allocation4 + $0x880] sm:$0xff] }
 0x890   :  { %2880 = vmatpush.bf16.msra.mxu2 %v9424_v29  ;;  %v9454_v29 = vld [vmem:[#allocation4 + $0x860] sm:$0xff] }
 0x894   :  { %2881 = vmatpush.bf16.msra.mxu2 %v9423_v42 }
 0x898   :  { %2882 = vmatpush.bf16.msra.mxu2 %v9422_v36  ;;  %v9485_v36 = vld [vmem:[#allocation4 + $0x960] sm:$0xff] }
 0x89c   :  { %2883 = vmatpush.bf16.msra.mxu2 %v9421_v45  ;;  %v9476_v45 = vld [vmem:[#allocation4 + $0x918] sm:$0xff] }
 0x8e2   :  { %v2300_v57 = vpop.f32.mrf.mxu2 }
 0x8e3   :  { %v2374_v58 = vpack.c.bf16 %v2300_v57, %v2300_v57 }
 0x8e5   :  { %2580 = vmatmul.bf16.vlgmr.msrb.gmra.mxu3 %v2374_v58  ;;  %v9444_v58 = vld [vmem:[#allocation4 + $0x810] sm:$0xff] }
 0x8ea   :  { %v2302_v59 = vpop.f32.mrf.mxu2 }
 0x8eb   :  { %v2375_v60 = vpack.c.bf16 %v2302_v59, %v2302_v59  ;;  %v9461_v59 = vld [vmem:[#allocation4 + $0x898] sm:$0xff] }
 0x8ed   :  { %2593 = vmatmul.bf16.vlgmr.msra.gmra.mxu0 %v2375_v60 }
 0x8ee   :  { %3139 = vmatpush.bf16.msra.mxu0 %v9445_v56  ;;  %v9489_v56 = vld [vmem:[#allocation4 + $0x980] sm:$0xff] }
 0x8f2   :  { %v2305_v61 = vpop.f32.mrf.mxu2  ;;  %3140 = vmatpush.bf16.msra.mxu0 %v9444_v58 }
 0x8f3   :  { %v2376_v62 = vpack.c.bf16 %v2305_v61, %v2305_v61  ;;  %v9460_v61 = vld [vmem:[#allocation4 + $0x890] sm:$0xff] }
 0x8f5   :  { %2606 = vmatmul.bf16.vlgmr.msrb.gmra.mxu2 %v2376_v62 }
 0x8f6   :  { %3165 = vmatpush.bf16.msrb.mxu2 %v9461_v59  ;;  %v9472_v59 = vld [vmem:[#allocation4 + $0x8f8] sm:$0xff] }
 0x8fa   :  { %v2307_v63 = vpop.f32.mrf.mxu2  ;;  %3166 = vmatpush.bf16.msrb.mxu2 %v9460_v61 }
 0x8fb   :  { %v2377_v0 = vpack.c.bf16 %v2307_v63, %v2307_v63 }
 0x8fd   :  { %2619 = vmatmul.bf16.vlgmr.msrb.gmra.mxu1 %v2377_v0 }
 0x968   :  { %v2581_v1 = vpop.f32.mrf.mxu3 }
 0x969   :  { %v2582_v6 = vadd.f32 %v9769_v3, %v2581_v1  ;;  %v9443_v1 = vld [vmem:[#allocation4 + $0x808] sm:$0xff] }
 0x96a   :  { %v2594_v2 = vpop.f32.mrf.mxu0  ;;  %v9459_v3 = vld [vmem:[#allocation4 + $0x888] sm:$0xff]  ;;  %3141 = vmatpush.bf16.msra.mxu0 %v9443_v1  ;;  %v9471_v1 = vld [vmem:[#allocation4 + $0x8f0] sm:$0xff] }
 0x96b   :  { %v2595_v9 = vadd.f32 %v2594_v2, %v2582_v6  ;;  %v9442_v6 = vld [vmem:[#allocation4 + $0x800] sm:$0xff]  ;;  %3167 = vmatpush.bf16.msrb.mxu2 %v9459_v3  ;;  %v9487_v3 = vld [vmem:[#allocation4 + $0x970] sm:$0xff] }
 0x96e   :  { %3142 = vmatpush.bf16.msra.mxu0 %v9442_v6  ;;  %v9469_v6 = vld [vmem:[#allocation4 + $0x8e0] sm:$0xff] }
 0x96f   :  { %3168 = vmatpush.bf16.msrb.mxu2 %v9458_v23 }
 0x970   :  { %v2583_v4 = vpop.f32.mrf.mxu3 }
 0x972   :  { %v2596_v5 = vpop.f32.mrf.mxu0 }
 0x973   :  { %v9453_v5 = vld [vmem:[#allocation4 + $0x858] sm:$0xff] }
 0x978   :  { %v2607_v11 = vpop.f32.mrf.mxu2 }
 0x979   :  { %v2608_v13 = vadd.f32 %v2607_v11, %v2595_v9  ;;  %v9441_v11 = vld [vmem:[#allocation4 + $0x7f8] sm:$0xff] }
 0x97a   :  { %v2620_v14 = vpop.f32.mrf.mxu1  ;;  %3143 = vmatpush.bf16.msra.mxu0 %v9441_v11  ;;  %v9466_v11 = vld [vmem:[#allocation4 + $0x8c8] sm:$0xff] }
 0x97b   :  { %v2621_v15 = vadd.f32 %v2620_v14, %v2608_v13  ;;  %v9440_v13 = vld [vmem:[#allocation4 + $0x7f0] sm:$0xff]  ;;  %v2905_v14 = vld [vmem:[#allocation4 + $0x7d8] sm:$0xf] }
 0x97c   :  { %v2912_v17 = vunpack.c.l.b16 %v2905_v14  ;;  %v9463_v14 = vld [vmem:[#allocation4 + $0x8b0] sm:$0xff] }
 0x97d   :  { %v10043_v18 = vmax.f32 %v2621_v15, 0.0  ;;  %v9450_v15 = vld [vmem:[#allocation4 + $0x840] sm:$0xff] }
 0x97e   :  { %3144 = vmatpush.bf16.msra.mxu0 %v9440_v13  ;;  %v2914_v20 = vpack.c.b16 %v2912_v17, %v2912_v17  ;;  %v9464_v13 = vld [vmem:[#allocation4 + $0x8b8] sm:$0xff]  ;;  %v9478_v17 = vld [vmem:[#allocation4 + $0x928] sm:$0xff] }
 0x97f   :  { %v2628_v19 = vpack.c.bf16 %v10043_v18, %v10043_v18 }
 0x980   :  { %v2609_v22 = vpop.f32.mrf.mxu2 }
 0x981   :  { %v2646_v24 = vsel %vm2644_vm3, %v2628_v19, 0  ;;  %v9449_v19 = vld [vmem:[#allocation4 + $0x838] sm:$0xff]  ;;  %v9448_v22 = vld [vmem:[#allocation4 + $0x830] sm:$0xff] }
 0x982   :  { %v2622_v26 = vpop.f32.mrf.mxu1  ;;  %2655 = vmatpush.bf16.msra.mxu3 %v2646_v24  ;;  %3145 = vmatpush.bf16.msra.mxu0 %v9439_v16  ;;  %v9447_v24 = vld [vmem:[#allocation4 + $0x828] sm:$0xff] }
 0x983   :  { %v9446_v26 = vld [vmem:[#allocation4 + $0x820] sm:$0xff]  ;;  %v9470_v16 = vld [vmem:[#allocation4 + $0x8e8] sm:$0xff] }
 0x985   :  { %7765 = vmatmul.msk.bf16.vlgmr.msra.gmra.mxu3 %vm2637_vm4, %v9412_v25  ;;  %v9457_v25 = vld [vmem:[#allocation4 + $0x878] sm:$0xff] }
 0x986   :  { %2889 = vmatpush.bf16.msrb.mxu3 %v9436_v21  ;;  %v9438_v21 = vld [vmem:[#allocation4 + $0x7e0] sm:$0xff]  ;;  %3169 = vmatpush.bf16.msrb.mxu2 %v9457_v25 }
 0x987   :  { %3146 = vmatpush.bf16.msra.mxu0 %v9438_v21 }
 0x98a   :  { %2890 = vmatpush.bf16.msrb.mxu3 %v9435_v28  ;;  %3170 = vmatpush.bf16.msrb.mxu2 %v9456_v27  ;;  %v9455_v28 = vld [vmem:[#allocation4 + $0x868] sm:$0xff] }
 0x98e   :  { %2891 = vmatpush.bf16.msrb.mxu3 %v9434_v31  ;;  %3171 = vmatpush.bf16.msrb.mxu2 %v9455_v28 }
 0x992   :  { %2892 = vmatpush.bf16.msrb.mxu3 %v9433_v34  ;;  %3172 = vmatpush.bf16.msrb.mxu2 %v9454_v29  ;;  %v9477_v34 = vld [vmem:[#allocation4 + $0x920] sm:$0xff] }
 0x995   :  { %7766 = vmatmul.msk.bf16.gmra.mxu3 %vm2637_vm4, %v2636_v33 }
 0x996   :  { %2893 = vmatpush.bf16.msrb.mxu3 %v9432_v43  ;;  %v9493_v43 = vld [vmem:[#allocation4 + $0x9a0] sm:$0xff] }
 0x99a   :  { %2894 = vmatpush.bf16.msrb.mxu3 %v9431_v44  ;;  %v9484_v44 = vld [vmem:[#allocation4 + $0x958] sm:$0xff] }
 0x99e   :  { %2895 = vmatpush.bf16.msrb.mxu3 %v9430_v46  ;;  %v9492_v46 = vld [vmem:[#allocation4 + $0x998] sm:$0xff] }
 0x9a2   :  { %2896 = vmatpush.bf16.msrb.mxu3 %v9429_v47 }
 0xa08   :  { %v2657_v49 = vpop.f32.mrf.mxu3 }
 0xa09   :  { %v2714_v38 = vpack.c.bf16 %v2657_v49, %v2657_v49 }
 0xa0b   :  { %2871 = vmatmul.bf16.vlgmr.msrb.gmra.mxu0 %v2714_v38  ;;  %v9475_v38 = vld [vmem:[#allocation4 + $0x910] sm:$0xff] }
 0xa0c   :  { %3483 = vmatpush.bf16.msrb.mxu0 %v9477_v34 }
 0xa10   :  { %v2659_v40 = vpop.f32.mrf.mxu3  ;;  %3484 = vmatpush.bf16.msrb.mxu0 %v9476_v45 }
 0xa11   :  { %v2715_v41 = vpack.c.bf16 %v2659_v40, %v2659_v40  ;;  %v9483_v40 = vld [vmem:[#allocation4 + $0x950] sm:$0xff] }
 0xa13   :  { %2884 = vmatmul.bf16.vlgmr.msra.gmra.mxu2 %v2715_v41  ;;  %v9491_v41 = vld [vmem:[#allocation4 + $0x990] sm:$0xff] }
 0xa14   :  { %3509 = vmatpush.bf16.msra.mxu2 %v9493_v43  ;;  %3485 = vmatpush.bf16.msrb.mxu0 %v9475_v38  ;;  %v3527_v38 = vld [vmem:[#allocation2] sm:$0x1] }
 0xa18   :  { %v2662_v48 = vpop.f32.mrf.mxu3  ;;  %3510 = vmatpush.bf16.msra.mxu2 %v9492_v46 }
 0xa19   :  { %v2716_v50 = vpack.c.bf16 %v2662_v48, %v2662_v48  ;;  %v9474_v48 = vld [vmem:[#allocation4 + $0x908] sm:$0xff] }
 0xa1a   :  { %3486 = vmatpush.bf16.msrb.mxu0 %v9474_v48 }
 0xa1b   :  { %2897 = vmatmul.bf16.vlgmr.msrb.gmra.mxu3 %v2716_v50  ;;  %v9482_v50 = vld [vmem:[#allocation4 + $0x948] sm:$0xff] }
 0xa1c   :  { %3511 = vmatpush.bf16.msra.mxu2 %v9491_v41 }
 0xa20   :  { %v2664_v51 = vpop.f32.mrf.mxu3 }
 0xa21   :  { %v9490_v51 = vld [vmem:[#allocation4 + $0x988] sm:$0xff] }
 0xa22   :  { %3512 = vmatpush.bf16.msra.mxu2 %v9490_v51 }
 0xa26   :  { %3513 = vmatpush.bf16.msra.mxu2 %v9489_v56 }
 0xa88   :  { %v2872_v52 = vpop.f32.mrf.mxu0 }
 0xa89   :  { %v2873_v57 = vadd.f32 %v9770_v55, %v2872_v52  ;;  %v9771_v52 = vld [vmem:[#allocation6 + $0x40] ss:$0 sm:$0xff]  ;;  %v9481_v55 = vld [vmem:[#allocation4 + $0x940] sm:$0xff] }
 0xa90   :  { %v2874_v53 = vpop.f32.mrf.mxu0 }
 0xa96   :  { %v2885_v54 = vpop.f32.mrf.mxu2 }
 0xa97   :  { %v2886_v60 = vadd.f32 %v2885_v54, %v2873_v57  ;;  %v9473_v54 = vld [vmem:[#allocation4 + $0x900] sm:$0xff] }
 0xa98   :  { %3487 = vmatpush.bf16.msrb.mxu0 %v9473_v54  ;;  %v9495_v54 = vld [vmem:[#allocation4 + $0x9b0] sm:$0xff] }
 0xa9c   :  { %3488 = vmatpush.bf16.msrb.mxu0 %v9472_v59  ;;  %v9499_v59 = vld [vmem:[#allocation4 + $0x9d0] sm:$0xff] }
 0xa9e   :  { %v2887_v62 = vpop.f32.mrf.mxu2  ;;  %v2898_v63 = vpop.f32.mrf.mxu3 }
 0xa9f   :  { %v2899_v0 = vadd.f32 %v2898_v63, %v2886_v60  ;;  %v9480_v60 = vld [vmem:[#allocation4 + $0x938] sm:$0xff] }
 0xaa0   :  { %v9488_v62 = vld [vmem:[#allocation4 + $0x978] sm:$0xff]  ;;  %3489 = vmatpush.bf16.msrb.mxu0 %v9471_v1 }
 0xaa1   :  { %v2902_v2 = vmax.f32 %v2899_v0, 0.0  ;;  %3514 = vmatpush.bf16.msra.mxu2 %v9488_v62  ;;  %v9496_v62 = vld [vmem:[#allocation4 + $0x9b8] sm:$0xff] }
 0xaa3   :  { %v2906_v4 = vpack.c.bf16 %v2902_v2, %v2902_v2  ;;  %v9479_v2 = vld [vmem:[#allocation4 + $0x930] sm:$0xff] }
 0xaa4   :  { %3490 = vmatpush.bf16.msrb.mxu0 %v9470_v16  ;;  %v9509_v16 = vld [vmem:[#allocation4 + $0xa20] sm:$0xff] }
 0xaa5   :  { %v2922_v7 = vsel %vm2644_vm3, %v2906_v4, 0  ;;  %3515 = vmatpush.bf16.msra.mxu2 %v9487_v3 }
 0xaa6   :  { %v2900_v9 = vpop.f32.mrf.mxu3  ;;  %2931 = vmatpush.bf16.msra.mxu1 %v2922_v7 }
 0xaa7   :  { %v3180_v9 = vld [vmem:[#allocation4 + $0x8a0] sm:$0xf] }
 0xaa9   :  { %7867 = vmatmul.msk.bf16.vlgmr.msra.gmra.mxu1 %vm2637_vm4, %v9437_v8 }
 0xaaa   :  { %3152 = vmatpush.bf16.msrb.mxu1 %v9453_v5 }
 0xaae   :  { %3153 = vmatpush.bf16.msrb.mxu1 %v9452_v10  ;;  %v9468_v10 = vld [vmem:[#allocation4 + $0x8d8] sm:$0xff] }
 0xab2   :  { %3154 = vmatpush.bf16.msrb.mxu1 %v9451_v12  ;;  %v9465_v12 = vld [vmem:[#allocation4 + $0x8c0] sm:$0xff] }
 0xab6   :  { %3155 = vmatpush.bf16.msrb.mxu1 %v9450_v15  ;;  %v9462_v15 = vld [vmem:[#allocation4 + $0x8a8] sm:$0xff] }
 0xab9   :  { %7868 = vmatmul.msk.bf16.gmra.mxu1 %vm2637_vm4, %v2914_v20 }
 0xaba   :  { %3156 = vmatpush.bf16.msrb.mxu1 %v9449_v19  ;;  %v9486_v19 = vld [vmem:[#allocation4 + $0x968] sm:$0xff] }
 0xabb   :  { %3516 = vmatpush.bf16.msra.mxu2 %v9486_v19  ;;  %v9502_v19 = vld [vmem:[#allocation4 + $0x9e8] sm:$0xff] }
 0xabe   :  { %3157 = vmatpush.bf16.msrb.mxu1 %v9448_v22 }
 0xac2   :  { %3158 = vmatpush.bf16.msrb.mxu1 %v9447_v24 }
 0xac6   :  { %3159 = vmatpush.bf16.msrb.mxu1 %v9446_v26 }
 0xaca   :  { %3496 = vmatpush.bf16.msra.mxu1 %v9485_v36 }
 0xace   :  { %3497 = vmatpush.bf16.msra.mxu1 %v9484_v44 }
 0xad2   :  { %3498 = vmatpush.bf16.msra.mxu1 %v9483_v40 }
 0xad6   :  { %3499 = vmatpush.bf16.msra.mxu1 %v9482_v50 }
 0xada   :  { %3500 = vmatpush.bf16.msra.mxu1 %v9481_v55 }
 0xade   :  { %3501 = vmatpush.bf16.msra.mxu1 %v9480_v60  ;;  %v9498_v60 = vld [vmem:[#allocation4 + $0x9c8] sm:$0xff] }
 0xae2   :  { %3502 = vmatpush.bf16.msra.mxu1 %v9479_v2 }
 0xae6   :  { %3503 = vmatpush.bf16.msra.mxu1 %v9478_v17  ;;  %v9508_v17 = vld [vmem:[#allocation4 + $0xa18] sm:$0xff] }
 0xb26   :  { %v2933_v30 = vpop.f32.mrf.mxu1 }
 0xb27   :  { %v2990_v31 = vpack.c.bf16 %v2933_v30, %v2933_v30 }
 0xb29   :  { %3147 = vmatmul.bf16.vlgmr.msra.gmra.mxu0 %v2990_v31  ;;  %v9772_v31 = vld [vmem:[#allocation6 + $0x48] ss:$0 sm:$0xff] }
 0xb2e   :  { %v2935_v32 = vpop.f32.mrf.mxu1 }
 0xb2f   :  { %v2991_v35 = vpack.c.bf16 %v2935_v32, %v2935_v32 }
 0xb31   :  { %3160 = vmatmul.bf16.vlgmr.msrb.gmra.mxu1 %v2991_v35 }
 0xb32   :  { %3645 = vmatpush.bf16.msrb.mxu1 %v9499_v59 }
 0xb36   :  { %v2938_v39 = vpop.f32.mrf.mxu1  ;;  %3646 = vmatpush.bf16.msrb.mxu1 %v9498_v60 }
 0xb37   :  { %v2992_v33 = vpack.c.bf16 %v2938_v39, %v2938_v39 }
 0xb39   :  { %3173 = vmatmul.bf16.vlgmr.msrb.gmra.mxu2 %v2992_v33 }
 0xb3e   :  { %v2940_v37 = vpop.f32.mrf.mxu1 }
 0xba6   :  { %v3148_v42 = vpop.f32.mrf.mxu0 }
 0xba7   :  { %v3149_v57 = vadd.f32 %v9771_v52, %v3148_v42 }
 0xbae   :  { %v3150_v47 = vpop.f32.mrf.mxu0  ;;  %v3161_v49 = vpop.f32.mrf.mxu1 }
 0xbaf   :  { %v3162_v58 = vadd.f32 %v3161_v49, %v3149_v57  ;;  %v9773_v49 = vld [vmem:[#allocation2 + $0x1] ss:$0 sm:$0xff] }
 0xbb0   :  { %v3534_v40 = vsel %vm3533_vm7, %v3527_v38, %v9773_v49 }
 0xbb6   :  { %v3163_v53 = vpop.f32.mrf.mxu1 }
 0xbb7   :  { %v9494_v53 = vld [vmem:[#allocation4 + $0x9a8] sm:$0xff] }
 0xbbc   :  { %v3174_v61 = vpop.f32.mrf.mxu2 }
 0xbbd   :  { %v3175_v63 = vadd.f32 %v3174_v61, %v3162_v58  ;;  %v9497_v61 = vld [vmem:[#allocation4 + $0x9c0] sm:$0xff] }
 0xbbe   :  { %3647 = vmatpush.bf16.msrb.mxu1 %v9497_v61 }
 0xbbf   :  { %v3178_v0 = vadd.f32 %v3175_v63, %v10043_v18  ;;  %v9467_v18 = vld [vmem:[#allocation4 + $0x8d0] sm:$0xff] }
 0xbc1   :  { %v3179_v4 = vmax.f32 %v3178_v0, 0.0 }
 0xbc2   :  { %3648 = vmatpush.bf16.msrb.mxu1 %v9496_v62 }
 0xbc3   :  { %v3181_v5 = vpack.c.bf16 %v3179_v4, %v3179_v4 }
 0xbc4   :  { %v3176_v7 = vpop.f32.mrf.mxu2 }
 0xbc5   :  { %v3186_v8 = vsel %vm2644_vm3, %v3181_v5, 0 }
 0xbc6   :  { %3195 = vmatpush.bf16.msra.mxu3 %v3186_v8 }
 0xbc9   :  { %7965 = vmatmul.msk.bf16.vlgmr.msra.gmra.mxu3 %vm2637_vm4, %v3180_v9 }
 0xbca   :  { %3470 = vmatpush.bf16.msrb.mxu3 %v9469_v6  ;;  %v3613_v6 = vld [vmem:[#allocation6 + $0x50] sm:$0xff] }
 0xbce   :  { %3471 = vmatpush.bf16.msrb.mxu3 %v9468_v10 }
 0xbd2   :  { %3472 = vmatpush.bf16.msrb.mxu3 %v9467_v18  ;;  %v9500_v18 = vld [vmem:[#allocation4 + $0x9d8] sm:$0xff] }
 0xbd6   :  { %3473 = vmatpush.bf16.msrb.mxu3 %v9466_v11 }
 0xbda   :  { %3474 = vmatpush.bf16.msrb.mxu3 %v9465_v12  ;;  %v9501_v12 = vld [vmem:[#allocation4 + $0x9e0] sm:$0xff] }
 0xbde   :  { %3475 = vmatpush.bf16.msrb.mxu3 %v9464_v13  ;;  %v9511_v13 = vld [vmem:[#allocation4 + $0xa30] sm:$0xff] }
 0xbdf   :  { %3989 = vmatpush.bf16.msrb.mxu2 %v9511_v13 }
 0xbe2   :  { %3476 = vmatpush.bf16.msrb.mxu3 %v9463_v14  ;;  %v9519_v14 = vld [vmem:[#allocation4 + $0xa70] sm:$0xff] }
 0xbe6   :  { %3477 = vmatpush.bf16.msrb.mxu3 %v9462_v15  ;;  %v9510_v15 = vld [vmem:[#allocation4 + $0xa28] sm:$0xff] }
 0xbe7   :  { %3990 = vmatpush.bf16.msrb.mxu2 %v9510_v15 }
 0xbeb   :  { %3991 = vmatpush.bf16.msrb.mxu2 %v9509_v16  ;;  %v9536_v16 = vld [vmem:[#allocation4 + $0xaf8] sm:$0xff] }
 0xbef   :  { %3992 = vmatpush.bf16.msrb.mxu2 %v9508_v17  ;;  %v9546_v17 = vld [vmem:[#allocation4 + $0xb48] sm:$0xff] }
 0xc4c   :  { %v3197_v20 = vpop.f32.mrf.mxu3 }
 0xc4d   :  { %v3202_v21 = vrot.slane %v3197_v20, 2  ;;  %v3204_v22 = vrot.slane %v3197_v20, 4  ;;  %v3206_v23 = vrot.slane %v3197_v20, 6  ;;  %v3272_v24 = vpack.c.bf16 %v3197_v20, %v3197_v20  ;;  %v9507_v20 = vld [vmem:[#allocation4 + $0xa10] sm:$0xff] }
 0xc4e   :  { %3993 = vmatpush.bf16.msrb.mxu2 %v9507_v20  ;;  %v9545_v20 = vld [vmem:[#allocation4 + $0xb40] sm:$0xff] }
 0xc4f   :  { %v3273_v25 = vpack.c.bf16 %v3202_v21, %v3202_v21  ;;  %v3274_v26 = vpack.c.bf16 %v3204_v22, %v3204_v22  ;;  %v3275_v27 = vpack.c.bf16 %v3206_v23, %v3206_v23  ;;  %3478 = vmatmul.bf16.vlgmr.msrb.gmra.mxu3 %v3272_v24  ;;  %v9503_v21 = vld [vmem:[#allocation4 + $0x9f0] sm:$0xff]  ;;  %v9506_v22 = vld [vmem:[#allocation4 + $0xa08] sm:$0xff]  ;;  %v9505_v24 = vld [vmem:[#allocation4 + $0xa00] sm:$0xff] }
 0xc50   :  { %v9518_v23 = vld [vmem:[#allocation4 + $0xa68] sm:$0xff] }
 0xc51   :  { %3491 = vmatmul.bf16.vlgmr.msrb.gmra.mxu0 %v3273_v25  ;;  %3504 = vmatmul.bf16.vlgmr.msra.gmra.mxu1 %v3274_v26  ;;  %v9517_v25 = vld [vmem:[#allocation4 + $0xa60] sm:$0xff]  ;;  %v9504_v26 = vld [vmem:[#allocation4 + $0x9f8] sm:$0xff] }
 0xc52   :  { %3517 = vmatmul.bf16.vlgmr.msra.gmra.mxu2 %v3275_v27  ;;  %v9516_v27 = vld [vmem:[#allocation4 + $0xa58] sm:$0xff] }
 0xc53   :  { %3994 = vmatpush.bf16.msrb.mxu2 %v9506_v22  ;;  %v9543_v22 = vld [vmem:[#allocation4 + $0xb30] sm:$0xff] }
 0xc54   :  { %v3199_v28 = vpop.f32.mrf.mxu3 }
 0xc55   :  { %v9515_v28 = vld [vmem:[#allocation4 + $0xa50] sm:$0xff] }
 0xc57   :  { %3995 = vmatpush.bf16.msrb.mxu2 %v9505_v24  ;;  %v9542_v24 = vld [vmem:[#allocation4 + $0xb28] sm:$0xff] }
 0xc5b   :  { %3996 = vmatpush.bf16.msrb.mxu2 %v9504_v26  ;;  %v9541_v26 = vld [vmem:[#allocation4 + $0xb20] sm:$0xff] }
 0xcce   :  { %v3492_v29 = vpop.f32.mrf.mxu0  ;;  %v3505_v30 = vpop.f32.mrf.mxu1 }
 0xcd2   :  { %v3479_v32 = vpop.f32.mrf.mxu3 }
 0xcd3   :  { %v3480_v35 = vadd.f32 %v9772_v31, %v3479_v32  ;;  %v9526_v31 = vld [vmem:[#allocation4 + $0xaa8] sm:$0xff]  ;;  %v9513_v32 = vld [vmem:[#allocation4 + $0xa40] sm:$0xff] }
 0xcd5   :  { %v3493_v39 = vadd.f32 %v3492_v29, %v3480_v35  ;;  %v3518_v33 = vpop.f32.mrf.mxu2  ;;  %v9527_v29 = vld [vmem:[#allocation4 + $0xab0] sm:$0xff]  ;;  %v9525_v35 = vld [vmem:[#allocation4 + $0xaa0] sm:$0xff] }
 0xcd6   :  { %v3494_v37 = vpop.f32.mrf.mxu0  ;;  %v3507_v42 = vpop.f32.mrf.mxu1  ;;  %4017 = vmatpush.bf16.msra.mxu0 %v9527_v29  ;;  %v9552_v29 = vld [vmem:[#allocation4 + $0xb78] sm:$0xff] }
 0xcd7   :  { %v3506_v34 = vadd.f32 %v3505_v30, %v3493_v39  ;;  %v9514_v30 = vld [vmem:[#allocation4 + $0xa48] sm:$0xff]  ;;  %v9512_v39 = vld [vmem:[#allocation4 + $0xa38] sm:$0xff]  ;;  %v9523_v37 = vld [vmem:[#allocation4 + $0xa90] sm:$0xff] }
 0xcd8   :  { %v9535_v42 = vld [vmem:[#allocation4 + $0xaf0] sm:$0xff] }
 0xcd9   :  { %v3519_v36 = vadd.f32 %v3518_v33, %v3506_v34  ;;  %v9524_v33 = vld [vmem:[#allocation4 + $0xa98] sm:$0xff]  ;;  %4031 = vmatpush.bf16.msra.mxu2 %v9535_v42  ;;  %v9522_v34 = vld [vmem:[#allocation4 + $0xa88] sm:$0xff] }
 0xcda   :  { %v3481_v43 = vpop.f32.mrf.mxu3  ;;  %4018 = vmatpush.bf16.msra.mxu0 %v9526_v31  ;;  %v9551_v31 = vld [vmem:[#allocation4 + $0xb70] sm:$0xff]  ;;  %v9560_v42 = vld [vmem:[#allocation4 + $0xbb8] sm:$0xff] }
 0xcdb   :  { %3523 = vst.msk [vmem:[%s10269_s5] sm:$0x1] %vm3522_vm5, %v3519_v36  ;;  %v3535_v45 = vmul.f32 0.5, %v3519_v36 }
 0xcdc   :  { %8094 = vst.msk [vmem:[%s10269_s5] sm:$0x2] %vm3525_vm6, %v3519_v36  ;;  %s9902_s5 = smov 32  }
 0xcdd   :  { %v3520_v44 = vpop.f32.mrf.mxu2  ;;  %v3536_v46 = vmul.f32 1.442695, %v3535_v45  ;;  %v9521_v45 = vld [vmem:[#allocation4 + $0xa80] sm:$0xff] }
 0xcde   :  { %4019 = vmatpush.bf16.msra.mxu0 %v9525_v35  ;;  %v9533_v44 = vld [vmem:[#allocation4 + $0xae0] sm:$0xff]  ;;  %v9562_v35 = vld [vmem:[#allocation4 + $0xbc8] sm:$0xff] }
 0xcdf   :  { %9782 = vpow2.f32 %v3536_v46  ;;  %v9520_v46 = vld [vmem:[#allocation4 + $0xa78] sm:$0xff] }
 0xce2   :  { %4020 = vmatpush.bf16.msra.mxu0 %v9524_v33  ;;  %v9561_v33 = vld [vmem:[#allocation4 + $0xbc0] sm:$0xff] }
 0xce5   :  { %v9783_v47 = vpop.eup %9782 }
 0xce6   :  { %3539 = vrot.lane.b32.xlu0 %v9783_v47, %s9901_s6  ;;  %4021 = vmatpush.bf16.msra.mxu0 %v9523_v37  ;;  %v9532_v47 = vld [vmem:[#allocation4 + $0xad8] sm:$0xff] }
 0xce7   :  { %v9548_v37 = vld [vmem:[#allocation4 + $0xb58] sm:$0xff] }
 0xcea   :  { %4022 = vmatpush.bf16.msra.mxu0 %v9522_v34  ;;  %v9547_v34 = vld [vmem:[#allocation4 + $0xb50] sm:$0xff] }
 0xcee   :  { %4023 = vmatpush.bf16.msra.mxu0 %v9521_v45  ;;  %v9557_v45 = vld [vmem:[#allocation4 + $0xba0] sm:$0xff] }
 0xcf2   :  { %4024 = vmatpush.bf16.msra.mxu0 %v9520_v46  ;;  %v9556_v46 = vld [vmem:[#allocation4 + $0xb98] sm:$0xff] }
 0xcf6   :  { %4299 = vmatpush.bf16.msrb.mxu0 %v9546_v17  ;;  %v9565_v17 = vld [vmem:[#allocation4 + $0xbe0] sm:$0xff] }
 0xcfa   :  { %4300 = vmatpush.bf16.msrb.mxu0 %v9545_v20  ;;  %v9580_v20 = vld [vmem:[#allocation4 + $0xc58] sm:$0xff] }
 0xd58   :  { %v3540_v41 = vpop.permute.xlu0 %3539 }
 0xd59   :  { %v3542_v48 = vmul.f32 %v3540_v41, %v3534_v40  ;;  %v9531_v40 = vld [vmem:[#allocation4 + $0xad0] sm:$0xff]  ;;  %v9530_v41 = vld [vmem:[#allocation4 + $0xac8] sm:$0xff] }
 0xd5b   :  { %v3543_v50 = vadd.f32 %v3542_v48, %v3519_v36  ;;  %v9534_v36 = vld [vmem:[#allocation4 + $0xae8] sm:$0xff] }
 0xd5c   :  { %4032 = vmatpush.bf16.msra.mxu2 %v9534_v36  ;;  %v9559_v36 = vld [vmem:[#allocation4 + $0xbb0] sm:$0xff] }
 0xd5d   :  { %v3548_v51 = vpack.c.bf16 %v3543_v50, %v3543_v50  ;;  %v9529_v50 = vld [vmem:[#allocation4 + $0xac0] sm:$0xff] }
 0xd5f   :  { %v3567_v52 = vsel %vm3533_vm7, %v3548_v51, 0  ;;  %v9528_v51 = vld [vmem:[#allocation4 + $0xab8] sm:$0xff] }
 0xd60   :  { %3576 = vmatpush.bf16.msra.mxu3 %v3567_v52  ;;  %4033 = vmatpush.bf16.msra.mxu2 %v9533_v44 }
 0xd63   :  { %8103 = vmatmul.msk.bf16.vlgmr.msra.gmra.mxu3 %vm3559_vm8, %v9494_v53 }
 0xd64   :  { %4003 = vmatpush.bf16.msrb.mxu3 %v9519_v14  ;;  %4034 = vmatpush.bf16.msra.mxu2 %v9532_v47  ;;  %v9555_v47 = vld [vmem:[#allocation4 + $0xb90] sm:$0xff] }
 0xd68   :  { %4004 = vmatpush.bf16.msrb.mxu3 %v9518_v23  ;;  %4035 = vmatpush.bf16.msra.mxu2 %v9531_v40  ;;  %v9537_v23 = vld [vmem:[#allocation4 + $0xb00] sm:$0xff] }
 0xd6c   :  { %4005 = vmatpush.bf16.msrb.mxu3 %v9517_v25  ;;  %4036 = vmatpush.bf16.msra.mxu2 %v9530_v41  ;;  %v9538_v25 = vld [vmem:[#allocation4 + $0xb08] sm:$0xff] }
 0xd70   :  { %4006 = vmatpush.bf16.msrb.mxu3 %v9516_v27  ;;  %4037 = vmatpush.bf16.msra.mxu2 %v9529_v50  ;;  %v9553_v27 = vld [vmem:[#allocation4 + $0xb80] sm:$0xff] }
 0xd73   :  { %8104 = vmatmul.msk.bf16.gmra.mxu3 %vm3559_vm8, %v9495_v54 }
 0xd74   :  { %4007 = vmatpush.bf16.msrb.mxu3 %v9515_v28  ;;  %4038 = vmatpush.bf16.msra.mxu2 %v9528_v51  ;;  %v9540_v28 = vld [vmem:[#allocation4 + $0xb18] sm:$0xff] }
 0xd78   :  { %4008 = vmatpush.bf16.msrb.mxu3 %v9514_v30  ;;  %v9539_v30 = vld [vmem:[#allocation4 + $0xb10] sm:$0xff] }
 0xd7c   :  { %4009 = vmatpush.bf16.msrb.mxu3 %v9513_v32  ;;  %v9550_v32 = vld [vmem:[#allocation4 + $0xb68] sm:$0xff] }
 0xd80   :  { %4010 = vmatpush.bf16.msrb.mxu3 %v9512_v39  ;;  %v9549_v39 = vld [vmem:[#allocation4 + $0xb60] sm:$0xff] }
 0xde6   :  { %v3578_v55 = vpop.f32.mrf.mxu3 }
 0xdee   :  { %v3580_v56 = vpop.f32.mrf.mxu3 }
 0xdef   :  { %3589 = vrot.lane.b32.xlu0 %v3580_v56, %s9896_s30 }
 0xdf6   :  { %v3583_v57 = vpop.f32.mrf.mxu3 }
 0xdf7   :  { %3593 = vrot.lane.b32.xlu1 %v3583_v57, %s9902_s5 }
 0xdfe   :  { %v3585_v58 = vpop.f32.mrf.mxu3 }
 0xdff   :  { %3597 = vrot.lane.b32.xlu1 %v3585_v58, %s9903_s2 }
 0xe61   :  { %v3590_v0 = vpop.permute.xlu0 %3589 }
 0xe62   :  { %v3600_v1 = vsel %vm1697_vm2, %v3578_v55, %v3590_v0  ;;  %v9774_v0 = vld [vmem:[#allocation6 + $0x58] ss:$0 sm:$0xff] }
 0xe69   :  { %v3594_v63 = vpop.permute.xlu1 %3593 }
 0xe6a   :  { %v3601_v2 = vsel %vm599_vm1, %v3600_v1, %v3594_v63 }
 0xe71   :  { %v3598_v3 = vpop.permute.xlu1 %3597 }
 0xe72   :  { %v3603_v4 = vsel %vm3602_vm9, %v3601_v2, %v3598_v3 }
 0xe73   :  { %v3612_v5 = vpack.c.bf16 %v3603_v4, %v3603_v4 }
 0xe75   :  { %8121 = vmatmul.msk.bf16.vlgmr.msrb.gmra.mxu1 %vm135_vm0, %v3612_v5 }
 0xef2   :  { %v3650_v7 = vpop.f32.mrf.mxu1 }
 0xef3   :  { %v3651_v8 = vadd.f32 %v3650_v7, %v3613_v6 }
 0xef5   :  { %v3662_v9 = vpack.c.bf16 %v3651_v8, %v3651_v8 }
 0xef7   :  { %v10067_v10 = vsel %vm2644_vm3, %v3662_v9, 0 }
 0xef8   :  { %3705 = vmatpush.bf16.msra.mxu1 %v10067_v10 }
 0xefa   :  { %v3652_v11 = vpop.f32.mrf.mxu1 }
 0xefb   :  { %8138 = vmatmul.msk.bf16.vlgmr.msra.gmra.mxu1 %vm2637_vm4, %v9500_v18 }
 0xf0b   :  { %8139 = vmatmul.msk.bf16.gmra.mxu1 %vm2637_vm4, %v9501_v12 }
 0xf1b   :  { %8140 = vmatmul.msk.bf16.gmra.mxu1 %vm2637_vm4, %v9502_v19  ;;  %v9554_v19 = vld [vmem:[#allocation4 + $0xb88] sm:$0xff] }
 0xf1c   :  { %4313 = vmatpush.bf16.msrb.mxu1 %v9554_v19  ;;  %v9568_v19 = vld [vmem:[#allocation4 + $0xbf8] sm:$0xff] }
 0xf20   :  { %4314 = vmatpush.bf16.msrb.mxu1 %v9553_v27  ;;  %v9576_v27 = vld [vmem:[#allocation4 + $0xc38] sm:$0xff] }
 0xf24   :  { %4315 = vmatpush.bf16.msrb.mxu1 %v9552_v29  ;;  %v9575_v29 = vld [vmem:[#allocation4 + $0xc30] sm:$0xff] }
 0xf28   :  { %4316 = vmatpush.bf16.msrb.mxu1 %v9551_v31  ;;  %v9574_v31 = vld [vmem:[#allocation4 + $0xc28] sm:$0xff] }
 0xf2b   :  { %8141 = vmatmul.msk.bf16.gmra.mxu1 %vm2637_vm4, %v9503_v21  ;;  %v9544_v21 = vld [vmem:[#allocation4 + $0xb38] sm:$0xff] }
 0xf2c   :  { %4301 = vmatpush.bf16.msrb.mxu0 %v9544_v21  ;;  %4317 = vmatpush.bf16.msrb.mxu1 %v9550_v32  ;;  %v9567_v21 = vld [vmem:[#allocation4 + $0xbf0] sm:$0xff]  ;;  %v9586_v32 = vld [vmem:[#allocation4 + $0xc88] sm:$0xff] }
 0xf30   :  { %4302 = vmatpush.bf16.msrb.mxu0 %v9543_v22  ;;  %4318 = vmatpush.bf16.msrb.mxu1 %v9549_v39  ;;  %v9579_v22 = vld [vmem:[#allocation4 + $0xc50] sm:$0xff]  ;;  %v9584_v39 = vld [vmem:[#allocation4 + $0xc78] sm:$0xff] }
 0xf34   :  { %4303 = vmatpush.bf16.msrb.mxu0 %v9542_v24  ;;  %4319 = vmatpush.bf16.msrb.mxu1 %v9548_v37  ;;  %v9578_v24 = vld [vmem:[#allocation4 + $0xc48] sm:$0xff]  ;;  %v9583_v37 = vld [vmem:[#allocation4 + $0xc70] sm:$0xff] }
 0xf38   :  { %4304 = vmatpush.bf16.msrb.mxu0 %v9541_v26  ;;  %4320 = vmatpush.bf16.msrb.mxu1 %v9547_v34  ;;  %v9589_v26 = vld [vmem:[#allocation4 + $0xca0] sm:$0xff] }
 0xf3c   :  { %4305 = vmatpush.bf16.msrb.mxu0 %v9540_v28  ;;  %v9588_v28 = vld [vmem:[#allocation4 + $0xc98] sm:$0xff] }
 0xf40   :  { %4306 = vmatpush.bf16.msrb.mxu0 %v9539_v30  ;;  %v9587_v30 = vld [vmem:[#allocation4 + $0xc90] sm:$0xff] }
 0xf78   :  { %v3707_v43 = vpop.f32.mrf.mxu1 }
 0xf80   :  { %v3709_v49 = vpop.f32.mrf.mxu1 }
 0xf81   :  { %v3791_v38 = vpack.c.bf16 %v3709_v49, %v3707_v43  ;;  %v9558_v43 = vld [vmem:[#allocation4 + $0xba8] sm:$0xff] }
 0xf83   :  { %3997 = vmatmul.bf16.vlgmr.msrb.gmra.mxu2 %v3791_v38 }
 0xf84   :  { %4327 = vmatpush.bf16.msrb.mxu2 %v9562_v35  ;;  %v9585_v35 = vld [vmem:[#allocation4 + $0xc80] sm:$0xff] }
 0xf88   :  { %v3712_v48 = vpop.f32.mrf.mxu1  ;;  %4328 = vmatpush.bf16.msrb.mxu2 %v9561_v33 }
 0xf8c   :  { %4329 = vmatpush.bf16.msrb.mxu2 %v9560_v42  ;;  %v9582_v42 = vld [vmem:[#allocation4 + $0xc68] sm:$0xff] }
 0xf90   :  { %v3714_v52 = vpop.f32.mrf.mxu1  ;;  %4330 = vmatpush.bf16.msrb.mxu2 %v9559_v36 }
 0xf91   :  { %v3792_v53 = vpack.c.bf16 %v3714_v52, %v3712_v48 }
 0xf93   :  { %4011 = vmatmul.bf16.vlgmr.msrb.gmra.mxu3 %v3792_v53 }
 0xf94   :  { %4331 = vmatpush.bf16.msrb.mxu2 %v9558_v43 }
 0xf98   :  { %v3717_v54 = vpop.f32.mrf.mxu1  ;;  %4332 = vmatpush.bf16.msrb.mxu2 %v9557_v45 }
 0xf9c   :  { %4333 = vmatpush.bf16.msrb.mxu2 %v9556_v46 }
 0xfa0   :  { %v3719_v55 = vpop.f32.mrf.mxu1  ;;  %4334 = vmatpush.bf16.msrb.mxu2 %v9555_v47 }
 0xfa1   :  { %v3793_v56 = vpack.c.bf16 %v3719_v55, %v3717_v54  ;;  %v9775_v55 = vld [vmem:[#allocation6 + $0x60] ss:$0 sm:$0xff] }
 0xfa3   :  { %4025 = vmatmul.bf16.vlgmr.msra.gmra.mxu0 %v3793_v56 }
 0xfa8   :  { %v3722_v57 = vpop.f32.mrf.mxu1 }
 0xfb0   :  { %v3724_v58 = vpop.f32.mrf.mxu1 }
 0xfb1   :  { %v3794_v59 = vpack.c.bf16 %v3724_v58, %v3722_v57 }
 0xfb3   :  { %4039 = vmatmul.bf16.vlgmr.msra.gmra.mxu2 %v3794_v59 }
 0xfb4   :  { %4623 = vmatpush.bf16.msra.mxu2 %v9589_v26  ;;  %v9629_v26 = vld [vmem:[#allocation4 + $0xde0] sm:$0xff] }
 0xfb8   :  { %4624 = vmatpush.bf16.msra.mxu2 %v9588_v28  ;;  %v9628_v28 = vld [vmem:[#allocation4 + $0xdd8] sm:$0xff] }
 0xfbc   :  { %4625 = vmatpush.bf16.msra.mxu2 %v9587_v30  ;;  %v9627_v30 = vld [vmem:[#allocation4 + $0xdd0] sm:$0xff] }
 0xfc0   :  { %4626 = vmatpush.bf16.msra.mxu2 %v9586_v32  ;;  %v9626_v32 = vld [vmem:[#allocation4 + $0xdc8] sm:$0xff] }
 0xfc4   :  { %4627 = vmatpush.bf16.msra.mxu2 %v9585_v35  ;;  %v9609_v35 = vld [vmem:[#allocation4 + $0xd40] sm:$0xff] }
 0xfc8   :  { %4628 = vmatpush.bf16.msra.mxu2 %v9584_v39  ;;  %v9625_v39 = vld [vmem:[#allocation4 + $0xdc0] sm:$0xff] }
 0xfcc   :  { %4629 = vmatpush.bf16.msra.mxu2 %v9583_v37  ;;  %v9624_v37 = vld [vmem:[#allocation4 + $0xdb8] sm:$0xff] }
 0xfd0   :  { %4630 = vmatpush.bf16.msra.mxu2 %v9582_v42 }
0x1006   :  { %v3998_v60 = vpop.f32.mrf.mxu2 }
0x1007   :  { %v3999_v2 = vadd.f32 %v9774_v0, %v3998_v60 }
0x100e   :  { %v4000_v61 = vpop.f32.mrf.mxu2 }
0x100f   :  { %v4001_v4 = vadd.f32 %v9774_v0, %v4000_v61 }
0x1016   :  { %v4012_v62 = vpop.f32.mrf.mxu3 }
0x1017   :  { %v4013_v5 = vadd.f32 %v4012_v62, %v3999_v2 }
0x101e   :  { %v4014_v3 = vpop.f32.mrf.mxu3 }
0x101f   :  { %v4015_v7 = vadd.f32 %v4014_v3, %v4001_v4 }
0x1020   :  { %v4026_v63 = vpop.f32.mrf.mxu0 }
0x1021   :  { %v4027_v8 = vadd.f32 %v4026_v63, %v4013_v5  ;;  %v9563_v5 = vld [vmem:[#allocation4 + $0xbd0] sm:$0xff] }
0x1028   :  { %v4028_v6 = vpop.f32.mrf.mxu0 }
0x1029   :  { %v4029_v9 = vadd.f32 %v4028_v6, %v4015_v7  ;;  %v9573_v6 = vld [vmem:[#allocation4 + $0xc20] sm:$0xff] }
0x102a   :  { %v9581_v7 = vld [vmem:[#allocation4 + $0xc60] sm:$0xff] }
0x102b   :  { %4609 = vmatpush.bf16.msra.mxu1 %v9581_v7  ;;  %v9618_v7 = vld [vmem:[#allocation4 + $0xd88] sm:$0xff] }
0x102f   :  { %4610 = vmatpush.bf16.msra.mxu1 %v9580_v20  ;;  %v9616_v20 = vld [vmem:[#allocation4 + $0xd78] sm:$0xff] }
0x1033   :  { %4611 = vmatpush.bf16.msra.mxu1 %v9579_v22  ;;  %v9615_v22 = vld [vmem:[#allocation4 + $0xd70] sm:$0xff] }
0x1036   :  { %v4040_v1 = vpop.f32.mrf.mxu2 }
0x1037   :  { %v10074_v18 = vadd.f32 %v4040_v1, %v4027_v8  ;;  %v9572_v8 = vld [vmem:[#allocation4 + $0xc18] sm:$0xff]  ;;  %4612 = vmatpush.bf16.msra.mxu1 %v9578_v24  ;;  %v9614_v24 = vld [vmem:[#allocation4 + $0xd68] sm:$0xff] }
0x1039   :  { %v4045_v13 = vmax.f32 %v10074_v18, 0.0  ;;  %v9605_v18 = vld [vmem:[#allocation4 + $0xd20] sm:$0xff] }
0x103e   :  { %v4042_v11 = vpop.f32.mrf.mxu2 }
0x103f   :  { %v10076_v12 = vadd.f32 %v4042_v11, %v4029_v9  ;;  %v9571_v9 = vld [vmem:[#allocation4 + $0xc10] sm:$0xff]  ;;  %v9570_v11 = vld [vmem:[#allocation4 + $0xc08] sm:$0xff] }
0x1041   :  { %v4046_v14 = vmax.f32 %v10076_v12, 0.0  ;;  %v9621_v12 = vld [vmem:[#allocation4 + $0xda0] sm:$0xff] }
0x1043   :  { %v4053_v15 = vpack.c.bf16 %v4046_v14, %v4045_v13 }
0x1045   :  { %4085 = vmatpush.bf16.msra.mxu3 %v4053_v15  ;;  %v9564_v15 = vld [vmem:[#allocation4 + $0xbd8] sm:$0xff] }
0x1048   :  { %8282 = vmatmul.msk.bf16.vlgmr.msra.gmra.mxu3 %vm1697_vm2, %v9536_v16  ;;  %v9569_v16 = vld [vmem:[#allocation4 + $0xc00] sm:$0xff] }
0x1049   :  { %4595 = vmatpush.bf16.msrb.mxu3 %v9573_v6  ;;  %v9602_v6 = vld [vmem:[#allocation4 + $0xd08] sm:$0xff] }
0x104d   :  { %4596 = vmatpush.bf16.msrb.mxu3 %v9572_v8  ;;  %v9592_v8 = vld [vmem:[#allocation4 + $0xcb8] sm:$0xff] }
0x1051   :  { %4597 = vmatpush.bf16.msrb.mxu3 %v9571_v9  ;;  %v9596_v9 = vld [vmem:[#allocation4 + $0xcd8] sm:$0xff] }
0x1055   :  { %4598 = vmatpush.bf16.msrb.mxu3 %v9570_v11  ;;  %v9601_v11 = vld [vmem:[#allocation4 + $0xd00] sm:$0xff] }
0x1058   :  { %8283 = vmatmul.msk.bf16.gmra.mxu3 %vm1697_vm2, %v9537_v23  ;;  %v9566_v23 = vld [vmem:[#allocation4 + $0xbe8] sm:$0xff] }
0x1059   :  { %4599 = vmatpush.bf16.msrb.mxu3 %v9569_v16  ;;  %v9593_v16 = vld [vmem:[#allocation4 + $0xcc0] sm:$0xff] }
0x105d   :  { %4600 = vmatpush.bf16.msrb.mxu3 %v9568_v19  ;;  %v9600_v19 = vld [vmem:[#allocation4 + $0xcf8] sm:$0xff] }
0x1061   :  { %4601 = vmatpush.bf16.msrb.mxu3 %v9567_v21  ;;  %v9599_v21 = vld [vmem:[#allocation4 + $0xcf0] sm:$0xff] }
0x1065   :  { %4602 = vmatpush.bf16.msrb.mxu3 %v9566_v23  ;;  %v9598_v23 = vld [vmem:[#allocation4 + $0xce8] sm:$0xff] }
0x1068   :  { %8284 = vmatmul.msk.bf16.gmra.mxu3 %vm1697_vm2, %v9538_v25  ;;  %v9577_v25 = vld [vmem:[#allocation4 + $0xc40] sm:$0xff] }
0x1069   :  { %4613 = vmatpush.bf16.msra.mxu1 %v9577_v25  ;;  %v9613_v25 = vld [vmem:[#allocation4 + $0xd60] sm:$0xff] }
0x106d   :  { %4614 = vmatpush.bf16.msra.mxu1 %v9576_v27  ;;  %v9612_v27 = vld [vmem:[#allocation4 + $0xd58] sm:$0xff] }
0x1071   :  { %4615 = vmatpush.bf16.msra.mxu1 %v9575_v29  ;;  %v9611_v29 = vld [vmem:[#allocation4 + $0xd50] sm:$0xff] }
0x1075   :  { %4616 = vmatpush.bf16.msra.mxu1 %v9574_v31  ;;  %v9610_v31 = vld [vmem:[#allocation4 + $0xd48] sm:$0xff] }
0x10cb   :  { %v4087_v44 = vpop.f32.mrf.mxu3 }
0x10d3   :  { %v4089_v49 = vpop.f32.mrf.mxu3 }
0x10d4   :  { %v4150_v38 = vpack.c.bf16 %v4089_v49, %v4087_v44 }
0x10d6   :  { %4307 = vmatmul.bf16.vlgmr.msrb.gmra.mxu0 %v4150_v38 }
0x10db   :  { %v4092_v40 = vpop.f32.mrf.mxu3 }
0x10e3   :  { %v4094_v41 = vpop.f32.mrf.mxu3 }
0x10e4   :  { %v4151_v48 = vpack.c.bf16 %v4094_v41, %v4092_v40  ;;  %v9776_v41 = vld [vmem:[#allocation6 + $0x68] ss:$0 sm:$0xff] }
0x10e6   :  { %4321 = vmatmul.bf16.vlgmr.msrb.gmra.mxu1 %v4151_v48 }
0x10e7   :  { %5056 = vmatpush.bf16.msrb.mxu1 %v9613_v25 }
0x10eb   :  { %v4097_v50 = vpop.f32.mrf.mxu3  ;;  %5057 = vmatpush.bf16.msrb.mxu1 %v9612_v27 }
0x10ef   :  { %5058 = vmatpush.bf16.msrb.mxu1 %v9611_v29 }
0x10f3   :  { %v4099_v51 = vpop.f32.mrf.mxu3  ;;  %5059 = vmatpush.bf16.msrb.mxu1 %v9610_v31 }
0x10f4   :  { %v4152_v52 = vpack.c.bf16 %v4099_v51, %v4097_v50 }
0x10f6   :  { %4335 = vmatmul.bf16.vlgmr.msrb.gmra.mxu2 %v4152_v52 }
0x10f7   :  { %5060 = vmatpush.bf16.msrb.mxu1 %v9609_v35 }
0x1153   :  { %v4308_v53 = vpop.f32.mrf.mxu0 }
0x1154   :  { %v4309_v58 = vadd.f32 %v9775_v55, %v4308_v53 }
0x115b   :  { %v4310_v57 = vpop.f32.mrf.mxu0 }
0x115c   :  { %v4311_v60 = vadd.f32 %v9775_v55, %v4310_v57 }
0x1163   :  { %v4322_v54 = vpop.f32.mrf.mxu1 }
0x1164   :  { %v4323_v61 = vadd.f32 %v4322_v54, %v4309_v58 }
0x116b   :  { %v4324_v59 = vpop.f32.mrf.mxu1 }
0x116c   :  { %v4325_v62 = vadd.f32 %v4324_v59, %v4311_v60 }
0x1179   :  { %v4336_v56 = vpop.f32.mrf.mxu2 }
0x117a   :  { %v4337_v63 = vadd.f32 %v4336_v56, %v4323_v61 }
0x117c   :  { %v4341_v2 = vmax.f32 %v4337_v63, 0.0 }
0x1181   :  { %v4338_v0 = vpop.f32.mrf.mxu2 }
0x1182   :  { %v4339_v1 = vadd.f32 %v4338_v0, %v4325_v62  ;;  %v9590_v0 = vld [vmem:[#allocation4 + $0xca8] sm:$0xff] }
0x1184   :  { %v4342_v3 = vmax.f32 %v4339_v1, 0.0  ;;  %v9594_v1 = vld [vmem:[#allocation4 + $0xcc8] sm:$0xff] }
0x1186   :  { %v4349_v4 = vpack.c.bf16 %v4342_v3, %v4341_v2  ;;  %v9591_v2 = vld [vmem:[#allocation4 + $0xcb0] sm:$0xff] }
0x1187   :  { %v9595_v3 = vld [vmem:[#allocation4 + $0xcd0] sm:$0xff] }
0x1188   :  { %4381 = vmatpush.bf16.msra.mxu0 %v4349_v4  ;;  %v9603_v4 = vld [vmem:[#allocation4 + $0xd10] sm:$0xff] }
0x118b   :  { %8393 = vmatmul.msk.bf16.vlgmr.msra.gmra.mxu0 %vm1697_vm2, %v9563_v5  ;;  %v9619_v5 = vld [vmem:[#allocation4 + $0xd90] sm:$0xff] }
0x118c   :  { %5037 = vmatpush.bf16.msrb.mxu0 %v9605_v18 }
0x119b   :  { %8394 = vmatmul.msk.bf16.gmra.mxu0 %vm1697_vm2, %v9564_v15  ;;  %v9617_v15 = vld [vmem:[#allocation4 + $0xd80] sm:$0xff] }
0x11ab   :  { %8395 = vmatmul.msk.bf16.gmra.mxu0 %vm1697_vm2, %v9565_v17  ;;  %v9597_v17 = vld [vmem:[#allocation4 + $0xce0] sm:$0xff] }
0x1208   :  { %v4383_v33 = vpop.f32.mrf.mxu0 }
0x1210   :  { %v4385_v34 = vpop.f32.mrf.mxu0 }
0x1211   :  { %v4446_v36 = vpack.c.bf16 %v4385_v34, %v4383_v33  ;;  %v9608_v33 = vld [vmem:[#allocation4 + $0xd38] sm:$0xff] }
0x1212   :  { %5061 = vmatpush.bf16.msrb.mxu1 %v9608_v33 }
0x1213   :  { %4603 = vmatmul.bf16.vlgmr.msrb.gmra.mxu3 %v4446_v36  ;;  %v9607_v36 = vld [vmem:[#allocation4 + $0xd30] sm:$0xff] }
0x1216   :  { %5062 = vmatpush.bf16.msrb.mxu1 %v9607_v36 }
0x1218   :  { %v4388_v43 = vpop.f32.mrf.mxu0 }
0x1220   :  { %v4390_v45 = vpop.f32.mrf.mxu0 }
0x1221   :  { %v4447_v44 = vpack.c.bf16 %v4390_v45, %v4388_v43  ;;  %v9623_v43 = vld [vmem:[#allocation4 + $0xdb0] sm:$0xff]  ;;  %v9606_v45 = vld [vmem:[#allocation4 + $0xd28] sm:$0xff] }
0x1222   :  { %5063 = vmatpush.bf16.msrb.mxu1 %v9606_v45  ;;  %v9630_v45 = vld [vmem:[#allocation4 + $0xde8] sm:$0xff] }
0x1223   :  { %4617 = vmatmul.bf16.vlgmr.msra.gmra.mxu1 %v4447_v44  ;;  %v9622_v44 = vld [vmem:[#allocation4 + $0xda8] sm:$0xff] }
0x1228   :  { %v4393_v46 = vpop.f32.mrf.mxu0 }
0x1230   :  { %v4395_v47 = vpop.f32.mrf.mxu0 }
0x1231   :  { %v4448_v49 = vpack.c.bf16 %v4395_v47, %v4393_v46 }
0x1233   :  { %4631 = vmatmul.bf16.vlgmr.msra.gmra.mxu2 %v4448_v49 }
0x1296   :  { %v4604_v38 = vpop.f32.mrf.mxu3 }
0x1297   :  { %v4605_v50 = vadd.f32 %v9776_v41, %v4604_v38 }
0x129e   :  { %v4606_v51 = vpop.f32.mrf.mxu3 }
0x129f   :  { %v4607_v54 = vadd.f32 %v9776_v41, %v4606_v51 }
0x12a0   :  { %v4618_v40 = vpop.f32.mrf.mxu1 }
0x12a1   :  { %v4619_v52 = vadd.f32 %v4618_v40, %v4605_v50 }
0x12a8   :  { %v4620_v53 = vpop.f32.mrf.mxu1 }
0x12a9   :  { %v4621_v56 = vadd.f32 %v4620_v53, %v4607_v54 }
0x12b6   :  { %v4632_v48 = vpop.f32.mrf.mxu2 }
0x12b7   :  { %v4633_v55 = vadd.f32 %v4632_v48, %v4619_v52 }
0x12b9   :  { %v4637_v58 = vadd.f32 %v4633_v55, %v4045_v13  ;;  %v9604_v13 = vld [vmem:[#allocation4 + $0xd18] sm:$0xff] }
0x12ba   :  { %5038 = vmatpush.bf16.msrb.mxu0 %v9604_v13 }
0x12bb   :  { %v4639_v61 = vmax.f32 %v4637_v58, 0.0 }
0x12be   :  { %v4634_v57 = vpop.f32.mrf.mxu2  ;;  %5039 = vmatpush.bf16.msrb.mxu0 %v9603_v4 }
0x12bf   :  { %v4635_v59 = vadd.f32 %v4634_v57, %v4621_v56 }
0x12c1   :  { %v4638_v60 = vadd.f32 %v4635_v59, %v4046_v14  ;;  %v9620_v14 = vld [vmem:[#allocation4 + $0xd98] sm:$0xff] }
0x12c2   :  { %5040 = vmatpush.bf16.msrb.mxu0 %v9602_v6 }
0x12c3   :  { %v4640_v62 = vmax.f32 %v4638_v60, 0.0 }
0x12c5   :  { %v4657_v63 = vpack.c.bf16 %v4640_v62, %v4639_v61 }
0x12c6   :  { %5041 = vmatpush.bf16.msrb.mxu0 %v9601_v11 }
0x12c7   :  { %4729 = vmatpush.bf16.msrb.mxu2 %v4657_v63  ;;  %9750 = vmatpush.bf16.msra.mxu3 %v4657_v63 }
0x12ca   :  { %8524 = vmatmul.msk.bf16.vlgmr.msrb.gmra.mxu2 %vm1697_vm2, %v9590_v0  ;;  %8528 = vmatmul.msk.bf16.vlgmr.msra.gmra.mxu3 %vm1697_vm2, %v9594_v1 }
0x12cb   :  { %5075 = vmatpush.bf16.msra.mxu2 %v9621_v12  ;;  %5042 = vmatpush.bf16.msrb.mxu0 %v9600_v19 }
0x12cf   :  { %5076 = vmatpush.bf16.msra.mxu2 %v9620_v14  ;;  %5043 = vmatpush.bf16.msrb.mxu0 %v9599_v21 }
0x12d3   :  { %5077 = vmatpush.bf16.msra.mxu2 %v9619_v5  ;;  %5044 = vmatpush.bf16.msrb.mxu0 %v9598_v23 }
0x12d7   :  { %5078 = vmatpush.bf16.msra.mxu2 %v9618_v7  ;;  %5094 = vmatpush.bf16.msra.mxu0 %v9629_v26  ;;  %v9777_v7 = vld [vmem:[#allocation6 + $0x70] ss:$0 sm:$0xff] }
0x12da   :  { %8525 = vmatmul.msk.bf16.gmra.mxu2 %vm1697_vm2, %v9591_v2  ;;  %8529 = vmatmul.msk.bf16.gmra.mxu3 %vm1697_vm2, %v9595_v3 }
0x12db   :  { %5079 = vmatpush.bf16.msra.mxu2 %v9617_v15  ;;  %5095 = vmatpush.bf16.msra.mxu0 %v9628_v28 }
0x12df   :  { %5080 = vmatpush.bf16.msra.mxu2 %v9616_v20  ;;  %5096 = vmatpush.bf16.msra.mxu0 %v9627_v30 }
0x12e3   :  { %5081 = vmatpush.bf16.msra.mxu2 %v9615_v22  ;;  %5097 = vmatpush.bf16.msra.mxu0 %v9626_v32 }
0x12e7   :  { %5082 = vmatpush.bf16.msra.mxu2 %v9614_v24  ;;  %5098 = vmatpush.bf16.msra.mxu0 %v9625_v39 }
0x12ea   :  { %8526 = vmatmul.msk.bf16.gmra.mxu2 %vm1697_vm2, %v9592_v8  ;;  %8530 = vmatmul.msk.bf16.gmra.mxu3 %vm1697_vm2, %v9596_v9 }
0x12eb   :  { %5099 = vmatpush.bf16.msra.mxu0 %v9624_v37 }
0x12ef   :  { %5100 = vmatpush.bf16.msra.mxu0 %v9623_v43 }
0x12f3   :  { %5101 = vmatpush.bf16.msra.mxu0 %v9622_v44  ;;  %v9631_v44 = vld [vmem:[#allocation4 + $0xdf0] sm:$0xff] }
0x12fa   :  { %8527 = vmatmul.msk.bf16.gmra.mxu2 %vm1697_vm2, %v9593_v16  ;;  %8531 = vmatmul.msk.bf16.gmra.mxu3 %vm1697_vm2, %v9597_v17 }
0x134d   :  { %v4731_v42 = vpop.f32.mrf.mxu2  ;;  %v4751_v34 = vpop.f32.mrf.mxu3 }
0x1355   :  { %v4733_v46 = vpop.f32.mrf.mxu2  ;;  %v4753_v47 = vpop.f32.mrf.mxu3 }
0x1356   :  { %v4835_v49 = vpack.c.bf16 %v4733_v46, %v4731_v42  ;;  %v4837_v38 = vpack.c.bf16 %v4753_v47, %v4751_v34  ;;  %v9632_v46 = vld [vmem:[#allocation4 + $0xdf8] sm:$0xff]  ;;  %v9633_v47 = vld [vmem:[#allocation4 + $0xe00] sm:$0xff] }
0x1358   :  { %5045 = vmatmul.bf16.vlgmr.msrb.gmra.mxu0 %v4835_v49  ;;  %5083 = vmatmul.bf16.vlgmr.msra.gmra.mxu2 %v4837_v38  ;;  %v9643_v49 = vld [vmem:[#allocation4 + $0xe50] sm:$0xff]  ;;  %v9642_v38 = vld [vmem:[#allocation4 + $0xe48] sm:$0xff] }
0x1359   :  { %5418 = vmatpush.bf16.msrb.mxu2 %v9643_v49 }
0x135d   :  { %v4736_v40 = vpop.f32.mrf.mxu2  ;;  %v4756_v41 = vpop.f32.mrf.mxu3  ;;  %5419 = vmatpush.bf16.msrb.mxu2 %v9642_v38 }
0x1365   :  { %v4738_v48 = vpop.f32.mrf.mxu2  ;;  %v4758_v50 = vpop.f32.mrf.mxu3 }
0x1366   :  { %v4839_v51 = vpack.c.bf16 %v4738_v48, %v4736_v40  ;;  %v4841_v52 = vpack.c.bf16 %v4758_v50, %v4756_v41  ;;  %v9641_v40 = vld [vmem:[#allocation4 + $0xe40] sm:$0xff]  ;;  %v9640_v41 = vld [vmem:[#allocation4 + $0xe38] sm:$0xff]  ;;  %v9634_v48 = vld [vmem:[#allocation4 + $0xe08] sm:$0xff] }
0x1367   :  { %5420 = vmatpush.bf16.msrb.mxu2 %v9641_v40  ;;  %v9639_v50 = vld [vmem:[#allocation4 + $0xe30] sm:$0xff] }
0x1368   :  { %5050 = vmatmul.bf16.gmra.mxu0 %v4839_v51  ;;  %5088 = vmatmul.bf16.gmra.mxu2 %v4841_v52  ;;  %v9635_v51 = vld [vmem:[#allocation4 + $0xe10] sm:$0xff]  ;;  %v9638_v52 = vld [vmem:[#allocation4 + $0xe28] sm:$0xff] }
0x136b   :  { %5421 = vmatpush.bf16.msrb.mxu2 %v9640_v41 }
0x136d   :  { %v4741_v53 = vpop.f32.mrf.mxu2  ;;  %v4761_v54 = vpop.f32.mrf.mxu3 }
0x136f   :  { %5422 = vmatpush.bf16.msrb.mxu2 %v9639_v50 }
0x1373   :  { %5423 = vmatpush.bf16.msrb.mxu2 %v9638_v52 }
0x1375   :  { %v4743_v55 = vpop.f32.mrf.mxu2  ;;  %v4763_v56 = vpop.f32.mrf.mxu3 }
0x1376   :  { %v4836_v57 = vpack.c.bf16 %v4743_v55, %v4741_v53  ;;  %v4838_v58 = vpack.c.bf16 %v4763_v56, %v4761_v54  ;;  %v9637_v53 = vld [vmem:[#allocation4 + $0xe20] sm:$0xff]  ;;  %v9636_v54 = vld [vmem:[#allocation4 + $0xe18] sm:$0xff]  ;;  %v9651_v55 = vld [vmem:[#allocation4 + $0xe90] sm:$0xff] }
0x1377   :  { %5424 = vmatpush.bf16.msrb.mxu2 %v9637_v53  ;;  %5437 = vmatpush.bf16.msrb.mxu0 %v9651_v55  ;;  %v9650_v56 = vld [vmem:[#allocation4 + $0xe88] sm:$0xff] }
0x1378   :  { %5064 = vmatmul.bf16.vlgmr.msrb.gmra.mxu1 %v4836_v57  ;;  %5102 = vmatmul.bf16.vlgmr.msra.gmra.mxu0 %v4838_v58  ;;  %v9649_v57 = vld [vmem:[#allocation4 + $0xe80] sm:$0xff]  ;;  %v9648_v58 = vld [vmem:[#allocation4 + $0xe78] sm:$0xff] }
0x137b   :  { %5425 = vmatpush.bf16.msrb.mxu2 %v9636_v54  ;;  %5438 = vmatpush.bf16.msrb.mxu0 %v9650_v56 }
0x137d   :  { %v4746_v59 = vpop.f32.mrf.mxu2  ;;  %v4766_v60 = vpop.f32.mrf.mxu3 }
0x137f   :  { %5439 = vmatpush.bf16.msrb.mxu0 %v9649_v57 }
0x1383   :  { %5440 = vmatpush.bf16.msrb.mxu0 %v9648_v58 }
0x1385   :  { %v4748_v61 = vpop.f32.mrf.mxu2  ;;  %v4768_v62 = vpop.f32.mrf.mxu3 }
0x1386   :  { %v4840_v63 = vpack.c.bf16 %v4748_v61, %v4746_v59  ;;  %v4842_v0 = vpack.c.bf16 %v4768_v62, %v4766_v60  ;;  %v9647_v59 = vld [vmem:[#allocation4 + $0xe70] sm:$0xff]  ;;  %v9646_v60 = vld [vmem:[#allocation4 + $0xe68] sm:$0xff]  ;;  %v9645_v62 = vld [vmem:[#allocation4 + $0xe60] sm:$0xff] }
0x1387   :  { %5441 = vmatpush.bf16.msrb.mxu0 %v9647_v59 }
0x1388   :  { %5069 = vmatmul.bf16.gmra.mxu1 %v4840_v63  ;;  %5107 = vmatmul.bf16.gmra.mxu0 %v4842_v0  ;;  %v9644_v63 = vld [vmem:[#allocation4 + $0xe58] sm:$0xff] }
0x138b   :  { %5442 = vmatpush.bf16.msrb.mxu0 %v9646_v60 }
0x138f   :  { %5443 = vmatpush.bf16.msrb.mxu0 %v9645_v62 }
0x1393   :  { %5444 = vmatpush.bf16.msrb.mxu0 %v9644_v63 }
0x13d5   :  { %v5046_v1 = vpop.f32.mrf.mxu0 }
0x13d6   :  { %v5047_v19 = vadd.f32 %v9777_v7, %v5046_v1 }
0x13db   :  { %v5084_v12 = vpop.f32.mrf.mxu2 }
0x13dd   :  { %v5048_v2 = vpop.f32.mrf.mxu0 }
0x13de   :  { %v5049_v16 = vadd.f32 %v9777_v7, %v5048_v2  ;;  %v9659_v2 = vld [vmem:[#allocation4 + $0xed0] sm:$0xff] }
0x13df   :  { %5456 = vmatpush.bf16.msra.mxu2 %v9659_v2  ;;  %v9661_v2 = vld [vmem:[#allocation4 + $0xee0] sm:$0xff] }
0x13e3   :  { %v5086_v4 = vpop.f32.mrf.mxu2 }
0x13e5   :  { %v5051_v3 = vpop.f32.mrf.mxu0 }
0x13e6   :  { %v5052_v11 = vadd.f32 %v9777_v7, %v5051_v3  ;;  %v9658_v3 = vld [vmem:[#allocation4 + $0xec8] sm:$0xff] }
0x13e7   :  { %5457 = vmatpush.bf16.msra.mxu2 %v9658_v3  ;;  %v9662_v3 = vld [vmem:[#allocation4 + $0xee8] sm:$0xff] }
0x13eb   :  { %v5089_v8 = vpop.f32.mrf.mxu2 }
0x13ed   :  { %v5053_v18 = vpop.f32.mrf.mxu0 }
0x13ee   :  { %v5054_v21 = vadd.f32 %v9777_v7, %v5053_v18 }
0x13f3   :  { %v5091_v27 = vpop.f32.mrf.mxu2 }
0x13f5   :  { %v5065_v13 = vpop.f32.mrf.mxu1  ;;  %v5103_v14 = vpop.f32.mrf.mxu0 }
0x13f6   :  { %v5066_v22 = vadd.f32 %v5065_v13, %v5047_v19  ;;  %v9656_v13 = vld [vmem:[#allocation4 + $0xeb8] sm:$0xff] }
0x13f8   :  { %v5085_v28 = vadd.f32 %v5084_v12, %v5066_v22  ;;  %v9657_v12 = vld [vmem:[#allocation4 + $0xec0] sm:$0xff] }
0x13f9   :  { %5458 = vmatpush.bf16.msra.mxu2 %v9657_v12  ;;  %v9673_v12 = vld [vmem:[#allocation4 + $0xf40] sm:$0xff] }
0x13fa   :  { %v10108_v39 = vadd.f32 %v5103_v14, %v5085_v28  ;;  %5780 = vmatpush.bf16.msrb.mxu3 %v9673_v12 }
0x13fc   :  { %v5113_v36 = vmax.f32 %v10108_v39, 0.0  ;;  %v9694_v39 = vld [vmem:[#allocation4 + $0xfe8] sm:$0xff] }
0x13fd   :  { %v5067_v5 = vpop.f32.mrf.mxu1  ;;  %v5105_v6 = vpop.f32.mrf.mxu0  ;;  %5459 = vmatpush.bf16.msra.mxu2 %v9656_v13  ;;  %v9672_v13 = vld [vmem:[#allocation4 + $0xf38] sm:$0xff] }
0x13fe   :  { %v5068_v20 = vadd.f32 %v5067_v5, %v5049_v16  ;;  %v9655_v5 = vld [vmem:[#allocation4 + $0xeb0] sm:$0xff]  ;;  %5781 = vmatpush.bf16.msrb.mxu3 %v9672_v13 }
0x1400   :  { %v5087_v25 = vadd.f32 %v5086_v4, %v5068_v20 }
0x1401   :  { %5460 = vmatpush.bf16.msra.mxu2 %v9655_v5  ;;  %v9664_v5 = vld [vmem:[#allocation4 + $0xef8] sm:$0xff] }
0x1402   :  { %v10104_v32 = vadd.f32 %v5105_v6, %v5087_v25  ;;  %v9654_v6 = vld [vmem:[#allocation4 + $0xea8] sm:$0xff] }
0x1404   :  { %v5114_v42 = vmax.f32 %v10104_v32, 0.0  ;;  %v9692_v32 = vld [vmem:[#allocation4 + $0xfd8] sm:$0xff] }
0x1405   :  { %v5070_v9 = vpop.f32.mrf.mxu1  ;;  %v5108_v15 = vpop.f32.mrf.mxu0  ;;  %5461 = vmatpush.bf16.msra.mxu2 %v9654_v6  ;;  %v9669_v6 = vld [vmem:[#allocation4 + $0xf20] sm:$0xff] }
0x1406   :  { %v5071_v17 = vadd.f32 %v5070_v9, %v5052_v11  ;;  %v5129_v43 = vpack.c.bf16 %v5114_v42, %v5113_v36  ;;  %v9652_v9 = vld [vmem:[#allocation4 + $0xe98] sm:$0xff] }
0x1408   :  { %v5090_v23 = vadd.f32 %v5089_v8, %v5071_v17  ;;  %v9653_v8 = vld [vmem:[#allocation4 + $0xea0] sm:$0xff] }
0x1409   :  { %5462 = vmatpush.bf16.msra.mxu2 %v9653_v8  ;;  %v9668_v8 = vld [vmem:[#allocation4 + $0xf18] sm:$0xff] }
0x140a   :  { %v10102_v29 = vadd.f32 %v5108_v15, %v5090_v23 }
0x140c   :  { %v5115_v33 = vmax.f32 %v10102_v29, 0.0  ;;  %v9691_v29 = vld [vmem:[#allocation4 + $0xfd0] sm:$0xff] }
0x140d   :  { %v5072_v24 = vpop.f32.mrf.mxu1  ;;  %v5110_v31 = vpop.f32.mrf.mxu0  ;;  %5463 = vmatpush.bf16.msra.mxu2 %v9652_v9  ;;  %v9689_v9 = vld [vmem:[#allocation4 + $0xfc0] sm:$0xff] }
0x140e   :  { %v5073_v26 = vadd.f32 %v5072_v24, %v5054_v21 }
0x1410   :  { %v5092_v30 = vadd.f32 %v5091_v27, %v5073_v26 }
0x1412   :  { %v10106_v35 = vadd.f32 %v5110_v31, %v5092_v30 }
0x1414   :  { %v5116_v37 = vmax.f32 %v10106_v35, 0.0  ;;  %v9693_v35 = vld [vmem:[#allocation4 + $0xfe0] sm:$0xff] }
0x1416   :  { %v5130_v34 = vpack.c.bf16 %v5116_v37, %v5115_v33 }
0x1418   :  { %5185 = vmatpush.bf16.msra.mxu1 %v5130_v34 }
0x141c   :  { %5186 = vmatpush.bf16.msra.mxu1 %v5129_v43 }
0x141f   :  { %8684 = vmatmul.msk.bf16.vlgmr.msra.gmra.mxu1 %vm599_vm1, %v9630_v45 }
0x1420   :  { %5818 = vmatpush.bf16.msrb.mxu1 %v9689_v9 }
0x142f   :  { %8685 = vmatmul.msk.bf16.gmra.mxu1 %vm599_vm1, %v9631_v44 }
0x143f   :  { %8686 = vmatmul.msk.bf16.gmra.mxu1 %vm599_vm1, %v9632_v46 }
0x144f   :  { %8687 = vmatmul.msk.bf16.gmra.mxu1 %vm599_vm1, %v9633_v47  ;;  %v9778_v47 = vld [vmem:[#allocation6 + $0x78] ss:$0 sm:$0xff] }
0x145f   :  { %8688 = vmatmul.msk.bf16.gmra.mxu1 %vm599_vm1, %v9634_v48 }
0x146f   :  { %8689 = vmatmul.msk.bf16.gmra.mxu1 %vm599_vm1, %v9635_v51 }
0x149c   :  { %v5188_v61 = vpop.f32.mrf.mxu1 }
0x14a4   :  { %v5190_v0 = vpop.f32.mrf.mxu1 }
0x14a5   :  { %v5266_v1 = vpack.c.bf16 %v5190_v0, %v5188_v61 }
0x14a7   :  { %5426 = vmatmul.bf16.vlgmr.msrb.gmra.mxu2 %v5266_v1  ;;  %v9660_v1 = vld [vmem:[#allocation4 + $0xed8] sm:$0xff] }
0x14ac   :  { %v5193_v18 = vpop.f32.mrf.mxu1 }
0x14b4   :  { %v5195_v14 = vpop.f32.mrf.mxu1 }
0x14b5   :  { %v5269_v4 = vpack.c.bf16 %v5195_v14, %v5193_v18  ;;  %v9663_v18 = vld [vmem:[#allocation4 + $0xef0] sm:$0xff] }
0x14b6   :  { %v9671_v14 = vld [vmem:[#allocation4 + $0xf30] sm:$0xff] }
0x14b7   :  { %5431 = vmatmul.bf16.gmra.mxu2 %v5269_v4  ;;  %5782 = vmatpush.bf16.msrb.mxu3 %v9671_v14  ;;  %v9670_v4 = vld [vmem:[#allocation4 + $0xf28] sm:$0xff] }
0x14bb   :  { %5783 = vmatpush.bf16.msrb.mxu3 %v9670_v4 }
0x14bc   :  { %v5198_v7 = vpop.f32.mrf.mxu1 }
0x14bf   :  { %5784 = vmatpush.bf16.msrb.mxu3 %v9669_v6  ;;  %v9779_v6 = vld [vmem:[#allocation6 + $0x80] ss:$0 sm:$0xff] }
0x14c3   :  { %5785 = vmatpush.bf16.msrb.mxu3 %v9668_v8 }
0x14c4   :  { %v5200_v11 = vpop.f32.mrf.mxu1 }
0x14c5   :  { %v5267_v15 = vpack.c.bf16 %v5200_v11, %v5198_v7  ;;  %v9665_v7 = vld [vmem:[#allocation4 + $0xf00] sm:$0xff]  ;;  %v9667_v11 = vld [vmem:[#allocation4 + $0xf10] sm:$0xff] }
0x14c7   :  { %5445 = vmatmul.bf16.vlgmr.msrb.gmra.mxu0 %v5267_v15  ;;  %5786 = vmatpush.bf16.msrb.mxu3 %v9667_v11  ;;  %v9666_v15 = vld [vmem:[#allocation4 + $0xf08] sm:$0xff] }
0x14cb   :  { %5787 = vmatpush.bf16.msrb.mxu3 %v9666_v15 }
0x14cc   :  { %v5203_v16 = vpop.f32.mrf.mxu1 }
0x14d4   :  { %v5205_v17 = vpop.f32.mrf.mxu1 }
0x14d5   :  { %v5270_v19 = vpack.c.bf16 %v5205_v17, %v5203_v16  ;;  %v9681_v16 = vld [vmem:[#allocation4 + $0xf80] sm:$0xff]  ;;  %v9680_v17 = vld [vmem:[#allocation4 + $0xf78] sm:$0xff] }
0x14d6   :  { %5799 = vmatpush.bf16.msrb.mxu2 %v9681_v16 }
0x14d7   :  { %5450 = vmatmul.bf16.gmra.mxu0 %v5270_v19  ;;  %v9688_v19 = vld [vmem:[#allocation4 + $0xfb8] sm:$0xff] }
0x14d8   :  { %5819 = vmatpush.bf16.msrb.mxu1 %v9688_v19 }
0x14da   :  { %5800 = vmatpush.bf16.msrb.mxu2 %v9680_v17 }
0x14dc   :  { %v5208_v20 = vpop.f32.mrf.mxu1 }
0x14e4   :  { %v5210_v21 = vpop.f32.mrf.mxu1 }
0x14e5   :  { %v5268_v22 = vpack.c.bf16 %v5210_v21, %v5208_v20  ;;  %v9679_v20 = vld [vmem:[#allocation4 + $0xf70] sm:$0xff]  ;;  %v9678_v21 = vld [vmem:[#allocation4 + $0xf68] sm:$0xff] }
0x14e6   :  { %5801 = vmatpush.bf16.msrb.mxu2 %v9679_v20 }
0x14e7   :  { %5464 = vmatmul.bf16.vlgmr.msra.gmra.mxu2 %v5268_v22  ;;  %v9687_v22 = vld [vmem:[#allocation4 + $0xfb0] sm:$0xff] }
0x14e8   :  { %5820 = vmatpush.bf16.msrb.mxu1 %v9687_v22 }
0x14ea   :  { %5802 = vmatpush.bf16.msrb.mxu2 %v9678_v21 }
0x14ec   :  { %v5213_v23 = vpop.f32.mrf.mxu1 }
0x14f4   :  { %v5215_v24 = vpop.f32.mrf.mxu1 }
0x14f5   :  { %v5271_v25 = vpack.c.bf16 %v5215_v24, %v5213_v23  ;;  %v9677_v23 = vld [vmem:[#allocation4 + $0xf60] sm:$0xff]  ;;  %v9686_v24 = vld [vmem:[#allocation4 + $0xfa8] sm:$0xff] }
0x14f6   :  { %5803 = vmatpush.bf16.msrb.mxu2 %v9677_v23  ;;  %5821 = vmatpush.bf16.msrb.mxu1 %v9686_v24 }
0x14f7   :  { %5469 = vmatmul.bf16.gmra.mxu2 %v5271_v25  ;;  %v9676_v25 = vld [vmem:[#allocation4 + $0xf58] sm:$0xff] }
0x14fa   :  { %5804 = vmatpush.bf16.msrb.mxu2 %v9676_v25 }
0x152a   :  { %v5427_v26 = vpop.f32.mrf.mxu2 }
0x152b   :  { %v5428_v50 = vadd.f32 %v9778_v47, %v5427_v26 }
0x1532   :  { %v5429_v27 = vpop.f32.mrf.mxu2 }
0x1533   :  { %v5430_v40 = vadd.f32 %v9778_v47, %v5429_v27  ;;  %v9685_v27 = vld [vmem:[#allocation4 + $0xfa0] sm:$0xff] }
0x1534   :  { %5822 = vmatpush.bf16.msrb.mxu1 %v9685_v27 }
0x153a   :  { %v5432_v28 = vpop.f32.mrf.mxu2 }
0x153b   :  { %v5433_v49 = vadd.f32 %v9778_v47, %v5432_v28  ;;  %v9675_v28 = vld [vmem:[#allocation4 + $0xf50] sm:$0xff] }
0x153c   :  { %5805 = vmatpush.bf16.msrb.mxu2 %v9675_v28 }
0x1542   :  { %v5434_v31 = vpop.f32.mrf.mxu2 }
0x1543   :  { %v5435_v41 = vadd.f32 %v9778_v47, %v5434_v31  ;;  %v9674_v31 = vld [vmem:[#allocation4 + $0xf48] sm:$0xff] }
0x1544   :  { %v5446_v30 = vpop.f32.mrf.mxu0  ;;  %5806 = vmatpush.bf16.msrb.mxu2 %v9674_v31 }
0x1545   :  { %v5447_v55 = vadd.f32 %v5446_v30, %v5428_v50  ;;  %v9684_v30 = vld [vmem:[#allocation4 + $0xf98] sm:$0xff]  ;;  %v9717_v50 = vld [vmem:[#allocation4 + $0x10a0] sm:$0xff] }
0x1546   :  { %5823 = vmatpush.bf16.msrb.mxu1 %v9684_v30 }
0x154c   :  { %v5448_v34 = vpop.f32.mrf.mxu0 }
0x154d   :  { %v5449_v51 = vadd.f32 %v5448_v34, %v5430_v40 }
0x1554   :  { %v5451_v44 = vpop.f32.mrf.mxu0 }
0x1555   :  { %v5452_v48 = vadd.f32 %v5451_v44, %v5433_v49  ;;  %v9682_v44 = vld [vmem:[#allocation4 + $0xf88] sm:$0xff]  ;;  %v9720_v49 = vld [vmem:[#allocation4 + $0x10b8] sm:$0xff] }
0x155c   :  { %v5453_v38 = vpop.f32.mrf.mxu0 }
0x155d   :  { %v5454_v52 = vadd.f32 %v5453_v38, %v5435_v41  ;;  %v9719_v38 = vld [vmem:[#allocation4 + $0x10b0] sm:$0xff] }
0x156a   :  { %v5465_v43 = vpop.f32.mrf.mxu2 }
0x156b   :  { %v5466_v58 = vadd.f32 %v5465_v43, %v5447_v55  ;;  %v9683_v43 = vld [vmem:[#allocation4 + $0xf90] sm:$0xff] }
0x156c   :  { %5824 = vmatpush.bf16.msrb.mxu1 %v9683_v43 }
0x156d   :  { %v5475_v63 = vmax.f32 %v5466_v58, 0.0 }
0x1570   :  { %5825 = vmatpush.bf16.msrb.mxu1 %v9682_v44 }
0x1572   :  { %v5467_v45 = vpop.f32.mrf.mxu2 }
0x1573   :  { %v5468_v56 = vadd.f32 %v5467_v45, %v5449_v51 }
0x1575   :  { %v5476_v61 = vmax.f32 %v5468_v56, 0.0  ;;  %v9714_v56 = vld [vmem:[#allocation4 + $0x1088] sm:$0xff] }
0x1577   :  { %v5491_v0 = vpack.c.bf16 %v5476_v61, %v5475_v63 }
0x157a   :  { %v5470_v46 = vpop.f32.mrf.mxu2 }
0x157b   :  { %v5471_v53 = vadd.f32 %v5470_v46, %v5452_v48  ;;  %v9721_v46 = vld [vmem:[#allocation4 + $0x10c0] sm:$0xff]  ;;  %v9718_v48 = vld [vmem:[#allocation4 + $0x10a8] sm:$0xff] }
0x157c   :  { %6399 = vmatpush.bf16.msra.mxu1 %v9721_v46 }
0x157d   :  { %v5477_v59 = vmax.f32 %v5471_v53, 0.0  ;;  %v9715_v53 = vld [vmem:[#allocation4 + $0x1090] sm:$0xff] }
0x1580   :  { %6400 = vmatpush.bf16.msra.mxu1 %v9720_v49  ;;  %v9690_v49 = vld [vmem:[#allocation4 + $0xfc8] sm:$0xff] }
0x1582   :  { %v5472_v54 = vpop.f32.mrf.mxu2 }
0x1583   :  { %v5473_v57 = vadd.f32 %v5472_v54, %v5454_v52  ;;  %v9716_v52 = vld [vmem:[#allocation4 + $0x1098] sm:$0xff] }
0x1584   :  { %6401 = vmatpush.bf16.msra.mxu1 %v9719_v38  ;;  %v9710_v38 = vld [vmem:[#allocation4 + $0x1068] sm:$0xff] }
0x1585   :  { %v5478_v60 = vmax.f32 %v5473_v57, 0.0 }
0x1587   :  { %v5492_v62 = vpack.c.bf16 %v5478_v60, %v5477_v59 }
0x1588   :  { %6402 = vmatpush.bf16.msra.mxu1 %v9718_v48  ;;  %v9708_v48 = vld [vmem:[#allocation4 + $0x1058] sm:$0xff] }
0x1589   :  { %5547 = vmatpush.bf16.msra.mxu0 %v5492_v62 }
0x158c   :  { %6403 = vmatpush.bf16.msra.mxu1 %v9717_v50  ;;  %v9707_v50 = vld [vmem:[#allocation4 + $0x1050] sm:$0xff] }
0x158d   :  { %5548 = vmatpush.bf16.msra.mxu0 %v5491_v0 }
0x1590   :  { %8810 = vmatmul.msk.bf16.vlgmr.msra.gmra.mxu0 %vm599_vm1, %v9660_v1  ;;  %6404 = vmatpush.bf16.msra.mxu1 %v9716_v52  ;;  %v9697_v52 = vld [vmem:[#allocation4 + $0x1000] sm:$0xff] }
0x1594   :  { %6405 = vmatpush.bf16.msra.mxu1 %v9715_v53  ;;  %v9698_v53 = vld [vmem:[#allocation4 + $0x1008] sm:$0xff] }
0x1598   :  { %6406 = vmatpush.bf16.msra.mxu1 %v9714_v56 }
0x15a0   :  { %8811 = vmatmul.msk.bf16.gmra.mxu0 %vm599_vm1, %v9661_v2 }
0x15b0   :  { %8812 = vmatmul.msk.bf16.gmra.mxu0 %vm599_vm1, %v9662_v3 }
0x15c0   :  { %8813 = vmatmul.msk.bf16.gmra.mxu0 %vm599_vm1, %v9663_v18 }
0x15d0   :  { %8814 = vmatmul.msk.bf16.gmra.mxu0 %vm599_vm1, %v9664_v5 }
0x15e0   :  { %8815 = vmatmul.msk.bf16.gmra.mxu0 %vm599_vm1, %v9665_v7 }
0x160d   :  { %v5550_v26 = vpop.f32.mrf.mxu0 }
0x1615   :  { %v5552_v34 = vpop.f32.mrf.mxu0 }
0x1616   :  { %v5628_v45 = vpack.c.bf16 %v5552_v34, %v5550_v26 }
0x1618   :  { %5788 = vmatmul.bf16.vlgmr.msrb.gmra.mxu3 %v5628_v45 }
0x161d   :  { %v5555_v47 = vpop.f32.mrf.mxu0 }
0x1625   :  { %v5557_v40 = vpop.f32.mrf.mxu0 }
0x1626   :  { %v5631_v41 = vpack.c.bf16 %v5557_v40, %v5555_v47  ;;  %v9696_v40 = vld [vmem:[#allocation4 + $0xff8] sm:$0xff] }
0x1628   :  { %5793 = vmatmul.bf16.gmra.mxu3 %v5631_v41  ;;  %v9709_v41 = vld [vmem:[#allocation4 + $0x1060] sm:$0xff] }
0x162d   :  { %v5560_v51 = vpop.f32.mrf.mxu0 }
0x1635   :  { %v5562_v54 = vpop.f32.mrf.mxu0 }
0x1636   :  { %v5629_v55 = vpack.c.bf16 %v5562_v54, %v5560_v51  ;;  %v9706_v51 = vld [vmem:[#allocation4 + $0x1048] sm:$0xff] }
0x1638   :  { %5807 = vmatmul.bf16.vlgmr.msrb.gmra.mxu2 %v5629_v55 }
0x163d   :  { %v5565_v57 = vpop.f32.mrf.mxu0 }
0x1645   :  { %v5567_v58 = vpop.f32.mrf.mxu0 }
0x1646   :  { %v5632_v59 = vpack.c.bf16 %v5567_v58, %v5565_v57  ;;  %v9699_v57 = vld [vmem:[#allocation4 + $0x1010] sm:$0xff] }
0x1648   :  { %5812 = vmatmul.bf16.gmra.mxu2 %v5632_v59 }
0x164d   :  { %v5570_v60 = vpop.f32.mrf.mxu0 }
0x1655   :  { %v5572_v61 = vpop.f32.mrf.mxu0 }
0x1656   :  { %v5630_v62 = vpack.c.bf16 %v5572_v61, %v5570_v60  ;;  %v9700_v61 = vld [vmem:[#allocation4 + $0x1018] sm:$0xff] }
0x1658   :  { %5826 = vmatmul.bf16.vlgmr.msrb.gmra.mxu1 %v5630_v62 }
0x1659   :  { %6693 = vmatpush.bf16.msrb.mxu1 %v10067_v10 }
0x165d   :  { %v5575_v63 = vpop.f32.mrf.mxu0 }
0x1665   :  { %v5577_v0 = vpop.f32.mrf.mxu0 }
0x1666   :  { %v5633_v1 = vpack.c.bf16 %v5577_v0, %v5575_v63 }
0x1668   :  { %5831 = vmatmul.bf16.gmra.mxu1 %v5633_v1  ;;  %v9701_v1 = vld [vmem:[#allocation4 + $0x1020] sm:$0xff] }
0x169b   :  { %v5789_v2 = vpop.f32.mrf.mxu3 }
0x169c   :  { %v5790_v10 = vadd.f32 %v9779_v6, %v5789_v2 }
0x16a3   :  { %v5791_v18 = vpop.f32.mrf.mxu3 }
0x16a4   :  { %v5792_v11 = vadd.f32 %v9779_v6, %v5791_v18 }
0x16ab   :  { %v5794_v14 = vpop.f32.mrf.mxu3 }
0x16ac   :  { %v5795_v8 = vadd.f32 %v9779_v6, %v5794_v14 }
0x16b3   :  { %v5796_v9 = vpop.f32.mrf.mxu3 }
0x16b4   :  { %v5797_v17 = vadd.f32 %v9779_v6, %v5796_v9  ;;  %v9729_v6 = vld [vmem:[#allocation4 + $0x1100] sm:$0xff]  ;;  %v9727_v9 = vld [vmem:[#allocation4 + $0x10f0] sm:$0xff] }
0x16b5   :  { %6428 = vmatpush.bf16.msrb.mxu0 %v9729_v6  ;;  %v9742_v6 = vld [vmem:[#allocation4 + $0x1168] sm:$0xff] }
0x16bb   :  { %v5808_v3 = vpop.f32.mrf.mxu2 }
0x16bc   :  { %v5809_v21 = vadd.f32 %v5808_v3, %v5790_v10  ;;  %v9704_v10 = vld [vmem:[#allocation4 + $0x1038] sm:$0xff] }
0x16c3   :  { %v5810_v12 = vpop.f32.mrf.mxu2 }
0x16c4   :  { %v5811_v19 = vadd.f32 %v5810_v12, %v5792_v11  ;;  %v9702_v12 = vld [vmem:[#allocation4 + $0x1028] sm:$0xff] }
0x16c5   :  { %v9726_v11 = vld [vmem:[#allocation4 + $0x10e8] sm:$0xff] }
0x16cb   :  { %v5813_v5 = vpop.f32.mrf.mxu2 }
0x16cc   :  { %v5814_v15 = vadd.f32 %v5813_v5, %v5795_v8  ;;  %v9703_v5 = vld [vmem:[#allocation4 + $0x1030] sm:$0xff] }
0x16d3   :  { %v5815_v16 = vpop.f32.mrf.mxu2 }
0x16d4   :  { %v5816_v22 = vadd.f32 %v5815_v16, %v5797_v17  ;;  %v9725_v17 = vld [vmem:[#allocation4 + $0x10e0] sm:$0xff] }
0x16d5   :  { %v5827_v13 = vpop.f32.mrf.mxu1 }
0x16d6   :  { %v5828_v25 = vadd.f32 %v5827_v13, %v5809_v21  ;;  %v9723_v21 = vld [vmem:[#allocation4 + $0x10d0] sm:$0xff] }
0x16d8   :  { %v5837_v31 = vadd.f32 %v5828_v25, %v5113_v36  ;;  %v9711_v36 = vld [vmem:[#allocation4 + $0x1070] sm:$0xff]  ;;  %v9705_v25 = vld [vmem:[#allocation4 + $0x1040] sm:$0xff] }
0x16da   :  { %v5841_v46 = vmax.f32 %v5837_v31, 0.0  ;;  %v9738_v31 = vld [vmem:[#allocation4 + $0x1148] sm:$0xff] }
0x16dd   :  { %v5829_v4 = vpop.f32.mrf.mxu1 }
0x16de   :  { %v5830_v23 = vadd.f32 %v5829_v4, %v5811_v19  ;;  %v9724_v19 = vld [vmem:[#allocation4 + $0x10d8] sm:$0xff] }
0x16e0   :  { %v5838_v28 = vadd.f32 %v5830_v23, %v5114_v42  ;;  %v9712_v42 = vld [vmem:[#allocation4 + $0x1078] sm:$0xff] }
0x16e2   :  { %v5842_v45 = vmax.f32 %v5838_v28, 0.0 }
0x16e4   :  { %v5877_v47 = vpack.c.bf16 %v5842_v45, %v5841_v46  ;;  %v9737_v45 = vld [vmem:[#allocation4 + $0x1140] sm:$0xff] }
0x16e5   :  { %v5832_v7 = vpop.f32.mrf.mxu1 }
0x16e6   :  { %v5833_v20 = vadd.f32 %v5832_v7, %v5814_v15  ;;  %v9728_v7 = vld [vmem:[#allocation4 + $0x10f8] sm:$0xff] }
0x16e7   :  { %6429 = vmatpush.bf16.msrb.mxu0 %v9728_v7 }
0x16e8   :  { %v5839_v26 = vadd.f32 %v5833_v20, %v5115_v33  ;;  %v9695_v33 = vld [vmem:[#allocation4 + $0xff0] sm:$0xff] }
0x16ea   :  { %v5843_v34 = vmax.f32 %v5839_v26, 0.0 }
0x16eb   :  { %6430 = vmatpush.bf16.msrb.mxu0 %v9727_v9 }
0x16ed   :  { %v5834_v24 = vpop.f32.mrf.mxu1 }
0x16ee   :  { %v5835_v27 = vadd.f32 %v5834_v24, %v5816_v22  ;;  %v9722_v22 = vld [vmem:[#allocation4 + $0x10c8] sm:$0xff] }
0x16ef   :  { %6431 = vmatpush.bf16.msrb.mxu0 %v9726_v11 }
0x16f0   :  { %v5840_v30 = vadd.f32 %v5835_v27, %v5116_v37  ;;  %v9713_v37 = vld [vmem:[#allocation4 + $0x1080] sm:$0xff] }
0x16f1   :  { %6370 = vmatpush.bf16.msra.mxu2 %v9713_v37 }
0x16f2   :  { %v5844_v43 = vmax.f32 %v5840_v30, 0.0 }
0x16f3   :  { %6432 = vmatpush.bf16.msrb.mxu0 %v9725_v17 }
0x16f4   :  { %v5878_v44 = vpack.c.bf16 %v5844_v43, %v5843_v34 }
0x16f5   :  { %6371 = vmatpush.bf16.msra.mxu2 %v9712_v42  ;;  %v9731_v42 = vld [vmem:[#allocation4 + $0x1110] sm:$0xff] }
0x16f6   :  { %6013 = vmatpush.bf16.msra.mxu3 %v5878_v44  ;;  %v9736_v44 = vld [vmem:[#allocation4 + $0x1138] sm:$0xff] }
0x16f7   :  { %6433 = vmatpush.bf16.msrb.mxu0 %v9724_v19 }
0x16f9   :  { %6372 = vmatpush.bf16.msra.mxu2 %v9711_v36  ;;  %v9740_v36 = vld [vmem:[#allocation4 + $0x1158] sm:$0xff] }
0x16fa   :  { %6014 = vmatpush.bf16.msra.mxu3 %v5877_v47  ;;  %v9735_v47 = vld [vmem:[#allocation4 + $0x1130] sm:$0xff] }
0x16fb   :  { %6434 = vmatpush.bf16.msrb.mxu0 %v9723_v21 }
0x16fd   :  { %8976 = vmatmul.msk.bf16.vlgmr.msra.gmra.mxu3 %vm599_vm1, %v9690_v49  ;;  %6373 = vmatpush.bf16.msra.mxu2 %v9710_v38  ;;  %v9739_v49 = vld [vmem:[#allocation4 + $0x1150] sm:$0xff]  ;;  %v9730_v38 = vld [vmem:[#allocation4 + $0x1108] sm:$0xff] }
0x16ff   :  { %6435 = vmatpush.bf16.msrb.mxu0 %v9722_v22 }
0x1701   :  { %6374 = vmatpush.bf16.msra.mxu2 %v9709_v41 }
0x1705   :  { %6375 = vmatpush.bf16.msra.mxu2 %v9708_v48 }
0x1709   :  { %6376 = vmatpush.bf16.msra.mxu2 %v9707_v50  ;;  %v9741_v50 = vld [vmem:[#allocation4 + $0x1160] sm:$0xff] }
0x170d   :  { %8977 = vmatmul.msk.bf16.gmra.mxu3 %vm599_vm1, %v9691_v29  ;;  %6377 = vmatpush.bf16.msra.mxu2 %v9706_v51  ;;  %v9734_v29 = vld [vmem:[#allocation4 + $0x1128] sm:$0xff] }
0x1711   :  { %6457 = vmatpush.bf16.msrb.mxu2 %v9737_v45 }
0x1715   :  { %6458 = vmatpush.bf16.msrb.mxu2 %v9736_v44 }
0x1719   :  { %6459 = vmatpush.bf16.msrb.mxu2 %v9735_v47 }
0x171d   :  { %8978 = vmatmul.msk.bf16.gmra.mxu3 %vm599_vm1, %v9692_v32  ;;  %6460 = vmatpush.bf16.msrb.mxu2 %v9734_v29 }
0x172d   :  { %8979 = vmatmul.msk.bf16.gmra.mxu3 %vm599_vm1, %v9693_v35 }
0x173d   :  { %8980 = vmatmul.msk.bf16.gmra.mxu3 %vm599_vm1, %v9694_v39  ;;  %v9733_v39 = vld [vmem:[#allocation4 + $0x1120] sm:$0xff] }
0x173e   :  { %6461 = vmatpush.bf16.msrb.mxu2 %v9733_v39 }
0x174d   :  { %8981 = vmatmul.msk.bf16.gmra.mxu3 %vm599_vm1, %v9695_v33  ;;  %v9732_v33 = vld [vmem:[#allocation4 + $0x1118] sm:$0xff] }
0x174e   :  { %6462 = vmatpush.bf16.msrb.mxu2 %v9732_v33 }
0x1752   :  { %6463 = vmatpush.bf16.msrb.mxu2 %v9731_v42 }
0x1756   :  { %6464 = vmatpush.bf16.msrb.mxu2 %v9730_v38 }
0x175d   :  { %8982 = vmatmul.msk.bf16.gmra.mxu3 %vm599_vm1, %v9696_v40 }
0x176d   :  { %8983 = vmatmul.msk.bf16.gmra.mxu3 %vm599_vm1, %v9697_v52 }
0x177d   :  { %8984 = vmatmul.msk.bf16.gmra.mxu3 %vm599_vm1, %v9698_v53 }
0x1780   :  { %v6016_v54 = vpop.f32.mrf.mxu3 }
0x1788   :  { %v6018_v55 = vpop.f32.mrf.mxu3 }
0x1789   :  { %v6160_v56 = vpack.c.bf16 %v6018_v55, %v6016_v54 }
0x178b   :  { %6378 = vmatmul.bf16.vlgmr.msra.gmra.mxu2 %v6160_v56 }
0x178d   :  { %8985 = vmatmul.msk.bf16.gmra.mxu3 %vm599_vm1, %v9699_v57  ;;  %v9749_v57 = vld [vmem:[#allocation4 + $0x11a0] sm:$0xff] }
0x178e   :  { %6785 = vmatpush.bf16.msra.mxu0 %v9749_v57 }
0x1790   :  { %v6021_v58 = vpop.f32.mrf.mxu3 }
0x1798   :  { %v6023_v59 = vpop.f32.mrf.mxu3 }
0x1799   :  { %v6164_v60 = vpack.c.bf16 %v6023_v59, %v6021_v58 }
0x179b   :  { %6383 = vmatmul.bf16.gmra.mxu2 %v6164_v60  ;;  %v9748_v60 = vld [vmem:[#allocation4 + $0x1198] sm:$0xff] }
0x179c   :  { %6786 = vmatpush.bf16.msra.mxu0 %v9748_v60 }
0x179d   :  { %8986 = vmatmul.msk.bf16.gmra.mxu3 %vm599_vm1, %v9700_v61 }
0x17a0   :  { %v6026_v62 = vpop.f32.mrf.mxu3 }
0x17a8   :  { %v6028_v63 = vpop.f32.mrf.mxu3 }
0x17a9   :  { %v6168_v0 = vpack.c.bf16 %v6028_v63, %v6026_v62 }
0x17ab   :  { %6388 = vmatmul.bf16.gmra.mxu2 %v6168_v0  ;;  %v9747_v0 = vld [vmem:[#allocation4 + $0x1190] sm:$0xff] }
0x17ac   :  { %6787 = vmatpush.bf16.msra.mxu0 %v9747_v0 }
0x17ad   :  { %8987 = vmatmul.msk.bf16.gmra.mxu3 %vm599_vm1, %v9701_v1  ;;  %v9746_v1 = vld [vmem:[#allocation4 + $0x1188] sm:$0xff] }
0x17b0   :  { %v6031_v2 = vpop.f32.mrf.mxu3  ;;  %6788 = vmatpush.bf16.msra.mxu0 %v9746_v1 }
0x17b8   :  { %v6033_v3 = vpop.f32.mrf.mxu3 }
0x17b9   :  { %v6172_v18 = vpack.c.bf16 %v6033_v3, %v6031_v2 }
0x17bb   :  { %6393 = vmatmul.bf16.gmra.mxu2 %v6172_v18  ;;  %v9745_v18 = vld [vmem:[#allocation4 + $0x1180] sm:$0xff] }
0x17bc   :  { %6789 = vmatpush.bf16.msra.mxu0 %v9745_v18 }
0x17bd   :  { %8988 = vmatmul.msk.bf16.gmra.mxu3 %vm599_vm1, %v9702_v12  ;;  %v9744_v12 = vld [vmem:[#allocation4 + $0x1178] sm:$0xff] }
0x17c0   :  { %v6036_v13 = vpop.f32.mrf.mxu3  ;;  %6790 = vmatpush.bf16.msra.mxu0 %v9744_v12 }
0x17c8   :  { %v6038_v14 = vpop.f32.mrf.mxu3 }
0x17c9   :  { %v6161_v4 = vpack.c.bf16 %v6038_v14, %v6036_v13 }
0x17cb   :  { %6407 = vmatmul.bf16.vlgmr.msra.gmra.mxu1 %v6161_v4 }
0x17cd   :  { %8989 = vmatmul.msk.bf16.gmra.mxu3 %vm599_vm1, %v9703_v5  ;;  %v9743_v5 = vld [vmem:[#allocation4 + $0x1170] sm:$0xff] }
0x17ce   :  { %6791 = vmatpush.bf16.msra.mxu0 %v9743_v5 }
0x17d0   :  { %v6041_v8 = vpop.f32.mrf.mxu3 }
0x17d2   :  { %6792 = vmatpush.bf16.msra.mxu0 %v9742_v6 }
0x17d8   :  { %v6043_v15 = vpop.f32.mrf.mxu3 }
0x17d9   :  { %v6165_v16 = vpack.c.bf16 %v6043_v15, %v6041_v8 }
0x17db   :  { %6412 = vmatmul.bf16.gmra.mxu1 %v6165_v16 }
0x17dd   :  { %8990 = vmatmul.msk.bf16.gmra.mxu3 %vm599_vm1, %v9704_v10 }
0x17e0   :  { %v6046_v20 = vpop.f32.mrf.mxu3 }
0x17e8   :  { %v6048_v23 = vpop.f32.mrf.mxu3 }
0x17e9   :  { %v6169_v24 = vpack.c.bf16 %v6048_v23, %v6046_v20 }
0x17eb   :  { %6417 = vmatmul.bf16.gmra.mxu1 %v6169_v24 }
0x17ed   :  { %8991 = vmatmul.msk.bf16.gmra.mxu3 %vm599_vm1, %v9705_v25 }
0x17f0   :  { %v6051_v26 = vpop.f32.mrf.mxu3 }
0x17f8   :  { %v6053_v27 = vpop.f32.mrf.mxu3 }
0x17f9   :  { %v6173_v28 = vpack.c.bf16 %v6053_v27, %v6051_v26 }
0x17fb   :  { %6422 = vmatmul.bf16.gmra.mxu1 %v6173_v28 }
0x1800   :  { %v6056_v30 = vpop.f32.mrf.mxu3 }
0x1808   :  { %v6058_v34 = vpop.f32.mrf.mxu3 }
0x1809   :  { %v6162_v43 = vpack.c.bf16 %v6058_v34, %v6056_v30 }
0x180b   :  { %6436 = vmatmul.bf16.vlgmr.msrb.gmra.mxu0 %v6162_v43  ;;  %9144 = vmatmul.msk.bf16.vlgmr.msrb.gmra.mxu1 %vm2637_vm4, %v9738_v31 }
0x180e   :  { %v6379_v16 = vpop.f32.mrf.mxu2 }
0x1810   :  { %v6061_v46 = vpop.f32.mrf.mxu3 }
0x1816   :  { %v6381_v19 = vpop.f32.mrf.mxu2 }
0x1818   :  { %v6063_v32 = vpop.f32.mrf.mxu3 }
0x1819   :  { %v6166_v35 = vpack.c.bf16 %v6063_v32, %v6061_v46 }
0x181b   :  { %6441 = vmatmul.bf16.gmra.mxu0 %v6166_v35  ;;  %9145 = vmatmul.msk.bf16.gmra.mxu1 %vm2637_vm4, %v9739_v49  ;;  %v10183_v49 = vld [vmem:[#allocation6 + $0x88] ss:$0 sm:$0xff] }
0x181c   :  { %v6380_v35 = vadd.f32 %v10183_v49, %v6379_v16  ;;  %v6382_v38 = vadd.f32 %v10183_v49, %v6381_v19 }
0x181e   :  { %v6384_v22 = vpop.f32.mrf.mxu2 }
0x1820   :  { %v6066_v37 = vpop.f32.mrf.mxu3 }
0x1826   :  { %v6386_v24 = vpop.f32.mrf.mxu2 }
0x1828   :  { %v6068_v40 = vpop.f32.mrf.mxu3 }
0x1829   :  { %v6170_v41 = vpack.c.bf16 %v6068_v40, %v6066_v37 }
0x182b   :  { %6446 = vmatmul.bf16.gmra.mxu0 %v6170_v41  ;;  %9146 = vmatmul.msk.bf16.gmra.mxu1 %vm2637_vm4, %v9740_v36 }
0x182e   :  { %v6389_v27 = vpop.f32.mrf.mxu2 }
0x182f   :  { %v6390_v16 = vadd.f32 %v10183_v49, %v6389_v27 }
0x1830   :  { %v6071_v48 = vpop.f32.mrf.mxu3 }
0x1836   :  { %v10179_v34 = vpop.f32.mrf.mxu2 }
0x1838   :  { %v6073_v51 = vpop.f32.mrf.mxu3 }
0x1839   :  { %v6174_v52 = vpack.c.bf16 %v6073_v51, %v6071_v48 }
0x183b   :  { %6451 = vmatmul.bf16.gmra.mxu0 %v6174_v52  ;;  %9147 = vmatmul.msk.bf16.gmra.mxu1 %vm2637_vm4, %v9741_v50 }
0x183e   :  { %v10181_v45 = vpop.f32.mrf.mxu2 }
0x1840   :  { %v6076_v53 = vpop.f32.mrf.mxu3 }
0x1846   :  { %v10185_v29 = vpop.f32.mrf.mxu2 }
0x1848   :  { %v6078_v54 = vpop.f32.mrf.mxu3  ;;  %v10163_v55 = vpop.f32.mrf.mxu1 }
0x1849   :  { %v6163_v56 = vpack.c.bf16 %v6078_v54, %v6076_v53  ;;  %v6409_v39 = vadd.f32 %v10163_v55, %v6380_v35  ;;  %v6385_v53 = vadd.f32 %v10183_v49, %v6384_v22 }
0x184b   :  { %6465 = vmatmul.bf16.vlgmr.msrb.gmra.mxu2 %v6163_v56 }
0x1850   :  { %v6081_v58 = vpop.f32.mrf.mxu3  ;;  %v10165_v59 = vpop.f32.mrf.mxu1 }
0x1851   :  { %v6411_v41 = vadd.f32 %v10165_v59, %v6382_v38  ;;  %v6387_v59 = vadd.f32 %v10183_v49, %v6386_v24 }
0x1858   :  { %v6083_v61 = vpop.f32.mrf.mxu3  ;;  %v10167_v62 = vpop.f32.mrf.mxu1 }
0x1859   :  { %v6167_v63 = vpack.c.bf16 %v6083_v61, %v6081_v58  ;;  %v6414_v55 = vadd.f32 %v10167_v62, %v6385_v53 }
0x185b   :  { %6470 = vmatmul.bf16.gmra.mxu2 %v6167_v63 }
0x1860   :  { %v6086_v2 = vpop.f32.mrf.mxu3  ;;  %v10169_v3 = vpop.f32.mrf.mxu1 }
0x1861   :  { %v6416_v18 = vadd.f32 %v10169_v3, %v6387_v59 }
0x1868   :  { %v6088_v13 = vpop.f32.mrf.mxu3  ;;  %v10171_v14 = vpop.f32.mrf.mxu1 }
0x1869   :  { %v6171_v4 = vpack.c.bf16 %v6088_v13, %v6086_v2  ;;  %v6419_v3 = vadd.f32 %v10171_v14, %v6390_v16 }
0x186b   :  { %6475 = vmatmul.bf16.gmra.mxu2 %v6171_v4 }
0x1870   :  { %v6091_v7 = vpop.f32.mrf.mxu3  ;;  %v10173_v8 = vpop.f32.mrf.mxu1 }
0x1878   :  { %v6093_v9 = vpop.f32.mrf.mxu3  ;;  %v10175_v11 = vpop.f32.mrf.mxu1 }
0x1879   :  { %v6175_v15 = vpack.c.bf16 %v6093_v9, %v6091_v7 }
0x187b   :  { %6480 = vmatmul.bf16.gmra.mxu2 %v6175_v15 }
0x1880   :  { %v10177_v10 = vpop.f32.mrf.mxu1 }
0x1888   :  { %v6695_v17 = vpop.f32.mrf.mxu1  ;;  %v6437_v44 = vpop.f32.mrf.mxu0 }
0x1889   :  { %v6438_v33 = vadd.f32 %v6437_v44, %v6409_v39 }
0x1890   :  { %v6697_v20 = vpop.f32.mrf.mxu1  ;;  %v6439_v32 = vpop.f32.mrf.mxu0 }
0x1891   :  { %v6731_v21 = vpack.c.bf16 %v6697_v20, %v6695_v17  ;;  %v6440_v48 = vadd.f32 %v6439_v32, %v6411_v41 }
0x1893   :  { %6793 = vmatmul.bf16.vlgmr.msra.gmra.mxu0 %v6731_v21 }
0x1898   :  { %v6700_v23 = vpop.f32.mrf.mxu1  ;;  %v6442_v36 = vpop.f32.mrf.mxu0 }
0x1899   :  { %v6443_v58 = vadd.f32 %v6442_v36, %v6414_v55 }
0x18a0   :  { %v6702_v25 = vpop.f32.mrf.mxu1  ;;  %v6444_v56 = vpop.f32.mrf.mxu0 }
0x18a1   :  { %v6732_v26 = vpack.c.bf16 %v6702_v25, %v6700_v23  ;;  %v6445_v4 = vadd.f32 %v6444_v56, %v6416_v18 }
0x18a3   :  { %6798 = vmatmul.bf16.gmra.mxu0 %v6732_v26 }
0x18a8   :  { %v6705_v28 = vpop.f32.mrf.mxu1  ;;  %v6447_v13 = vpop.f32.mrf.mxu0 }
0x18b0   :  { %v6707_v30 = vpop.f32.mrf.mxu1 }
0x18b1   :  { %v6733_v31 = vpack.c.bf16 %v6707_v30, %v6705_v28  ;;  %v6448_v28 = vadd.f32 %v6447_v13, %v6419_v3  ;;  %v6449_v30 = vpop.f32.mrf.mxu0 }
0x18b3   :  { %6803 = vmatmul.bf16.gmra.mxu0 %v6733_v31 }
0x18b8   :  { %v6710_v43 = vpop.f32.mrf.mxu1 }
0x18b9   :  { %v6452_v56 = vpop.f32.mrf.mxu0 }
0x18c0   :  { %v6712_v46 = vpop.f32.mrf.mxu1 }
0x18c1   :  { %v6734_v47 = vpack.c.bf16 %v6712_v46, %v6710_v43 }
0x18c3   :  { %6808 = vmatmul.bf16.gmra.mxu0 %v6734_v47  ;;  %v6392_v47 = vadd.f32 %v10183_v49, %v10179_v34 }
0x18ce   :  { %v6466_v37 = vpop.f32.mrf.mxu2 }
0x18cf   :  { %v6467_v42 = vadd.f32 %v6466_v37, %v6438_v33  ;;  %v6421_v37 = vadd.f32 %v10173_v8, %v6392_v47 }
0x18d1   :  { %v9120_v40 = vmul.f32 -1.442695, %v6467_v42 }
0x18d3   :  { %9784 = vpow2.f32 %v9120_v40 }
0x18d6   :  { %v6468_v50 = vpop.f32.mrf.mxu2 }
0x18d7   :  { %v6469_v51 = vadd.f32 %v6468_v50, %v6440_v48  ;;  %v6450_v48 = vadd.f32 %v6449_v30, %v6421_v37 }
0x18d9   :  { %v9785_v52 = vpop.eup %9784  ;;  %v9121_v54 = vmul.f32 -1.442695, %v6469_v51 }
0x18da   :  { %v6510_v57 = vadd.f32 1.0, %v9785_v52 }
0x18db   :  { %9786 = vpow2.f32 %v9121_v54  ;;  %v6395_v54 = vadd.f32 %v10183_v49, %v10181_v45 }
0x18dc   :  { %9788 = vrcp.f32 %v6510_v57  ;;  %v6529_v62 = vand.u32 2147483648, %v6510_v57  ;;  %v6527_v9 = vand.u32 2147483647, %v6510_v57  ;;  %vm6523_vm11 = vweird.f32 %v6510_v57 }
0x18de   :  { %v6471_v60 = vpop.f32.mrf.mxu2  ;;  %v6530_v22 = vor.u32 1.1754944e-38, %v6529_v62  ;;  %vm6528_vm13 = vcmp.eq.f32.partialorder %v6527_v9, 8.507059e+37  ;;  %v6397_v62 = vadd.f32 %v10183_v49, %v10185_v29 }
0x18df   :  { %v6472_v61 = vadd.f32 %v6471_v60, %v6443_v58 }
0x18e0   :  { %v6426_v16 = vadd.f32 %v10177_v10, %v6397_v62 }
0x18e1   :  { %v9787_v63 = vpop.eup %9786  ;;  %v9122_v0 = vmul.f32 -1.442695, %v6472_v61  ;;  %v6424_v61 = vadd.f32 %v10175_v11, %v6395_v54 }
0x18e2   :  { %v9789_v1 = vpop.eup %9788  ;;  %v6511_v2 = vadd.f32 1.0, %v9787_v63 }
0x18e3   :  { %v6519_v12 = vmul.f32 %v9789_v1, %v6510_v57  ;;  %9790 = vpow2.f32 %v9122_v0  ;;  %vm6524_vm10 = vweird.f32 %v9789_v1  ;;  %v6453_v18 = vadd.f32 %v6452_v56, %v6424_v61 }
0x18e4   :  { %9792 = vrcp.f32 %v6511_v2  ;;  %vm6525_vm12 = vmor %vm6523_vm11, %vm6524_vm10  ;;  %v6544_v31 = vand.u32 2147483648, %v6511_v2  ;;  %v6542_v14 = vand.u32 2147483647, %v6511_v2  ;;  %vm6538_vm15 = vweird.f32 %v6511_v2 }
0x18e5   :  { %v6520_v5 = vsub.f32 1.0, %v6519_v12 }
0x18e6   :  { %v6473_v6 = vpop.f32.mrf.mxu2  ;;  %v6545_v42 = vor.u32 1.1754944e-38, %v6544_v31  ;;  %vm6543_vm1 = vcmp.eq.f32.partialorder %v6542_v14, 8.507059e+37 }
0x18e7   :  { %v6521_v7 = vmul.f32 %v9789_v1, %v6520_v5  ;;  %v6474_v15 = vadd.f32 %v6473_v6, %v6445_v4 }
0x18e9   :  { %v9791_v17 = vpop.eup %9790  ;;  %v6522_v19 = vadd.f32 %v9789_v1, %v6521_v7  ;;  %v9123_v20 = vmul.f32 -1.442695, %v6474_v15 }
0x18ea   :  { %v9793_v21 = vpop.eup %9792  ;;  %v6512_v23 = vadd.f32 1.0, %v9791_v17  ;;  %v6454_v17 = vpop.f32.mrf.mxu0 }
0x18eb   :  { %v6526_v24 = vsel %vm6525_vm12, %v9789_v1, %v6522_v19  ;;  %v6534_v25 = vmul.f32 %v9793_v21, %v6511_v2  ;;  %9794 = vpow2.f32 %v9123_v20  ;;  %vm6539_vm14 = vweird.f32 %v9793_v21 }
0x18ec   :  { %v6531_v26 = vsel %vm6528_vm13, %v6530_v22, %v6526_v24  ;;  %9796 = vrcp.f32 %v6512_v23  ;;  %vm6540_vm0 = vmor %vm6538_vm15, %vm6539_vm14  ;;  %v6559_v50 = vand.u32 2147483648, %v6512_v23  ;;  %v6557_v8 = vand.u32 2147483647, %v6512_v23 }
0x18ed   :  { %6638 = vst [vmem:[%s10268_s4] sm:$0xff] %v6531_v26  ;;  %v6535_v27 = vsub.f32 1.0, %v6534_v25  ;;  %vm6553_vm3 = vweird.f32 %v6512_v23 }
0x18ee   :  { %v6476_v43 = vpop.f32.mrf.mxu2  ;;  %v6560_v63 = vor.u32 1.1754944e-38, %v6559_v50  ;;  %vm6558_vm5 = vcmp.eq.f32.partialorder %v6557_v8, 8.507059e+37 }
0x18ef   :  { %v6536_v44 = vmul.f32 %v9793_v21, %v6535_v27  ;;  %v6477_v46 = vadd.f32 %v6476_v43, %v6448_v28 }
0x18f1   :  { %v9795_v32 = vpop.eup %9794  ;;  %v6537_v35 = vadd.f32 %v9793_v21, %v6536_v44  ;;  %v9124_v39 = vmul.f32 -1.442695, %v6477_v46 }
0x18f2   :  { %v9797_v33 = vpop.eup %9796  ;;  %v6513_v36 = vadd.f32 1.0, %v9795_v32 }
0x18f3   :  { %v6541_v38 = vsel %vm6540_vm0, %v9793_v21, %v6537_v35  ;;  %v6549_v40 = vmul.f32 %v9797_v33, %v6512_v23  ;;  %9798 = vpow2.f32 %v9124_v39  ;;  %vm6554_vm2 = vweird.f32 %v9797_v33  ;;  %v10221_v35 = vld [vmem:[#allocation6 + $0x90] ss:$0 sm:$0xff] }
0x18f4   :  { %v6546_v41 = vsel %vm6543_vm1, %v6545_v42, %v6541_v38  ;;  %9800 = vrcp.f32 %v6513_v36  ;;  %vm6555_vm4 = vmor %vm6553_vm3, %vm6554_vm2  ;;  %v6574_v12 = vand.u32 2147483648, %v6513_v36  ;;  %v6572_v11 = vand.u32 2147483647, %v6513_v36 }
0x18f5   :  { %6639 = vst [vmem:[%s10268_s4 + $0x8] sm:$0xff] %v6546_v41  ;;  %v6550_v34 = vsub.f32 1.0, %v6549_v40  ;;  %vm6568_vm7 = vweird.f32 %v6513_v36  ;;  %v6455_v23 = vadd.f32 %v6454_v17, %v6426_v16 }
0x18f6   :  { %v6478_v51 = vpop.f32.mrf.mxu2  ;;  %v6575_v19 = vor.u32 1.1754944e-38, %v6574_v12  ;;  %vm6573_vm9 = vcmp.eq.f32.partialorder %v6572_v11, 8.507059e+37 }
0x18f7   :  { %v6551_v52 = vmul.f32 %v9797_v33, %v6550_v34  ;;  %v6479_v53 = vadd.f32 %v6478_v51, %v6450_v48 }
0x18f9   :  { %v9799_v57 = vpop.eup %9798  ;;  %v6552_v55 = vadd.f32 %v9797_v33, %v6551_v52  ;;  %v9125_v58 = vmul.f32 -1.442695, %v6479_v53 }
0x18fa   :  { %v9801_v60 = vpop.eup %9800  ;;  %v6514_v59 = vadd.f32 1.0, %v9799_v57 }
0x18fb   :  { %v6556_v0 = vsel %vm6555_vm4, %v9797_v33, %v6552_v55  ;;  %v6564_v1 = vmul.f32 %v9801_v60, %v6513_v36  ;;  %9802 = vpow2.f32 %v9125_v58  ;;  %vm6569_vm6 = vweird.f32 %v9801_v60 }
0x18fc   :  { %v6561_v2 = vsel %vm6558_vm5, %v6560_v63, %v6556_v0  ;;  %9804 = vrcp.f32 %v6514_v59  ;;  %vm6570_vm8 = vmor %vm6568_vm7, %vm6569_vm6  ;;  %v6589_v29 = vand.u32 2147483648, %v6514_v59  ;;  %v6587_v10 = vand.u32 2147483647, %v6514_v59 }
0x18fd   :  { %6640 = vst [vmem:[%s10268_s4 + $0x10] sm:$0xff] %v6561_v2  ;;  %v6565_v45 = vsub.f32 1.0, %v6564_v1  ;;  %vm6583_vm11 = vweird.f32 %v6514_v59 }
0x18fe   :  { %v6481_v13 = vpop.f32.mrf.mxu2  ;;  %v6590_v43 = vor.u32 1.1754944e-38, %v6589_v29  ;;  %vm6588_vm13 = vcmp.eq.f32.partialorder %v6587_v10, 8.507059e+37 }
0x18ff   :  { %v6566_v4 = vmul.f32 %v9801_v60, %v6565_v45  ;;  %v6482_v5 = vadd.f32 %v6481_v13, %v6453_v18 }
0x1901   :  { %v9803_v6 = vpop.eup %9802  ;;  %v6567_v7 = vadd.f32 %v9801_v60, %v6566_v4  ;;  %v9126_v9 = vmul.f32 -1.442695, %v6482_v5 }
0x1902   :  { %v9805_v15 = vpop.eup %9804  ;;  %v6515_v20 = vadd.f32 1.0, %v9803_v6 }
0x1903   :  { %v6571_v21 = vsel %vm6570_vm8, %v9801_v60, %v6567_v7  ;;  %v6579_v3 = vmul.f32 %v9805_v15, %v6514_v59  ;;  %9806 = vpow2.f32 %v9126_v9  ;;  %vm6584_vm10 = vweird.f32 %v9805_v15 }
0x1904   :  { %v6576_v22 = vsel %vm6573_vm9, %v6575_v19, %v6571_v21  ;;  %9808 = vrcp.f32 %v6515_v20  ;;  %vm6585_vm12 = vmor %vm6583_vm11, %vm6584_vm10  ;;  %v6604_v39 = vand.u32 2147483648, %v6515_v20  ;;  %v6602_v37 = vand.u32 2147483647, %v6515_v20 }
0x1905   :  { %6641 = vst [vmem:[%s10268_s4 + $0x18] sm:$0xff] %v6576_v22  ;;  %v6580_v49 = vsub.f32 1.0, %v6579_v3  ;;  %vm6598_vm15 = vweird.f32 %v6515_v20 }
0x1906   :  { %v6483_v24 = vpop.f32.mrf.mxu2  ;;  %v6605_v48 = vor.u32 1.1754944e-38, %v6604_v39  ;;  %vm6603_vm1 = vcmp.eq.f32.partialorder %v6602_v37, 8.507059e+37 }
0x1907   :  { %v6581_v25 = vmul.f32 %v9805_v15, %v6580_v49  ;;  %v6484_v26 = vadd.f32 %v6483_v24, %v6455_v23 }
0x1909   :  { %v9807_v28 = vpop.eup %9806  ;;  %v6582_v27 = vadd.f32 %v9805_v15, %v6581_v25  ;;  %v9127_v30 = vmul.f32 -1.442695, %v6484_v26 }
0x190a   :  { %v9809_v31 = vpop.eup %9808  ;;  %v6516_v44 = vadd.f32 1.0, %v9807_v28 }
0x190b   :  { %v6586_v14 = vsel %vm6585_vm12, %v9805_v15, %v6582_v27  ;;  %v6594_v46 = vmul.f32 %v9809_v31, %v6515_v20  ;;  %9810 = vpow2.f32 %v9127_v30  ;;  %vm6599_vm14 = vweird.f32 %v9809_v31 }
0x190c   :  { %v6591_v47 = vsel %vm6588_vm13, %v6590_v43, %v6586_v14  ;;  %9812 = vrcp.f32 %v6516_v44  ;;  %vm6600_vm0 = vmor %vm6598_vm15, %vm6599_vm14  ;;  %v6619_v53 = vand.u32 2147483648, %v6516_v44  ;;  %v6617_v56 = vand.u32 2147483647, %v6516_v44 }
0x190d   :  { %6642 = vst [vmem:[%s10268_s4 + $0x20] sm:$0xff] %v6591_v47  ;;  %v6595_v32 = vsub.f32 1.0, %v6594_v46  ;;  %vm6613_vm3 = vweird.f32 %v6516_v44 }
0x190e   :  { %v6620_v61 = vor.u32 1.1754944e-38, %v6619_v53  ;;  %vm6618_vm5 = vcmp.eq.f32.partialorder %v6617_v56, 8.507059e+37 }
0x190f   :  { %v6596_v33 = vmul.f32 %v9809_v31, %v6595_v32 }
0x1910   :  { %v6794_v42 = vpop.f32.mrf.mxu0 }
0x1911   :  { %v9811_v36 = vpop.eup %9810  ;;  %v6597_v38 = vadd.f32 %v9809_v31, %v6596_v33  ;;  %v6795_v40 = vadd.f32 %v10221_v35, %v6794_v42 }
0x1912   :  { %v9813_v41 = vpop.eup %9812  ;;  %v6517_v34 = vadd.f32 1.0, %v9811_v36 }
0x1913   :  { %v6601_v50 = vsel %vm6600_vm0, %v9809_v31, %v6597_v38  ;;  %v6609_v51 = vmul.f32 %v9813_v41, %v6516_v44  ;;  %9180 = vst [vmem:[%s10268_s4 + $0x40] sm:$0xff] %v6795_v40  ;;  %vm6614_vm2 = vweird.f32 %v9813_v41 }
0x1914   :  { %v6606_v52 = vsel %vm6603_vm1, %v6605_v48, %v6601_v50  ;;  %9814 = vrcp.f32 %v6517_v34  ;;  %vm6615_vm4 = vmor %vm6613_vm3, %vm6614_vm2  ;;  %v6634_v2 = vand.u32 2147483648, %v6517_v34  ;;  %v6632_v45 = vand.u32 2147483647, %v6517_v34 }
0x1915   :  { %6643 = vst [vmem:[%s10268_s4 + $0x28] sm:$0xff] %v6606_v52  ;;  %v6610_v8 = vsub.f32 1.0, %v6609_v51  ;;  %vm6628_vm7 = vweird.f32 %v6517_v34 }
0x1916   :  { %v6635_v11 = vor.u32 1.1754944e-38, %v6634_v2  ;;  %vm6633_vm9 = vcmp.eq.f32.partialorder %v6632_v45, 8.507059e+37 }
0x1917   :  { %v6611_v54 = vmul.f32 %v9813_v41, %v6610_v8 }
0x1918   :  { %v6796_v57 = vpop.f32.mrf.mxu0 }
0x1919   :  { %v6612_v55 = vadd.f32 %v9813_v41, %v6611_v54  ;;  %v6797_v58 = vadd.f32 %v10221_v35, %v6796_v57 }
0x191a   :  { %v9815_v60 = vpop.eup %9814 }
0x191b   :  { %v6616_v63 = vsel %vm6615_vm4, %v9813_v41, %v6612_v55  ;;  %v6624_v59 = vmul.f32 %v9815_v60, %v6517_v34  ;;  %9181 = vst [vmem:[%s10268_s4 + $0x48] sm:$0xff] %v6797_v58  ;;  %vm6629_vm6 = vweird.f32 %v9815_v60 }
0x191c   :  { %v6621_v0 = vsel %vm6618_vm5, %v6620_v61, %v6616_v63  ;;  %vm6630_vm8 = vmor %vm6628_vm7, %vm6629_vm6 }
0x191d   :  { %6644 = vst [vmem:[%s10268_s4 + $0x30] sm:$0xff] %v6621_v0  ;;  %v6625_v1 = vsub.f32 1.0, %v6624_v59 }
0x191f   :  { %v6626_v18 = vmul.f32 %v9815_v60, %v6625_v1 }
0x1920   :  { %v6799_v12 = vpop.f32.mrf.mxu0 }
0x1921   :  { %v6627_v13 = vadd.f32 %v9815_v60, %v6626_v18  ;;  %v6800_v4 = vadd.f32 %v10221_v35, %v6799_v12 }
0x1923   :  { %v6631_v5 = vsel %vm6630_vm8, %v9815_v60, %v6627_v13  ;;  %9182 = vst [vmem:[%s10268_s4 + $0x50] sm:$0xff] %v6800_v4 }
0x1924   :  { %v6636_v62 = vsel %vm6633_vm9, %v6635_v11, %v6631_v5 }
0x1925   :  { %6645 = vst [vmem:[%s10268_s4 + $0x38] sm:$0xff] %v6636_v62 }
0x1928   :  { %v6801_v6 = vpop.f32.mrf.mxu0 }
0x1929   :  { %v6802_v7 = vadd.f32 %v10221_v35, %v6801_v6 }
0x192b   :  { %9183 = vst [vmem:[%s10268_s4 + $0x58] sm:$0xff] %v6802_v7 }
0x1930   :  { %v6804_v9 = vpop.f32.mrf.mxu0 }
0x1931   :  { %v6805_v15 = vadd.f32 %v10221_v35, %v6804_v9 }
0x1933   :  { %9184 = vst [vmem:[%s10268_s4 + $0x60] sm:$0xff] %v6805_v15 }
0x1938   :  { %v6806_v16 = vpop.f32.mrf.mxu0 }
0x1939   :  { %v6807_v17 = vadd.f32 %v10221_v35, %v6806_v16 }
0x193b   :  { %9185 = vst [vmem:[%s10268_s4 + $0x68] sm:$0xff] %v6807_v17 }
0x1940   :  { %v6809_v19 = vpop.f32.mrf.mxu0 }
0x1941   :  { %v6810_v20 = vadd.f32 %v10221_v35, %v6809_v19 }
0x1943   :  { %9186 = vst [vmem:[%s10268_s4 + $0x70] sm:$0xff] %v6810_v20 }
0x1948   :  { %v6811_v21 = vpop.f32.mrf.mxu0 }
0x1949   :  { %v6812_v3 = vadd.f32 %v10221_v35, %v6811_v21 }
0x194b   :  { %9187 = vst [vmem:[%s10268_s4 + $0x78] sm:$0xff] %v6812_v3 }
0x194c   :  { %6831 = vsyncpa [#allocation3], 1 }
0x194d   :  { %6832 = vsyncpa [#allocation5], 1 }

</bundles_post_ra>
